<compile_context>
chip_gen: v6e
topology: v6e:2x2x1
jax: 0.10.0
libtpu: 0.0.40
codegen_flags: <defaults>
</compile_context>

<pallas_src>
import jax
import jax.numpy as jnp
from jax.experimental import pallas as pl
from jax.experimental.pallas import tpu as pltpu


# ------------------------------ fused kernel ---------------------------------

def _make_decoder_kernel(depth, hidden, t_chunk, batch):
    H = hidden

    def kernel(*refs):
        # refs: x, w0_ih, w0_hh, b0, (w_l, b_l)*(depth-1), fc_w, fc_b,
        #       out, h_scr, c_scr, xg_scr, htop_scr
        x_ref = refs[0]
        w0ih_ref, w0hh_ref, b0_ref = refs[1:4]
        pos = 4
        deep = []
        for _ in range(depth - 1):
            deep.append((refs[pos], refs[pos + 1]))
            pos += 2
        fcw_ref, fcb_ref = refs[pos], refs[pos + 1]
        out_ref = refs[pos + 2]
        h_scr, c_scr, xg_scr, htop_scr = refs[pos + 3:pos + 7]

        @pl.when(pl.program_id(0) == 0)
        def _():
            h_scr[...] = jnp.zeros_like(h_scr)
            c_scr[...] = jnp.zeros_like(c_scr)

        # Chunk-wide layer-0 input projection (off the serial critical path).
        x = x_ref[...]                                           # (t_chunk*B, D_in)
        xg_scr[...] = (
            jnp.dot(x.astype(jnp.bfloat16), w0ih_ref[...],
                    preferred_element_type=jnp.float32)
            + b0_ref[...])                                       # (t_chunk*B, 4H) f32

        def cell(gates, c_prev):
            # One fused sigmoid over the whole lane-dense (B, 4H) block.  The g
            # columns were pre-scaled by 2, so tanh(z_g) = 2*sigmoid(2*z_g) - 1.
            s = jax.nn.sigmoid(gates)
            i = s[:, 0 * H:1 * H]
            f = s[:, 1 * H:2 * H]
            g = 2.0 * s[:, 2 * H:3 * H] - 1.0
            o = s[:, 3 * H:4 * H]
            c_new = f * c_prev + i * g
            h_new = o * jnp.tanh(c_new)
            return h_new, c_new

        def step(t, carry):
            row = t * batch
            # Layer 0: only the recurrent term is on the serial path.
            gates = xg_scr[pl.ds(row, batch), :] + jnp.dot(
                h_scr[0].astype(jnp.bfloat16), w0hh_ref[...],
                preferred_element_type=jnp.float32)
            h, c = cell(gates, c_scr[0])
            h_scr[0] = h
            c_scr[0] = c
            # Deeper layers: one combined (2H, 4H) matmul each.
            for l in range(1, depth):
                w_ref, b_ref = deep[l - 1]
                inp = jnp.concatenate([h, h_scr[l]], axis=-1)    # (B, 2H)
                gates = jnp.dot(inp.astype(jnp.bfloat16), w_ref[...],
                                preferred_element_type=jnp.float32) + b_ref[...]
                h, c = cell(gates, c_scr[l])
                h_scr[l] = h
                c_scr[l] = c
            htop_scr[pl.ds(row, batch), :] = h
            return carry

        jax.lax.fori_loop(0, t_chunk, step, 0, unroll=True)

        # FC + sigmoid head over the whole chunk; output is 128-lane padded so
        # the stores are unmasked (lane-dense out_spec).
        logits = jnp.dot(htop_scr[...].astype(jnp.bfloat16), fcw_ref[...],
                         preferred_element_type=jnp.float32) + fcb_ref[...]
        out_ref[...] = jax.nn.sigmoid(logits)

    return kernel


def _const_spec(arr):
    assert arr.ndim == 2
    return pl.BlockSpec(arr.shape, lambda t: (0, 0))


def lstm_decoder_forward(x, kparams, *, t_chunk=32):
    """x: (batch, seq, input_size), batch_first like the PyTorch module.
    Returns (batch, seq, output_size) = Sigmoid(Linear(LSTM(x)))."""
    B, T, D_in = x.shape
    H = kparams["hidden"]
    L = kparams["depth"]
    O = kparams["output_size"]
    O_pad = kparams["fc_w"].shape[1]

    t_chunk = max(1, min(t_chunk, T))
    if T > t_chunk:
        # keep the flattened (t_chunk*B) sublane dim 8-aligned when tiling.
        while (t_chunk * B) % 8 != 0:
            t_chunk += 1
    n_chunks = pl.cdiv(T, t_chunk)
    T_pad = n_chunks * t_chunk

    x_tm = jnp.transpose(x.astype(jnp.float32), (1, 0, 2))       # (T, B, D_in)
    if T_pad != T:
        x_tm = jnp.pad(x_tm, ((0, T_pad - T), (0, 0), (0, 0)))   # pad tail steps
    x_flat = x_tm.reshape(T_pad * B, D_in)                       # time-major rows

    args = [x_flat, kparams["w0_ih"], kparams["w0_hh"], kparams["b0"]]
    in_specs = [pl.BlockSpec((t_chunk * B, D_in), lambda t: (t, 0)),
                _const_spec(kparams["w0_ih"]),
                _const_spec(kparams["w0_hh"]),
                _const_spec(kparams["b0"])]
    for (w, b) in kparams["deep"]:
        args += [w, b]
        in_specs += [_const_spec(w), _const_spec(b)]
    args += [kparams["fc_w"], kparams["fc_b"]]
    in_specs += [_const_spec(kparams["fc_w"]), _const_spec(kparams["fc_b"])]

    kernel = _make_decoder_kernel(L, H, t_chunk, B)
    out_flat = pl.pallas_call(
        kernel,
        out_shape=jax.ShapeDtypeStruct((T_pad * B, O_pad), jnp.float32),
        grid_spec=pltpu.PrefetchScalarGridSpec(
            num_scalar_prefetch=0,
            grid=(n_chunks,),
            in_specs=in_specs,
            out_specs=pl.BlockSpec((t_chunk * B, O_pad), lambda t: (t, 0)),
            scratch_shapes=[
                pltpu.VMEM((L, B, H), jnp.float32),              # h carry (all layers)
                pltpu.VMEM((L, B, H), jnp.float32),              # c carry (all layers)
                pltpu.VMEM((t_chunk * B, 4 * H), jnp.float32),   # layer-0 x @ W_ih
                pltpu.VMEM((t_chunk * B, H), jnp.float32),       # top-layer h per chunk
            ]),
        compiler_params=pltpu.CompilerParams(
            dimension_semantics=("arbitrary",)),                 # sequential over time
    )(*args)

    out = out_flat.reshape(T_pad, B, O_pad)[:T, :, :O]
    return jnp.transpose(out, (1, 0, 2))                         # -> (B, T, O)


# --------------------------- params (PyTorch layout) ---------------------------

def init_lstm_decoder_params(key, input_size, hidden_nodes, output_size,
                             rnn_depth=3):
    """Synthetic params in PyTorch nn.LSTM / nn.Linear storage convention."""
    bound = 1.0 / (hidden_nodes ** 0.5)
    params = {"lstm": []}
    for layer in range(rnn_depth):
        d_in = input_size if layer == 0 else hidden_nodes
        key, k1, k2, k3, k4 = jax.random.split(key, 5)
        w_ih = jax.random.uniform(k1, (4 * hidden_nodes, d_in),
                                  minval=-bound, maxval=bound, dtype=jnp.float32)
        w_hh = jax.random.uniform(k2, (4 * hidden_nodes, hidden_nodes),
                                  minval=-bound, maxval=bound, dtype=jnp.float32)
        b_ih = jax.random.uniform(k3, (4 * hidden_nodes,),
                                  minval=-bound, maxval=bound, dtype=jnp.float32)
        b_hh = jax.random.uniform(k4, (4 * hidden_nodes,),
                                  minval=-bound, maxval=bound, dtype=jnp.float32)
        params["lstm"].append((w_ih, w_hh, b_ih, b_hh))
    key, k1, k2 = jax.random.split(key, 3)
    params["fc_w"] = jax.random.uniform(k1, (output_size, hidden_nodes),
                                        minval=-bound, maxval=bound, dtype=jnp.float32)
    params["fc_b"] = jax.random.uniform(k2, (output_size,),
                                        minval=-bound, maxval=bound, dtype=jnp.float32)
    return params


def _prescale_g(a, H):
    """Scale the g-gate block (cols 2H:3H of the 4H axis) by 2 so one fused
    sigmoid recovers tanh via tanh(z) = 2*sigmoid(2z) - 1."""
    scale = jnp.concatenate([jnp.ones((2 * H,), a.dtype),
                             jnp.full((H,), 2.0, a.dtype),
                             jnp.ones((H,), a.dtype)])
    return a * scale


def pack_params_for_kernel(params, hidden, output_size):
    """Repack PyTorch-convention params into fused-kernel layout: transposed
    (in, 4H) weights, combined input+recurrent weights for layers > 0, merged
    biases, g-gate pre-scaling, bf16 matmul operands, 128-lane padded FC head."""
    H = hidden
    layers = params["lstm"]
    w_ih0, w_hh0, b_ih0, b_hh0 = layers[0]
    packed = {
        "depth": len(layers),
        "hidden": H,
        "output_size": output_size,
        "w0_ih": _prescale_g(w_ih0.T, H).astype(jnp.bfloat16),       # (D_in, 4H)
        "w0_hh": _prescale_g(w_hh0.T, H).astype(jnp.bfloat16),       # (H, 4H)
        "b0": _prescale_g((b_ih0 + b_hh0)[None, :], H),              # (1, 4H) f32
        "deep": [],
    }
    for (w_ih, w_hh, b_ih, b_hh) in layers[1:]:
        w = jnp.concatenate([w_ih.T, w_hh.T], axis=0)                # (2H, 4H)
        packed["deep"].append(
            (_prescale_g(w, H).astype(jnp.bfloat16),
             _prescale_g((b_ih + b_hh)[None, :], H)))
    O = output_size
    O_pad = ((O + 127) // 128) * 128
    fc_w = jnp.zeros((H, O_pad), jnp.float32).at[:, :O].set(params["fc_w"].T)
    fc_b = jnp.zeros((1, O_pad), jnp.float32).at[:, :O].set(params["fc_b"][None, :])
    packed["fc_w"] = fc_w.astype(jnp.bfloat16)
    packed["fc_b"] = fc_b
    return packed


# ------------------------------ pure-JAX reference -----------------------------

def lstm_decoder_reference(x, params):
    """f32 reference with exact nn.LSTM (i,f,g,o) semantics, for validation."""
    seq = x.astype(jnp.float32)
    B = seq.shape[0]
    for (w_ih, w_hh, b_ih, b_hh) in params["lstm"]:
        H = w_hh.shape[1]
        h = jnp.zeros((B, H), jnp.float32)
        c = jnp.zeros((B, H), jnp.float32)
        outs = []
        for t in range(seq.shape[1]):
            z = seq[:, t] @ w_ih.T + h @ w_hh.T + b_ih + b_hh
            i = jax.nn.sigmoid(z[:, 0 * H:1 * H])
            f = jax.nn.sigmoid(z[:, 1 * H:2 * H])
            g = jnp.tanh(z[:, 2 * H:3 * H])
            o = jax.nn.sigmoid(z[:, 3 * H:4 * H])
            c = f * c + i * g
            h = o * jnp.tanh(c)
            outs.append(h)
        seq = jnp.stack(outs, axis=1)
    return jax.nn.sigmoid(seq @ params["fc_w"].T + params["fc_b"])


# ----------------------------------- main --------------------------------------

if __name__ == "__main__":
    batch = 2
    seq = 8
    input_size = 16
    hidden_nodes = 32
    output_size = 8
    rnn_depth = 3

    key = jax.random.PRNGKey(0)
    key, xk, pk = jax.random.split(key, 3)
    x = jax.random.normal(xk, (batch, seq, input_size), dtype=jnp.float32)
    params = init_lstm_decoder_params(pk, input_size, hidden_nodes, output_size,
                                      rnn_depth)
    kparams = pack_params_for_kernel(params, hidden_nodes, output_size)

    out = lstm_decoder_forward(x, kparams)
    out = jax.block_until_ready(out)
    assert out.shape == (batch, seq, output_size)
    assert bool(jnp.all(jnp.isfinite(out)))
    assert bool(jnp.all((out >= 0.0) & (out <= 1.0)))        # sigmoid range

    ref = lstm_decoder_reference(x, params)
    max_err = float(jnp.max(jnp.abs(out - ref)))
    assert max_err < 5e-2, max_err                           # bf16-matmul tolerance
    print("KERNEL_OK")
</pallas_src>

<mosaic_0001>
module attributes {stable_mosaic.version = 11 : i64} {
  func.func @kernel(%arg0: i32, %arg1: memref<16x16xf32, #tpu.memory_space<vmem>>, %arg2: memref<16x128xbf16, #tpu.memory_space<vmem>>, %arg3: memref<32x128xbf16, #tpu.memory_space<vmem>>, %arg4: memref<1x128xf32, #tpu.memory_space<vmem>>, %arg5: memref<64x128xbf16, #tpu.memory_space<vmem>>, %arg6: memref<1x128xf32, #tpu.memory_space<vmem>>, %arg7: memref<64x128xbf16, #tpu.memory_space<vmem>>, %arg8: memref<1x128xf32, #tpu.memory_space<vmem>>, %arg9: memref<32x128xbf16, #tpu.memory_space<vmem>>, %arg10: memref<1x128xf32, #tpu.memory_space<vmem>>, %arg11: memref<16x128xf32, #tpu.memory_space<vmem>>, %arg12: memref<3x2x32xf32, #tpu.memory_space<vmem>>, %arg13: memref<3x2x32xf32, #tpu.memory_space<vmem>>, %arg14: memref<16x128xf32, #tpu.memory_space<vmem>>, %arg15: memref<16x32xf32, #tpu.memory_space<vmem>>) attributes {dimension_semantics = [#tpu.dimension_semantics<arbitrary>], iteration_bounds = array<i64: 1>, scalar_prefetch = 0 : i64, scratch_operands = 4 : i64, tpu.core_type = #tpu.core_type<tc>, window_params = [{transform_indices = @transform_0, window_bounds = array<i64: 16, 16>}, {pipeline_mode = #tpu.pipeline_mode<synchronous>, transform_indices = @transform_1, window_bounds = array<i64: 16, 128>}, {pipeline_mode = #tpu.pipeline_mode<synchronous>, transform_indices = @transform_2, window_bounds = array<i64: 32, 128>}, {pipeline_mode = #tpu.pipeline_mode<synchronous>, transform_indices = @transform_3, window_bounds = array<i64: 1, 128>}, {pipeline_mode = #tpu.pipeline_mode<synchronous>, transform_indices = @transform_4, window_bounds = array<i64: 64, 128>}, {pipeline_mode = #tpu.pipeline_mode<synchronous>, transform_indices = @transform_5, window_bounds = array<i64: 1, 128>}, {pipeline_mode = #tpu.pipeline_mode<synchronous>, transform_indices = @transform_6, window_bounds = array<i64: 64, 128>}, {pipeline_mode = #tpu.pipeline_mode<synchronous>, transform_indices = @transform_7, window_bounds = array<i64: 1, 128>}, {pipeline_mode = #tpu.pipeline_mode<synchronous>, transform_indices = @transform_8, window_bounds = array<i64: 32, 128>}, {pipeline_mode = #tpu.pipeline_mode<synchronous>, transform_indices = @transform_9, window_bounds = array<i64: 1, 128>}, {transform_indices = @transform_10, window_bounds = array<i64: 16, 128>}]} {
    %c0_i32 = arith.constant 0 : i32
    %0 = arith.cmpi eq, %arg0, %c0_i32 : i32
    %1 = arith.extui %0 : i1 to i32
    %c0_i32_0 = arith.constant 0 : i32
    %2 = arith.cmpi ne, %1, %c0_i32_0 : i32
    scf.if %2 {
      %cst_505 = arith.constant 0.000000e+00 : f32
      %880 = vector.broadcast %cst_505 : f32 to vector<3x2x32xf32>
      %c0_506 = arith.constant 0 : index
      %c0_507 = arith.constant 0 : index
      %c0_508 = arith.constant 0 : index
      %881 = vector.load %arg12[%c0_506, %c0_507, %c0_508] : memref<3x2x32xf32, #tpu.memory_space<vmem>>, vector<3x2x32xf32>
      tpu.vector_store %arg12[%c0_506, %c0_507, %c0_508], %880 {strides = array<i32>} : memref<3x2x32xf32, #tpu.memory_space<vmem>>, vector<3x2x32xf32>,
      %cst_509 = arith.constant 0.000000e+00 : f32
      %882 = vector.broadcast %cst_509 : f32 to vector<3x2x32xf32>
      %c0_510 = arith.constant 0 : index
      %c0_511 = arith.constant 0 : index
      %c0_512 = arith.constant 0 : index
      %883 = vector.load %arg13[%c0_510, %c0_511, %c0_512] : memref<3x2x32xf32, #tpu.memory_space<vmem>>, vector<3x2x32xf32>
      tpu.vector_store %arg13[%c0_510, %c0_511, %c0_512], %882 {strides = array<i32>} : memref<3x2x32xf32, #tpu.memory_space<vmem>>, vector<3x2x32xf32>,
    } else {
    }
    %c0 = arith.constant 0 : index
    %c0_1 = arith.constant 0 : index
    %3 = vector.load %arg1[%c0, %c0_1] : memref<16x16xf32, #tpu.memory_space<vmem>>, vector<16x16xf32>
    %4 = arith.truncf %3 : vector<16x16xf32> to vector<16x16xbf16>
    %c0_2 = arith.constant 0 : index
    %c0_3 = arith.constant 0 : index
    %5 = vector.load %arg2[%c0_2, %c0_3] : memref<16x128xbf16, #tpu.memory_space<vmem>>, vector<16x128xbf16>
    %cst = arith.constant dense<0.000000e+00> : vector<16x128xf32>
    %6 = tpu.matmul %4, %5, %cst {dimension_numbers = #tpu.dot_dimension_numbers<[1], [0], [0], [1], [0, 0, 1, 1], [], []>} : vector<16x16xbf16>, vector<16x128xbf16>, vector<16x128xf32> -> vector<16x128xf32>
    %c0_4 = arith.constant 0 : index
    %c0_5 = arith.constant 0 : index
    %7 = vector.load %arg4[%c0_4, %c0_5] : memref<1x128xf32, #tpu.memory_space<vmem>>, vector<1x128xf32>
    %8 = vector.broadcast %7 : vector<1x128xf32> to vector<16x128xf32>
    %9 = arith.addf %6, %8 : vector<16x128xf32>
    %c0_6 = arith.constant 0 : index
    %c0_7 = arith.constant 0 : index
    %10 = vector.load %arg14[%c0_6, %c0_7] : memref<16x128xf32, #tpu.memory_space<vmem>>, vector<16x128xf32>
    tpu.vector_store %arg14[%c0_6, %c0_7], %9 {strides = array<i32>} : memref<16x128xf32, #tpu.memory_space<vmem>>, vector<16x128xf32>,
    %c0_i32_8 = arith.constant 0 : i32
    %c2_i32 = arith.constant 2 : i32
    %11 = arith.muli %c0_i32_8, %c2_i32 : i32
    %12 = arith.index_cast %11 : i32 to index
    %c0_9 = arith.constant 0 : index
    %13 = vector.load %arg14[%12, %c0_9] : memref<16x128xf32, #tpu.memory_space<vmem>>, vector<2x128xf32>
    %c0_10 = arith.constant 0 : index
    %c0_11 = arith.constant 0 : index
    %c0_12 = arith.constant 0 : index
    %14 = vector.load %arg12[%c0_10, %c0_11, %c0_12] : memref<3x2x32xf32, #tpu.memory_space<vmem>>, vector<1x2x32xf32>
    %15 = vector.shape_cast %14 : vector<1x2x32xf32> to vector<2x32xf32>
    %16 = arith.truncf %15 : vector<2x32xf32> to vector<2x32xbf16>
    %c0_13 = arith.constant 0 : index
    %c0_14 = arith.constant 0 : index
    %17 = vector.load %arg3[%c0_13, %c0_14] : memref<32x128xbf16, #tpu.memory_space<vmem>>, vector<32x128xbf16>
    %cst_15 = arith.constant dense<0.000000e+00> : vector<2x128xf32>
    %18 = tpu.matmul %16, %17, %cst_15 {dimension_numbers = #tpu.dot_dimension_numbers<[1], [0], [0], [1], [0, 0, 1, 1], [], []>} : vector<2x32xbf16>, vector<32x128xbf16>, vector<2x128xf32> -> vector<2x128xf32>
    %19 = arith.addf %13, %18 : vector<2x128xf32>
    %c0_16 = arith.constant 0 : index
    %c0_17 = arith.constant 0 : index
    %c0_18 = arith.constant 0 : index
    %20 = vector.load %arg13[%c0_16, %c0_17, %c0_18] : memref<3x2x32xf32, #tpu.memory_space<vmem>>, vector<1x2x32xf32>
    %21 = vector.shape_cast %20 : vector<1x2x32xf32> to vector<2x32xf32>
    %22 = arith.negf %19 : vector<2x128xf32>
    %23 = math.exp %22 : vector<2x128xf32>
    %cst_19 = arith.constant 1.000000e+00 : f32
    %24 = vector.broadcast %cst_19 : f32 to vector<2x128xf32>
    %25 = arith.addf %24, %23 : vector<2x128xf32>
    %26 = arith.divf %24, %25 : vector<2x128xf32>
    %27 = vector.extract_strided_slice %26 {offsets = [0, 0], sizes = [2, 32], strides = [1, 1]} : vector<2x128xf32> to vector<2x32xf32>
    %28 = vector.extract_strided_slice %26 {offsets = [0, 32], sizes = [2, 32], strides = [1, 1]} : vector<2x128xf32> to vector<2x32xf32>
    %29 = vector.extract_strided_slice %26 {offsets = [0, 64], sizes = [2, 32], strides = [1, 1]} : vector<2x128xf32> to vector<2x32xf32>
    %cst_20 = arith.constant 2.000000e+00 : f32
    %30 = vector.broadcast %cst_20 : f32 to vector<2x32xf32>
    %31 = arith.mulf %30, %29 : vector<2x32xf32>
    %cst_21 = arith.constant 1.000000e+00 : f32
    %32 = vector.broadcast %cst_21 : f32 to vector<2x32xf32>
    %33 = arith.subf %31, %32 : vector<2x32xf32>
    %34 = vector.extract_strided_slice %26 {offsets = [0, 96], sizes = [2, 32], strides = [1, 1]} : vector<2x128xf32> to vector<2x32xf32>
    %35 = arith.mulf %28, %21 : vector<2x32xf32>
    %36 = arith.mulf %27, %33 : vector<2x32xf32>
    %37 = arith.addf %35, %36 : vector<2x32xf32>
    %38 = math.tanh %37 : vector<2x32xf32>
    %39 = arith.mulf %34, %38 : vector<2x32xf32>
    %c0_22 = arith.constant 0 : index
    %c0_23 = arith.constant 0 : index
    %c0_24 = arith.constant 0 : index
    %40 = vector.load %arg12[%c0_22, %c0_23, %c0_24] : memref<3x2x32xf32, #tpu.memory_space<vmem>>, vector<1x2x32xf32>
    %41 = vector.shape_cast %40 : vector<1x2x32xf32> to vector<2x32xf32>
    %42 = vector.shape_cast %39 : vector<2x32xf32> to vector<1x2x32xf32>
    tpu.vector_store %arg12[%c0_22, %c0_23, %c0_24], %42 {strides = array<i32>} : memref<3x2x32xf32, #tpu.memory_space<vmem>>, vector<1x2x32xf32>,
    %c0_25 = arith.constant 0 : index
    %c0_26 = arith.constant 0 : index
    %c0_27 = arith.constant 0 : index
    %43 = vector.load %arg13[%c0_25, %c0_26, %c0_27] : memref<3x2x32xf32, #tpu.memory_space<vmem>>, vector<1x2x32xf32>
    %44 = vector.shape_cast %43 : vector<1x2x32xf32> to vector<2x32xf32>
    %45 = vector.shape_cast %37 : vector<2x32xf32> to vector<1x2x32xf32>
    tpu.vector_store %arg13[%c0_25, %c0_26, %c0_27], %45 {strides = array<i32>} : memref<3x2x32xf32, #tpu.memory_space<vmem>>, vector<1x2x32xf32>,
    %c1 = arith.constant 1 : index
    %c0_28 = arith.constant 0 : index
    %c0_29 = arith.constant 0 : index
    %46 = vector.load %arg12[%c1, %c0_28, %c0_29] : memref<3x2x32xf32, #tpu.memory_space<vmem>>, vector<1x2x32xf32>
    %47 = vector.shape_cast %46 : vector<1x2x32xf32> to vector<2x32xf32>
    %48 = tpu.concatenate %39, %47 in 1 : vector<2x32xf32>, vector<2x32xf32> -> vector<2x64xf32>
    %49 = arith.truncf %48 : vector<2x64xf32> to vector<2x64xbf16>
    %c0_30 = arith.constant 0 : index
    %c0_31 = arith.constant 0 : index
    %50 = vector.load %arg5[%c0_30, %c0_31] : memref<64x128xbf16, #tpu.memory_space<vmem>>, vector<64x128xbf16>
    %cst_32 = arith.constant dense<0.000000e+00> : vector<2x128xf32>
    %51 = tpu.matmul %49, %50, %cst_32 {dimension_numbers = #tpu.dot_dimension_numbers<[1], [0], [0], [1], [0, 0, 1, 1], [], []>} : vector<2x64xbf16>, vector<64x128xbf16>, vector<2x128xf32> -> vector<2x128xf32>
    %c0_33 = arith.constant 0 : index
    %c0_34 = arith.constant 0 : index
    %52 = vector.load %arg6[%c0_33, %c0_34] : memref<1x128xf32, #tpu.memory_space<vmem>>, vector<1x128xf32>
    %53 = vector.broadcast %52 : vector<1x128xf32> to vector<2x128xf32>
    %54 = arith.addf %51, %53 : vector<2x128xf32>
    %c1_35 = arith.constant 1 : index
    %c0_36 = arith.constant 0 : index
    %c0_37 = arith.constant 0 : index
    %55 = vector.load %arg13[%c1_35, %c0_36, %c0_37] : memref<3x2x32xf32, #tpu.memory_space<vmem>>, vector<1x2x32xf32>
    %56 = vector.shape_cast %55 : vector<1x2x32xf32> to vector<2x32xf32>
    %57 = arith.negf %54 : vector<2x128xf32>
    %58 = math.exp %57 : vector<2x128xf32>
    %cst_38 = arith.constant 1.000000e+00 : f32
    %59 = vector.broadcast %cst_38 : f32 to vector<2x128xf32>
    %60 = arith.addf %59, %58 : vector<2x128xf32>
    %61 = arith.divf %59, %60 : vector<2x128xf32>
    %62 = vector.extract_strided_slice %61 {offsets = [0, 0], sizes = [2, 32], strides = [1, 1]} : vector<2x128xf32> to vector<2x32xf32>
    %63 = vector.extract_strided_slice %61 {offsets = [0, 32], sizes = [2, 32], strides = [1, 1]} : vector<2x128xf32> to vector<2x32xf32>
    %64 = vector.extract_strided_slice %61 {offsets = [0, 64], sizes = [2, 32], strides = [1, 1]} : vector<2x128xf32> to vector<2x32xf32>
    %cst_39 = arith.constant 2.000000e+00 : f32
    %65 = vector.broadcast %cst_39 : f32 to vector<2x32xf32>
    %66 = arith.mulf %65, %64 : vector<2x32xf32>
    %cst_40 = arith.constant 1.000000e+00 : f32
    %67 = vector.broadcast %cst_40 : f32 to vector<2x32xf32>
    %68 = arith.subf %66, %67 : vector<2x32xf32>
    %69 = vector.extract_strided_slice %61 {offsets = [0, 96], sizes = [2, 32], strides = [1, 1]} : vector<2x128xf32> to vector<2x32xf32>
    %70 = arith.mulf %63, %56 : vector<2x32xf32>
    %71 = arith.mulf %62, %68 : vector<2x32xf32>
    %72 = arith.addf %70, %71 : vector<2x32xf32>
    %73 = math.tanh %72 : vector<2x32xf32>
    %74 = arith.mulf %69, %73 : vector<2x32xf32>
    %c1_41 = arith.constant 1 : index
    %c0_42 = arith.constant 0 : index
    %c0_43 = arith.constant 0 : index
    %75 = vector.load %arg12[%c1_41, %c0_42, %c0_43] : memref<3x2x32xf32, #tpu.memory_space<vmem>>, vector<1x2x32xf32>
    %76 = vector.shape_cast %75 : vector<1x2x32xf32> to vector<2x32xf32>
    %77 = vector.shape_cast %74 : vector<2x32xf32> to vector<1x2x32xf32>
    tpu.vector_store %arg12[%c1_41, %c0_42, %c0_43], %77 {strides = array<i32>} : memref<3x2x32xf32, #tpu.memory_space<vmem>>, vector<1x2x32xf32>,
    %c1_44 = arith.constant 1 : index
    %c0_45 = arith.constant 0 : index
    %c0_46 = arith.constant 0 : index
    %78 = vector.load %arg13[%c1_44, %c0_45, %c0_46] : memref<3x2x32xf32, #tpu.memory_space<vmem>>, vector<1x2x32xf32>
    %79 = vector.shape_cast %78 : vector<1x2x32xf32> to vector<2x32xf32>
    %80 = vector.shape_cast %72 : vector<2x32xf32> to vector<1x2x32xf32>
    tpu.vector_store %arg13[%c1_44, %c0_45, %c0_46], %80 {strides = array<i32>} : memref<3x2x32xf32, #tpu.memory_space<vmem>>, vector<1x2x32xf32>,
    %c2 = arith.constant 2 : index
    %c0_47 = arith.constant 0 : index
    %c0_48 = arith.constant 0 : index
    %81 = vector.load %arg12[%c2, %c0_47, %c0_48] : memref<3x2x32xf32, #tpu.memory_space<vmem>>, vector<1x2x32xf32>
    %82 = vector.shape_cast %81 : vector<1x2x32xf32> to vector<2x32xf32>
    %83 = tpu.concatenate %74, %82 in 1 : vector<2x32xf32>, vector<2x32xf32> -> vector<2x64xf32>
    %84 = arith.truncf %83 : vector<2x64xf32> to vector<2x64xbf16>
    %c0_49 = arith.constant 0 : index
    %c0_50 = arith.constant 0 : index
    %85 = vector.load %arg7[%c0_49, %c0_50] : memref<64x128xbf16, #tpu.memory_space<vmem>>, vector<64x128xbf16>
    %cst_51 = arith.constant dense<0.000000e+00> : vector<2x128xf32>
    %86 = tpu.matmul %84, %85, %cst_51 {dimension_numbers = #tpu.dot_dimension_numbers<[1], [0], [0], [1], [0, 0, 1, 1], [], []>} : vector<2x64xbf16>, vector<64x128xbf16>, vector<2x128xf32> -> vector<2x128xf32>
    %c0_52 = arith.constant 0 : index
    %c0_53 = arith.constant 0 : index
    %87 = vector.load %arg8[%c0_52, %c0_53] : memref<1x128xf32, #tpu.memory_space<vmem>>, vector<1x128xf32>
    %88 = vector.broadcast %87 : vector<1x128xf32> to vector<2x128xf32>
    %89 = arith.addf %86, %88 : vector<2x128xf32>
    %c2_54 = arith.constant 2 : index
    %c0_55 = arith.constant 0 : index
    %c0_56 = arith.constant 0 : index
    %90 = vector.load %arg13[%c2_54, %c0_55, %c0_56] : memref<3x2x32xf32, #tpu.memory_space<vmem>>, vector<1x2x32xf32>
    %91 = vector.shape_cast %90 : vector<1x2x32xf32> to vector<2x32xf32>
    %92 = arith.negf %89 : vector<2x128xf32>
    %93 = math.exp %92 : vector<2x128xf32>
    %cst_57 = arith.constant 1.000000e+00 : f32
    %94 = vector.broadcast %cst_57 : f32 to vector<2x128xf32>
    %95 = arith.addf %94, %93 : vector<2x128xf32>
    %96 = arith.divf %94, %95 : vector<2x128xf32>
    %97 = vector.extract_strided_slice %96 {offsets = [0, 0], sizes = [2, 32], strides = [1, 1]} : vector<2x128xf32> to vector<2x32xf32>
    %98 = vector.extract_strided_slice %96 {offsets = [0, 32], sizes = [2, 32], strides = [1, 1]} : vector<2x128xf32> to vector<2x32xf32>
    %99 = vector.extract_strided_slice %96 {offsets = [0, 64], sizes = [2, 32], strides = [1, 1]} : vector<2x128xf32> to vector<2x32xf32>
    %cst_58 = arith.constant 2.000000e+00 : f32
    %100 = vector.broadcast %cst_58 : f32 to vector<2x32xf32>
    %101 = arith.mulf %100, %99 : vector<2x32xf32>
    %cst_59 = arith.constant 1.000000e+00 : f32
    %102 = vector.broadcast %cst_59 : f32 to vector<2x32xf32>
    %103 = arith.subf %101, %102 : vector<2x32xf32>
    %104 = vector.extract_strided_slice %96 {offsets = [0, 96], sizes = [2, 32], strides = [1, 1]} : vector<2x128xf32> to vector<2x32xf32>
    %105 = arith.mulf %98, %91 : vector<2x32xf32>
    %106 = arith.mulf %97, %103 : vector<2x32xf32>
    %107 = arith.addf %105, %106 : vector<2x32xf32>
    %108 = math.tanh %107 : vector<2x32xf32>
    %109 = arith.mulf %104, %108 : vector<2x32xf32>
    %c2_60 = arith.constant 2 : index
    %c0_61 = arith.constant 0 : index
    %c0_62 = arith.constant 0 : index
    %110 = vector.load %arg12[%c2_60, %c0_61, %c0_62] : memref<3x2x32xf32, #tpu.memory_space<vmem>>, vector<1x2x32xf32>
    %111 = vector.shape_cast %110 : vector<1x2x32xf32> to vector<2x32xf32>
    %112 = vector.shape_cast %109 : vector<2x32xf32> to vector<1x2x32xf32>
    tpu.vector_store %arg12[%c2_60, %c0_61, %c0_62], %112 {strides = array<i32>} : memref<3x2x32xf32, #tpu.memory_space<vmem>>, vector<1x2x32xf32>,
    %c2_63 = arith.constant 2 : index
    %c0_64 = arith.constant 0 : index
    %c0_65 = arith.constant 0 : index
    %113 = vector.load %arg13[%c2_63, %c0_64, %c0_65] : memref<3x2x32xf32, #tpu.memory_space<vmem>>, vector<1x2x32xf32>
    %114 = vector.shape_cast %113 : vector<1x2x32xf32> to vector<2x32xf32>
    %115 = vector.shape_cast %107 : vector<2x32xf32> to vector<1x2x32xf32>
    tpu.vector_store %arg13[%c2_63, %c0_64, %c0_65], %115 {strides = array<i32>} : memref<3x2x32xf32, #tpu.memory_space<vmem>>, vector<1x2x32xf32>,
    %116 = arith.index_cast %11 : i32 to index
    %c0_66 = arith.constant 0 : index
    %117 = vector.load %arg15[%116, %c0_66] : memref<16x32xf32, #tpu.memory_space<vmem>>, vector<2x32xf32>
    tpu.vector_store %arg15[%116, %c0_66], %109 {strides = array<i32>} : memref<16x32xf32, #tpu.memory_space<vmem>>, vector<2x32xf32>,
    %c1_i32 = arith.constant 1 : i32
    %c2_i32_67 = arith.constant 2 : i32
    %118 = arith.muli %c1_i32, %c2_i32_67 : i32
    %119 = arith.index_cast %118 : i32 to index
    %c0_68 = arith.constant 0 : index
    %120 = vector.load %arg14[%119, %c0_68] : memref<16x128xf32, #tpu.memory_space<vmem>>, vector<2x128xf32>
    %c0_69 = arith.constant 0 : index
    %c0_70 = arith.constant 0 : index
    %c0_71 = arith.constant 0 : index
    %121 = vector.load %arg12[%c0_69, %c0_70, %c0_71] : memref<3x2x32xf32, #tpu.memory_space<vmem>>, vector<1x2x32xf32>
    %122 = vector.shape_cast %121 : vector<1x2x32xf32> to vector<2x32xf32>
    %123 = arith.truncf %122 : vector<2x32xf32> to vector<2x32xbf16>
    %c0_72 = arith.constant 0 : index
    %c0_73 = arith.constant 0 : index
    %124 = vector.load %arg3[%c0_72, %c0_73] : memref<32x128xbf16, #tpu.memory_space<vmem>>, vector<32x128xbf16>
    %cst_74 = arith.constant dense<0.000000e+00> : vector<2x128xf32>
    %125 = tpu.matmul %123, %124, %cst_74 {dimension_numbers = #tpu.dot_dimension_numbers<[1], [0], [0], [1], [0, 0, 1, 1], [], []>} : vector<2x32xbf16>, vector<32x128xbf16>, vector<2x128xf32> -> vector<2x128xf32>
    %126 = arith.addf %120, %125 : vector<2x128xf32>
    %c0_75 = arith.constant 0 : index
    %c0_76 = arith.constant 0 : index
    %c0_77 = arith.constant 0 : index
    %127 = vector.load %arg13[%c0_75, %c0_76, %c0_77] : memref<3x2x32xf32, #tpu.memory_space<vmem>>, vector<1x2x32xf32>
    %128 = vector.shape_cast %127 : vector<1x2x32xf32> to vector<2x32xf32>
    %129 = arith.negf %126 : vector<2x128xf32>
    %130 = math.exp %129 : vector<2x128xf32>
    %cst_78 = arith.constant 1.000000e+00 : f32
    %131 = vector.broadcast %cst_78 : f32 to vector<2x128xf32>
    %132 = arith.addf %131, %130 : vector<2x128xf32>
    %133 = arith.divf %131, %132 : vector<2x128xf32>
    %134 = vector.extract_strided_slice %133 {offsets = [0, 0], sizes = [2, 32], strides = [1, 1]} : vector<2x128xf32> to vector<2x32xf32>
    %135 = vector.extract_strided_slice %133 {offsets = [0, 32], sizes = [2, 32], strides = [1, 1]} : vector<2x128xf32> to vector<2x32xf32>
    %136 = vector.extract_strided_slice %133 {offsets = [0, 64], sizes = [2, 32], strides = [1, 1]} : vector<2x128xf32> to vector<2x32xf32>
    %cst_79 = arith.constant 2.000000e+00 : f32
    %137 = vector.broadcast %cst_79 : f32 to vector<2x32xf32>
    %138 = arith.mulf %137, %136 : vector<2x32xf32>
    %cst_80 = arith.constant 1.000000e+00 : f32
    %139 = vector.broadcast %cst_80 : f32 to vector<2x32xf32>
    %140 = arith.subf %138, %139 : vector<2x32xf32>
    %141 = vector.extract_strided_slice %133 {offsets = [0, 96], sizes = [2, 32], strides = [1, 1]} : vector<2x128xf32> to vector<2x32xf32>
    %142 = arith.mulf %135, %128 : vector<2x32xf32>
    %143 = arith.mulf %134, %140 : vector<2x32xf32>
    %144 = arith.addf %142, %143 : vector<2x32xf32>
    %145 = math.tanh %144 : vector<2x32xf32>
    %146 = arith.mulf %141, %145 : vector<2x32xf32>
    %c0_81 = arith.constant 0 : index
    %c0_82 = arith.constant 0 : index
    %c0_83 = arith.constant 0 : index
    %147 = vector.load %arg12[%c0_81, %c0_82, %c0_83] : memref<3x2x32xf32, #tpu.memory_space<vmem>>, vector<1x2x32xf32>
    %148 = vector.shape_cast %147 : vector<1x2x32xf32> to vector<2x32xf32>
    %149 = vector.shape_cast %146 : vector<2x32xf32> to vector<1x2x32xf32>
    tpu.vector_store %arg12[%c0_81, %c0_82, %c0_83], %149 {strides = array<i32>} : memref<3x2x32xf32, #tpu.memory_space<vmem>>, vector<1x2x32xf32>,
    %c0_84 = arith.constant 0 : index
    %c0_85 = arith.constant 0 : index
    %c0_86 = arith.constant 0 : index
    %150 = vector.load %arg13[%c0_84, %c0_85, %c0_86] : memref<3x2x32xf32, #tpu.memory_space<vmem>>, vector<1x2x32xf32>
    %151 = vector.shape_cast %150 : vector<1x2x32xf32> to vector<2x32xf32>
    %152 = vector.shape_cast %144 : vector<2x32xf32> to vector<1x2x32xf32>
    tpu.vector_store %arg13[%c0_84, %c0_85, %c0_86], %152 {strides = array<i32>} : memref<3x2x32xf32, #tpu.memory_space<vmem>>, vector<1x2x32xf32>,
    %c1_87 = arith.constant 1 : index
    %c0_88 = arith.constant 0 : index
    %c0_89 = arith.constant 0 : index
    %153 = vector.load %arg12[%c1_87, %c0_88, %c0_89] : memref<3x2x32xf32, #tpu.memory_space<vmem>>, vector<1x2x32xf32>
    %154 = vector.shape_cast %153 : vector<1x2x32xf32> to vector<2x32xf32>
    %155 = tpu.concatenate %146, %154 in 1 : vector<2x32xf32>, vector<2x32xf32> -> vector<2x64xf32>
    %156 = arith.truncf %155 : vector<2x64xf32> to vector<2x64xbf16>
    %c0_90 = arith.constant 0 : index
    %c0_91 = arith.constant 0 : index
    %157 = vector.load %arg5[%c0_90, %c0_91] : memref<64x128xbf16, #tpu.memory_space<vmem>>, vector<64x128xbf16>
    %cst_92 = arith.constant dense<0.000000e+00> : vector<2x128xf32>
    %158 = tpu.matmul %156, %157, %cst_92 {dimension_numbers = #tpu.dot_dimension_numbers<[1], [0], [0], [1], [0, 0, 1, 1], [], []>} : vector<2x64xbf16>, vector<64x128xbf16>, vector<2x128xf32> -> vector<2x128xf32>
    %c0_93 = arith.constant 0 : index
    %c0_94 = arith.constant 0 : index
    %159 = vector.load %arg6[%c0_93, %c0_94] : memref<1x128xf32, #tpu.memory_space<vmem>>, vector<1x128xf32>
    %160 = vector.broadcast %159 : vector<1x128xf32> to vector<2x128xf32>
    %161 = arith.addf %158, %160 : vector<2x128xf32>
    %c1_95 = arith.constant 1 : index
    %c0_96 = arith.constant 0 : index
    %c0_97 = arith.constant 0 : index
    %162 = vector.load %arg13[%c1_95, %c0_96, %c0_97] : memref<3x2x32xf32, #tpu.memory_space<vmem>>, vector<1x2x32xf32>
    %163 = vector.shape_cast %162 : vector<1x2x32xf32> to vector<2x32xf32>
    %164 = arith.negf %161 : vector<2x128xf32>
    %165 = math.exp %164 : vector<2x128xf32>
    %cst_98 = arith.constant 1.000000e+00 : f32
    %166 = vector.broadcast %cst_98 : f32 to vector<2x128xf32>
    %167 = arith.addf %166, %165 : vector<2x128xf32>
    %168 = arith.divf %166, %167 : vector<2x128xf32>
    %169 = vector.extract_strided_slice %168 {offsets = [0, 0], sizes = [2, 32], strides = [1, 1]} : vector<2x128xf32> to vector<2x32xf32>
    %170 = vector.extract_strided_slice %168 {offsets = [0, 32], sizes = [2, 32], strides = [1, 1]} : vector<2x128xf32> to vector<2x32xf32>
    %171 = vector.extract_strided_slice %168 {offsets = [0, 64], sizes = [2, 32], strides = [1, 1]} : vector<2x128xf32> to vector<2x32xf32>
    %cst_99 = arith.constant 2.000000e+00 : f32
    %172 = vector.broadcast %cst_99 : f32 to vector<2x32xf32>
    %173 = arith.mulf %172, %171 : vector<2x32xf32>
    %cst_100 = arith.constant 1.000000e+00 : f32
    %174 = vector.broadcast %cst_100 : f32 to vector<2x32xf32>
    %175 = arith.subf %173, %174 : vector<2x32xf32>
    %176 = vector.extract_strided_slice %168 {offsets = [0, 96], sizes = [2, 32], strides = [1, 1]} : vector<2x128xf32> to vector<2x32xf32>
    %177 = arith.mulf %170, %163 : vector<2x32xf32>
    %178 = arith.mulf %169, %175 : vector<2x32xf32>
    %179 = arith.addf %177, %178 : vector<2x32xf32>
    %180 = math.tanh %179 : vector<2x32xf32>
    %181 = arith.mulf %176, %180 : vector<2x32xf32>
    %c1_101 = arith.constant 1 : index
    %c0_102 = arith.constant 0 : index
    %c0_103 = arith.constant 0 : index
    %182 = vector.load %arg12[%c1_101, %c0_102, %c0_103] : memref<3x2x32xf32, #tpu.memory_space<vmem>>, vector<1x2x32xf32>
    %183 = vector.shape_cast %182 : vector<1x2x32xf32> to vector<2x32xf32>
    %184 = vector.shape_cast %181 : vector<2x32xf32> to vector<1x2x32xf32>
    tpu.vector_store %arg12[%c1_101, %c0_102, %c0_103], %184 {strides = array<i32>} : memref<3x2x32xf32, #tpu.memory_space<vmem>>, vector<1x2x32xf32>,
    %c1_104 = arith.constant 1 : index
    %c0_105 = arith.constant 0 : index
    %c0_106 = arith.constant 0 : index
    %185 = vector.load %arg13[%c1_104, %c0_105, %c0_106] : memref<3x2x32xf32, #tpu.memory_space<vmem>>, vector<1x2x32xf32>
    %186 = vector.shape_cast %185 : vector<1x2x32xf32> to vector<2x32xf32>
    %187 = vector.shape_cast %179 : vector<2x32xf32> to vector<1x2x32xf32>
    tpu.vector_store %arg13[%c1_104, %c0_105, %c0_106], %187 {strides = array<i32>} : memref<3x2x32xf32, #tpu.memory_space<vmem>>, vector<1x2x32xf32>,
    %c2_107 = arith.constant 2 : index
    %c0_108 = arith.constant 0 : index
    %c0_109 = arith.constant 0 : index
    %188 = vector.load %arg12[%c2_107, %c0_108, %c0_109] : memref<3x2x32xf32, #tpu.memory_space<vmem>>, vector<1x2x32xf32>
    %189 = vector.shape_cast %188 : vector<1x2x32xf32> to vector<2x32xf32>
    %190 = tpu.concatenate %181, %189 in 1 : vector<2x32xf32>, vector<2x32xf32> -> vector<2x64xf32>
    %191 = arith.truncf %190 : vector<2x64xf32> to vector<2x64xbf16>
    %c0_110 = arith.constant 0 : index
    %c0_111 = arith.constant 0 : index
    %192 = vector.load %arg7[%c0_110, %c0_111] : memref<64x128xbf16, #tpu.memory_space<vmem>>, vector<64x128xbf16>
    %cst_112 = arith.constant dense<0.000000e+00> : vector<2x128xf32>
    %193 = tpu.matmul %191, %192, %cst_112 {dimension_numbers = #tpu.dot_dimension_numbers<[1], [0], [0], [1], [0, 0, 1, 1], [], []>} : vector<2x64xbf16>, vector<64x128xbf16>, vector<2x128xf32> -> vector<2x128xf32>
    %c0_113 = arith.constant 0 : index
    %c0_114 = arith.constant 0 : index
    %194 = vector.load %arg8[%c0_113, %c0_114] : memref<1x128xf32, #tpu.memory_space<vmem>>, vector<1x128xf32>
    %195 = vector.broadcast %194 : vector<1x128xf32> to vector<2x128xf32>
    %196 = arith.addf %193, %195 : vector<2x128xf32>
    %c2_115 = arith.constant 2 : index
    %c0_116 = arith.constant 0 : index
    %c0_117 = arith.constant 0 : index
    %197 = vector.load %arg13[%c2_115, %c0_116, %c0_117] : memref<3x2x32xf32, #tpu.memory_space<vmem>>, vector<1x2x32xf32>
    %198 = vector.shape_cast %197 : vector<1x2x32xf32> to vector<2x32xf32>
    %199 = arith.negf %196 : vector<2x128xf32>
    %200 = math.exp %199 : vector<2x128xf32>
    %cst_118 = arith.constant 1.000000e+00 : f32
    %201 = vector.broadcast %cst_118 : f32 to vector<2x128xf32>
    %202 = arith.addf %201, %200 : vector<2x128xf32>
    %203 = arith.divf %201, %202 : vector<2x128xf32>
    %204 = vector.extract_strided_slice %203 {offsets = [0, 0], sizes = [2, 32], strides = [1, 1]} : vector<2x128xf32> to vector<2x32xf32>
    %205 = vector.extract_strided_slice %203 {offsets = [0, 32], sizes = [2, 32], strides = [1, 1]} : vector<2x128xf32> to vector<2x32xf32>
    %206 = vector.extract_strided_slice %203 {offsets = [0, 64], sizes = [2, 32], strides = [1, 1]} : vector<2x128xf32> to vector<2x32xf32>
    %cst_119 = arith.constant 2.000000e+00 : f32
    %207 = vector.broadcast %cst_119 : f32 to vector<2x32xf32>
    %208 = arith.mulf %207, %206 : vector<2x32xf32>
    %cst_120 = arith.constant 1.000000e+00 : f32
    %209 = vector.broadcast %cst_120 : f32 to vector<2x32xf32>
    %210 = arith.subf %208, %209 : vector<2x32xf32>
    %211 = vector.extract_strided_slice %203 {offsets = [0, 96], sizes = [2, 32], strides = [1, 1]} : vector<2x128xf32> to vector<2x32xf32>
    %212 = arith.mulf %205, %198 : vector<2x32xf32>
    %213 = arith.mulf %204, %210 : vector<2x32xf32>
    %214 = arith.addf %212, %213 : vector<2x32xf32>
    %215 = math.tanh %214 : vector<2x32xf32>
    %216 = arith.mulf %211, %215 : vector<2x32xf32>
    %c2_121 = arith.constant 2 : index
    %c0_122 = arith.constant 0 : index
    %c0_123 = arith.constant 0 : index
    %217 = vector.load %arg12[%c2_121, %c0_122, %c0_123] : memref<3x2x32xf32, #tpu.memory_space<vmem>>, vector<1x2x32xf32>
    %218 = vector.shape_cast %217 : vector<1x2x32xf32> to vector<2x32xf32>
    %219 = vector.shape_cast %216 : vector<2x32xf32> to vector<1x2x32xf32>
    tpu.vector_store %arg12[%c2_121, %c0_122, %c0_123], %219 {strides = array<i32>} : memref<3x2x32xf32, #tpu.memory_space<vmem>>, vector<1x2x32xf32>,
    %c2_124 = arith.constant 2 : index
    %c0_125 = arith.constant 0 : index
    %c0_126 = arith.constant 0 : index
    %220 = vector.load %arg13[%c2_124, %c0_125, %c0_126] : memref<3x2x32xf32, #tpu.memory_space<vmem>>, vector<1x2x32xf32>
    %221 = vector.shape_cast %220 : vector<1x2x32xf32> to vector<2x32xf32>
    %222 = vector.shape_cast %214 : vector<2x32xf32> to vector<1x2x32xf32>
    tpu.vector_store %arg13[%c2_124, %c0_125, %c0_126], %222 {strides = array<i32>} : memref<3x2x32xf32, #tpu.memory_space<vmem>>, vector<1x2x32xf32>,
    %223 = arith.index_cast %118 : i32 to index
    %c0_127 = arith.constant 0 : index
    %224 = vector.load %arg15[%223, %c0_127] : memref<16x32xf32, #tpu.memory_space<vmem>>, vector<2x32xf32>
    tpu.vector_store %arg15[%223, %c0_127], %216 {strides = array<i32>} : memref<16x32xf32, #tpu.memory_space<vmem>>, vector<2x32xf32>,
    %c2_i32_128 = arith.constant 2 : i32
    %c2_i32_129 = arith.constant 2 : i32
    %225 = arith.muli %c2_i32_128, %c2_i32_129 : i32
    %226 = arith.index_cast %225 : i32 to index
    %c0_130 = arith.constant 0 : index
    %227 = vector.load %arg14[%226, %c0_130] : memref<16x128xf32, #tpu.memory_space<vmem>>, vector<2x128xf32>
    %c0_131 = arith.constant 0 : index
    %c0_132 = arith.constant 0 : index
    %c0_133 = arith.constant 0 : index
    %228 = vector.load %arg12[%c0_131, %c0_132, %c0_133] : memref<3x2x32xf32, #tpu.memory_space<vmem>>, vector<1x2x32xf32>
    %229 = vector.shape_cast %228 : vector<1x2x32xf32> to vector<2x32xf32>
    %230 = arith.truncf %229 : vector<2x32xf32> to vector<2x32xbf16>
    %c0_134 = arith.constant 0 : index
    %c0_135 = arith.constant 0 : index
    %231 = vector.load %arg3[%c0_134, %c0_135] : memref<32x128xbf16, #tpu.memory_space<vmem>>, vector<32x128xbf16>
    %cst_136 = arith.constant dense<0.000000e+00> : vector<2x128xf32>
    %232 = tpu.matmul %230, %231, %cst_136 {dimension_numbers = #tpu.dot_dimension_numbers<[1], [0], [0], [1], [0, 0, 1, 1], [], []>} : vector<2x32xbf16>, vector<32x128xbf16>, vector<2x128xf32> -> vector<2x128xf32>
    %233 = arith.addf %227, %232 : vector<2x128xf32>
    %c0_137 = arith.constant 0 : index
    %c0_138 = arith.constant 0 : index
    %c0_139 = arith.constant 0 : index
    %234 = vector.load %arg13[%c0_137, %c0_138, %c0_139] : memref<3x2x32xf32, #tpu.memory_space<vmem>>, vector<1x2x32xf32>
    %235 = vector.shape_cast %234 : vector<1x2x32xf32> to vector<2x32xf32>
    %236 = arith.negf %233 : vector<2x128xf32>
    %237 = math.exp %236 : vector<2x128xf32>
    %cst_140 = arith.constant 1.000000e+00 : f32
    %238 = vector.broadcast %cst_140 : f32 to vector<2x128xf32>
    %239 = arith.addf %238, %237 : vector<2x128xf32>
    %240 = arith.divf %238, %239 : vector<2x128xf32>
    %241 = vector.extract_strided_slice %240 {offsets = [0, 0], sizes = [2, 32], strides = [1, 1]} : vector<2x128xf32> to vector<2x32xf32>
    %242 = vector.extract_strided_slice %240 {offsets = [0, 32], sizes = [2, 32], strides = [1, 1]} : vector<2x128xf32> to vector<2x32xf32>
    %243 = vector.extract_strided_slice %240 {offsets = [0, 64], sizes = [2, 32], strides = [1, 1]} : vector<2x128xf32> to vector<2x32xf32>
    %cst_141 = arith.constant 2.000000e+00 : f32
    %244 = vector.broadcast %cst_141 : f32 to vector<2x32xf32>
    %245 = arith.mulf %244, %243 : vector<2x32xf32>
    %cst_142 = arith.constant 1.000000e+00 : f32
    %246 = vector.broadcast %cst_142 : f32 to vector<2x32xf32>
    %247 = arith.subf %245, %246 : vector<2x32xf32>
    %248 = vector.extract_strided_slice %240 {offsets = [0, 96], sizes = [2, 32], strides = [1, 1]} : vector<2x128xf32> to vector<2x32xf32>
    %249 = arith.mulf %242, %235 : vector<2x32xf32>
    %250 = arith.mulf %241, %247 : vector<2x32xf32>
    %251 = arith.addf %249, %250 : vector<2x32xf32>
    %252 = math.tanh %251 : vector<2x32xf32>
    %253 = arith.mulf %248, %252 : vector<2x32xf32>
    %c0_143 = arith.constant 0 : index
    %c0_144 = arith.constant 0 : index
    %c0_145 = arith.constant 0 : index
    %254 = vector.load %arg12[%c0_143, %c0_144, %c0_145] : memref<3x2x32xf32, #tpu.memory_space<vmem>>, vector<1x2x32xf32>
    %255 = vector.shape_cast %254 : vector<1x2x32xf32> to vector<2x32xf32>
    %256 = vector.shape_cast %253 : vector<2x32xf32> to vector<1x2x32xf32>
    tpu.vector_store %arg12[%c0_143, %c0_144, %c0_145], %256 {strides = array<i32>} : memref<3x2x32xf32, #tpu.memory_space<vmem>>, vector<1x2x32xf32>,
    %c0_146 = arith.constant 0 : index
    %c0_147 = arith.constant 0 : index
    %c0_148 = arith.constant 0 : index
    %257 = vector.load %arg13[%c0_146, %c0_147, %c0_148] : memref<3x2x32xf32, #tpu.memory_space<vmem>>, vector<1x2x32xf32>
    %258 = vector.shape_cast %257 : vector<1x2x32xf32> to vector<2x32xf32>
    %259 = vector.shape_cast %251 : vector<2x32xf32> to vector<1x2x32xf32>
    tpu.vector_store %arg13[%c0_146, %c0_147, %c0_148], %259 {strides = array<i32>} : memref<3x2x32xf32, #tpu.memory_space<vmem>>, vector<1x2x32xf32>,
    %c1_149 = arith.constant 1 : index
    %c0_150 = arith.constant 0 : index
    %c0_151 = arith.constant 0 : index
    %260 = vector.load %arg12[%c1_149, %c0_150, %c0_151] : memref<3x2x32xf32, #tpu.memory_space<vmem>>, vector<1x2x32xf32>
    %261 = vector.shape_cast %260 : vector<1x2x32xf32> to vector<2x32xf32>
    %262 = tpu.concatenate %253, %261 in 1 : vector<2x32xf32>, vector<2x32xf32> -> vector<2x64xf32>
    %263 = arith.truncf %262 : vector<2x64xf32> to vector<2x64xbf16>
    %c0_152 = arith.constant 0 : index
    %c0_153 = arith.constant 0 : index
    %264 = vector.load %arg5[%c0_152, %c0_153] : memref<64x128xbf16, #tpu.memory_space<vmem>>, vector<64x128xbf16>
    %cst_154 = arith.constant dense<0.000000e+00> : vector<2x128xf32>
    %265 = tpu.matmul %263, %264, %cst_154 {dimension_numbers = #tpu.dot_dimension_numbers<[1], [0], [0], [1], [0, 0, 1, 1], [], []>} : vector<2x64xbf16>, vector<64x128xbf16>, vector<2x128xf32> -> vector<2x128xf32>
    %c0_155 = arith.constant 0 : index
    %c0_156 = arith.constant 0 : index
    %266 = vector.load %arg6[%c0_155, %c0_156] : memref<1x128xf32, #tpu.memory_space<vmem>>, vector<1x128xf32>
    %267 = vector.broadcast %266 : vector<1x128xf32> to vector<2x128xf32>
    %268 = arith.addf %265, %267 : vector<2x128xf32>
    %c1_157 = arith.constant 1 : index
    %c0_158 = arith.constant 0 : index
    %c0_159 = arith.constant 0 : index
    %269 = vector.load %arg13[%c1_157, %c0_158, %c0_159] : memref<3x2x32xf32, #tpu.memory_space<vmem>>, vector<1x2x32xf32>
    %270 = vector.shape_cast %269 : vector<1x2x32xf32> to vector<2x32xf32>
    %271 = arith.negf %268 : vector<2x128xf32>
    %272 = math.exp %271 : vector<2x128xf32>
    %cst_160 = arith.constant 1.000000e+00 : f32
    %273 = vector.broadcast %cst_160 : f32 to vector<2x128xf32>
    %274 = arith.addf %273, %272 : vector<2x128xf32>
    %275 = arith.divf %273, %274 : vector<2x128xf32>
    %276 = vector.extract_strided_slice %275 {offsets = [0, 0], sizes = [2, 32], strides = [1, 1]} : vector<2x128xf32> to vector<2x32xf32>
    %277 = vector.extract_strided_slice %275 {offsets = [0, 32], sizes = [2, 32], strides = [1, 1]} : vector<2x128xf32> to vector<2x32xf32>
    %278 = vector.extract_strided_slice %275 {offsets = [0, 64], sizes = [2, 32], strides = [1, 1]} : vector<2x128xf32> to vector<2x32xf32>
    %cst_161 = arith.constant 2.000000e+00 : f32
    %279 = vector.broadcast %cst_161 : f32 to vector<2x32xf32>
    %280 = arith.mulf %279, %278 : vector<2x32xf32>
    %cst_162 = arith.constant 1.000000e+00 : f32
    %281 = vector.broadcast %cst_162 : f32 to vector<2x32xf32>
    %282 = arith.subf %280, %281 : vector<2x32xf32>
    %283 = vector.extract_strided_slice %275 {offsets = [0, 96], sizes = [2, 32], strides = [1, 1]} : vector<2x128xf32> to vector<2x32xf32>
    %284 = arith.mulf %277, %270 : vector<2x32xf32>
    %285 = arith.mulf %276, %282 : vector<2x32xf32>
    %286 = arith.addf %284, %285 : vector<2x32xf32>
    %287 = math.tanh %286 : vector<2x32xf32>
    %288 = arith.mulf %283, %287 : vector<2x32xf32>
    %c1_163 = arith.constant 1 : index
    %c0_164 = arith.constant 0 : index
    %c0_165 = arith.constant 0 : index
    %289 = vector.load %arg12[%c1_163, %c0_164, %c0_165] : memref<3x2x32xf32, #tpu.memory_space<vmem>>, vector<1x2x32xf32>
    %290 = vector.shape_cast %289 : vector<1x2x32xf32> to vector<2x32xf32>
    %291 = vector.shape_cast %288 : vector<2x32xf32> to vector<1x2x32xf32>
    tpu.vector_store %arg12[%c1_163, %c0_164, %c0_165], %291 {strides = array<i32>} : memref<3x2x32xf32, #tpu.memory_space<vmem>>, vector<1x2x32xf32>,
    %c1_166 = arith.constant 1 : index
    %c0_167 = arith.constant 0 : index
    %c0_168 = arith.constant 0 : index
    %292 = vector.load %arg13[%c1_166, %c0_167, %c0_168] : memref<3x2x32xf32, #tpu.memory_space<vmem>>, vector<1x2x32xf32>
    %293 = vector.shape_cast %292 : vector<1x2x32xf32> to vector<2x32xf32>
    %294 = vector.shape_cast %286 : vector<2x32xf32> to vector<1x2x32xf32>
    tpu.vector_store %arg13[%c1_166, %c0_167, %c0_168], %294 {strides = array<i32>} : memref<3x2x32xf32, #tpu.memory_space<vmem>>, vector<1x2x32xf32>,
    %c2_169 = arith.constant 2 : index
    %c0_170 = arith.constant 0 : index
    %c0_171 = arith.constant 0 : index
    %295 = vector.load %arg12[%c2_169, %c0_170, %c0_171] : memref<3x2x32xf32, #tpu.memory_space<vmem>>, vector<1x2x32xf32>
    %296 = vector.shape_cast %295 : vector<1x2x32xf32> to vector<2x32xf32>
    %297 = tpu.concatenate %288, %296 in 1 : vector<2x32xf32>, vector<2x32xf32> -> vector<2x64xf32>
    %298 = arith.truncf %297 : vector<2x64xf32> to vector<2x64xbf16>
    %c0_172 = arith.constant 0 : index
    %c0_173 = arith.constant 0 : index
    %299 = vector.load %arg7[%c0_172, %c0_173] : memref<64x128xbf16, #tpu.memory_space<vmem>>, vector<64x128xbf16>
    %cst_174 = arith.constant dense<0.000000e+00> : vector<2x128xf32>
    %300 = tpu.matmul %298, %299, %cst_174 {dimension_numbers = #tpu.dot_dimension_numbers<[1], [0], [0], [1], [0, 0, 1, 1], [], []>} : vector<2x64xbf16>, vector<64x128xbf16>, vector<2x128xf32> -> vector<2x128xf32>
    %c0_175 = arith.constant 0 : index
    %c0_176 = arith.constant 0 : index
    %301 = vector.load %arg8[%c0_175, %c0_176] : memref<1x128xf32, #tpu.memory_space<vmem>>, vector<1x128xf32>
    %302 = vector.broadcast %301 : vector<1x128xf32> to vector<2x128xf32>
    %303 = arith.addf %300, %302 : vector<2x128xf32>
    %c2_177 = arith.constant 2 : index
    %c0_178 = arith.constant 0 : index
    %c0_179 = arith.constant 0 : index
    %304 = vector.load %arg13[%c2_177, %c0_178, %c0_179] : memref<3x2x32xf32, #tpu.memory_space<vmem>>, vector<1x2x32xf32>
    %305 = vector.shape_cast %304 : vector<1x2x32xf32> to vector<2x32xf32>
    %306 = arith.negf %303 : vector<2x128xf32>
    %307 = math.exp %306 : vector<2x128xf32>
    %cst_180 = arith.constant 1.000000e+00 : f32
    %308 = vector.broadcast %cst_180 : f32 to vector<2x128xf32>
    %309 = arith.addf %308, %307 : vector<2x128xf32>
    %310 = arith.divf %308, %309 : vector<2x128xf32>
    %311 = vector.extract_strided_slice %310 {offsets = [0, 0], sizes = [2, 32], strides = [1, 1]} : vector<2x128xf32> to vector<2x32xf32>
    %312 = vector.extract_strided_slice %310 {offsets = [0, 32], sizes = [2, 32], strides = [1, 1]} : vector<2x128xf32> to vector<2x32xf32>
    %313 = vector.extract_strided_slice %310 {offsets = [0, 64], sizes = [2, 32], strides = [1, 1]} : vector<2x128xf32> to vector<2x32xf32>
    %cst_181 = arith.constant 2.000000e+00 : f32
    %314 = vector.broadcast %cst_181 : f32 to vector<2x32xf32>
    %315 = arith.mulf %314, %313 : vector<2x32xf32>
    %cst_182 = arith.constant 1.000000e+00 : f32
    %316 = vector.broadcast %cst_182 : f32 to vector<2x32xf32>
    %317 = arith.subf %315, %316 : vector<2x32xf32>
    %318 = vector.extract_strided_slice %310 {offsets = [0, 96], sizes = [2, 32], strides = [1, 1]} : vector<2x128xf32> to vector<2x32xf32>
    %319 = arith.mulf %312, %305 : vector<2x32xf32>
    %320 = arith.mulf %311, %317 : vector<2x32xf32>
    %321 = arith.addf %319, %320 : vector<2x32xf32>
    %322 = math.tanh %321 : vector<2x32xf32>
    %323 = arith.mulf %318, %322 : vector<2x32xf32>
    %c2_183 = arith.constant 2 : index
    %c0_184 = arith.constant 0 : index
    %c0_185 = arith.constant 0 : index
    %324 = vector.load %arg12[%c2_183, %c0_184, %c0_185] : memref<3x2x32xf32, #tpu.memory_space<vmem>>, vector<1x2x32xf32>
    %325 = vector.shape_cast %324 : vector<1x2x32xf32> to vector<2x32xf32>
    %326 = vector.shape_cast %323 : vector<2x32xf32> to vector<1x2x32xf32>
    tpu.vector_store %arg12[%c2_183, %c0_184, %c0_185], %326 {strides = array<i32>} : memref<3x2x32xf32, #tpu.memory_space<vmem>>, vector<1x2x32xf32>,
    %c2_186 = arith.constant 2 : index
    %c0_187 = arith.constant 0 : index
    %c0_188 = arith.constant 0 : index
    %327 = vector.load %arg13[%c2_186, %c0_187, %c0_188] : memref<3x2x32xf32, #tpu.memory_space<vmem>>, vector<1x2x32xf32>
    %328 = vector.shape_cast %327 : vector<1x2x32xf32> to vector<2x32xf32>
    %329 = vector.shape_cast %321 : vector<2x32xf32> to vector<1x2x32xf32>
    tpu.vector_store %arg13[%c2_186, %c0_187, %c0_188], %329 {strides = array<i32>} : memref<3x2x32xf32, #tpu.memory_space<vmem>>, vector<1x2x32xf32>,
    %330 = arith.index_cast %225 : i32 to index
    %c0_189 = arith.constant 0 : index
    %331 = vector.load %arg15[%330, %c0_189] : memref<16x32xf32, #tpu.memory_space<vmem>>, vector<2x32xf32>
    tpu.vector_store %arg15[%330, %c0_189], %323 {strides = array<i32>} : memref<16x32xf32, #tpu.memory_space<vmem>>, vector<2x32xf32>,
    %c3_i32 = arith.constant 3 : i32
    %c2_i32_190 = arith.constant 2 : i32
    %332 = arith.muli %c3_i32, %c2_i32_190 : i32
    %333 = arith.index_cast %332 : i32 to index
    %c0_191 = arith.constant 0 : index
    %334 = vector.load %arg14[%333, %c0_191] : memref<16x128xf32, #tpu.memory_space<vmem>>, vector<2x128xf32>
    %c0_192 = arith.constant 0 : index
    %c0_193 = arith.constant 0 : index
    %c0_194 = arith.constant 0 : index
    %335 = vector.load %arg12[%c0_192, %c0_193, %c0_194] : memref<3x2x32xf32, #tpu.memory_space<vmem>>, vector<1x2x32xf32>
    %336 = vector.shape_cast %335 : vector<1x2x32xf32> to vector<2x32xf32>
    %337 = arith.truncf %336 : vector<2x32xf32> to vector<2x32xbf16>
    %c0_195 = arith.constant 0 : index
    %c0_196 = arith.constant 0 : index
    %338 = vector.load %arg3[%c0_195, %c0_196] : memref<32x128xbf16, #tpu.memory_space<vmem>>, vector<32x128xbf16>
    %cst_197 = arith.constant dense<0.000000e+00> : vector<2x128xf32>
    %339 = tpu.matmul %337, %338, %cst_197 {dimension_numbers = #tpu.dot_dimension_numbers<[1], [0], [0], [1], [0, 0, 1, 1], [], []>} : vector<2x32xbf16>, vector<32x128xbf16>, vector<2x128xf32> -> vector<2x128xf32>
    %340 = arith.addf %334, %339 : vector<2x128xf32>
    %c0_198 = arith.constant 0 : index
    %c0_199 = arith.constant 0 : index
    %c0_200 = arith.constant 0 : index
    %341 = vector.load %arg13[%c0_198, %c0_199, %c0_200] : memref<3x2x32xf32, #tpu.memory_space<vmem>>, vector<1x2x32xf32>
    %342 = vector.shape_cast %341 : vector<1x2x32xf32> to vector<2x32xf32>
    %343 = arith.negf %340 : vector<2x128xf32>
    %344 = math.exp %343 : vector<2x128xf32>
    %cst_201 = arith.constant 1.000000e+00 : f32
    %345 = vector.broadcast %cst_201 : f32 to vector<2x128xf32>
    %346 = arith.addf %345, %344 : vector<2x128xf32>
    %347 = arith.divf %345, %346 : vector<2x128xf32>
    %348 = vector.extract_strided_slice %347 {offsets = [0, 0], sizes = [2, 32], strides = [1, 1]} : vector<2x128xf32> to vector<2x32xf32>
    %349 = vector.extract_strided_slice %347 {offsets = [0, 32], sizes = [2, 32], strides = [1, 1]} : vector<2x128xf32> to vector<2x32xf32>
    %350 = vector.extract_strided_slice %347 {offsets = [0, 64], sizes = [2, 32], strides = [1, 1]} : vector<2x128xf32> to vector<2x32xf32>
    %cst_202 = arith.constant 2.000000e+00 : f32
    %351 = vector.broadcast %cst_202 : f32 to vector<2x32xf32>
    %352 = arith.mulf %351, %350 : vector<2x32xf32>
    %cst_203 = arith.constant 1.000000e+00 : f32
    %353 = vector.broadcast %cst_203 : f32 to vector<2x32xf32>
    %354 = arith.subf %352, %353 : vector<2x32xf32>
    %355 = vector.extract_strided_slice %347 {offsets = [0, 96], sizes = [2, 32], strides = [1, 1]} : vector<2x128xf32> to vector<2x32xf32>
    %356 = arith.mulf %349, %342 : vector<2x32xf32>
    %357 = arith.mulf %348, %354 : vector<2x32xf32>
    %358 = arith.addf %356, %357 : vector<2x32xf32>
    %359 = math.tanh %358 : vector<2x32xf32>
    %360 = arith.mulf %355, %359 : vector<2x32xf32>
    %c0_204 = arith.constant 0 : index
    %c0_205 = arith.constant 0 : index
    %c0_206 = arith.constant 0 : index
    %361 = vector.load %arg12[%c0_204, %c0_205, %c0_206] : memref<3x2x32xf32, #tpu.memory_space<vmem>>, vector<1x2x32xf32>
    %362 = vector.shape_cast %361 : vector<1x2x32xf32> to vector<2x32xf32>
    %363 = vector.shape_cast %360 : vector<2x32xf32> to vector<1x2x32xf32>
    tpu.vector_store %arg12[%c0_204, %c0_205, %c0_206], %363 {strides = array<i32>} : memref<3x2x32xf32, #tpu.memory_space<vmem>>, vector<1x2x32xf32>,
    %c0_207 = arith.constant 0 : index
    %c0_208 = arith.constant 0 : index
    %c0_209 = arith.constant 0 : index
    %364 = vector.load %arg13[%c0_207, %c0_208, %c0_209] : memref<3x2x32xf32, #tpu.memory_space<vmem>>, vector<1x2x32xf32>
    %365 = vector.shape_cast %364 : vector<1x2x32xf32> to vector<2x32xf32>
    %366 = vector.shape_cast %358 : vector<2x32xf32> to vector<1x2x32xf32>
    tpu.vector_store %arg13[%c0_207, %c0_208, %c0_209], %366 {strides = array<i32>} : memref<3x2x32xf32, #tpu.memory_space<vmem>>, vector<1x2x32xf32>,
    %c1_210 = arith.constant 1 : index
    %c0_211 = arith.constant 0 : index
    %c0_212 = arith.constant 0 : index
    %367 = vector.load %arg12[%c1_210, %c0_211, %c0_212] : memref<3x2x32xf32, #tpu.memory_space<vmem>>, vector<1x2x32xf32>
    %368 = vector.shape_cast %367 : vector<1x2x32xf32> to vector<2x32xf32>
    %369 = tpu.concatenate %360, %368 in 1 : vector<2x32xf32>, vector<2x32xf32> -> vector<2x64xf32>
    %370 = arith.truncf %369 : vector<2x64xf32> to vector<2x64xbf16>
    %c0_213 = arith.constant 0 : index
    %c0_214 = arith.constant 0 : index
    %371 = vector.load %arg5[%c0_213, %c0_214] : memref<64x128xbf16, #tpu.memory_space<vmem>>, vector<64x128xbf16>
    %cst_215 = arith.constant dense<0.000000e+00> : vector<2x128xf32>
    %372 = tpu.matmul %370, %371, %cst_215 {dimension_numbers = #tpu.dot_dimension_numbers<[1], [0], [0], [1], [0, 0, 1, 1], [], []>} : vector<2x64xbf16>, vector<64x128xbf16>, vector<2x128xf32> -> vector<2x128xf32>
    %c0_216 = arith.constant 0 : index
    %c0_217 = arith.constant 0 : index
    %373 = vector.load %arg6[%c0_216, %c0_217] : memref<1x128xf32, #tpu.memory_space<vmem>>, vector<1x128xf32>
    %374 = vector.broadcast %373 : vector<1x128xf32> to vector<2x128xf32>
    %375 = arith.addf %372, %374 : vector<2x128xf32>
    %c1_218 = arith.constant 1 : index
    %c0_219 = arith.constant 0 : index
    %c0_220 = arith.constant 0 : index
    %376 = vector.load %arg13[%c1_218, %c0_219, %c0_220] : memref<3x2x32xf32, #tpu.memory_space<vmem>>, vector<1x2x32xf32>
    %377 = vector.shape_cast %376 : vector<1x2x32xf32> to vector<2x32xf32>
    %378 = arith.negf %375 : vector<2x128xf32>
    %379 = math.exp %378 : vector<2x128xf32>
    %cst_221 = arith.constant 1.000000e+00 : f32
    %380 = vector.broadcast %cst_221 : f32 to vector<2x128xf32>
    %381 = arith.addf %380, %379 : vector<2x128xf32>
    %382 = arith.divf %380, %381 : vector<2x128xf32>
    %383 = vector.extract_strided_slice %382 {offsets = [0, 0], sizes = [2, 32], strides = [1, 1]} : vector<2x128xf32> to vector<2x32xf32>
    %384 = vector.extract_strided_slice %382 {offsets = [0, 32], sizes = [2, 32], strides = [1, 1]} : vector<2x128xf32> to vector<2x32xf32>
    %385 = vector.extract_strided_slice %382 {offsets = [0, 64], sizes = [2, 32], strides = [1, 1]} : vector<2x128xf32> to vector<2x32xf32>
    %cst_222 = arith.constant 2.000000e+00 : f32
    %386 = vector.broadcast %cst_222 : f32 to vector<2x32xf32>
    %387 = arith.mulf %386, %385 : vector<2x32xf32>
    %cst_223 = arith.constant 1.000000e+00 : f32
    %388 = vector.broadcast %cst_223 : f32 to vector<2x32xf32>
    %389 = arith.subf %387, %388 : vector<2x32xf32>
    %390 = vector.extract_strided_slice %382 {offsets = [0, 96], sizes = [2, 32], strides = [1, 1]} : vector<2x128xf32> to vector<2x32xf32>
    %391 = arith.mulf %384, %377 : vector<2x32xf32>
    %392 = arith.mulf %383, %389 : vector<2x32xf32>
    %393 = arith.addf %391, %392 : vector<2x32xf32>
    %394 = math.tanh %393 : vector<2x32xf32>
    %395 = arith.mulf %390, %394 : vector<2x32xf32>
    %c1_224 = arith.constant 1 : index
    %c0_225 = arith.constant 0 : index
    %c0_226 = arith.constant 0 : index
    %396 = vector.load %arg12[%c1_224, %c0_225, %c0_226] : memref<3x2x32xf32, #tpu.memory_space<vmem>>, vector<1x2x32xf32>
    %397 = vector.shape_cast %396 : vector<1x2x32xf32> to vector<2x32xf32>
    %398 = vector.shape_cast %395 : vector<2x32xf32> to vector<1x2x32xf32>
    tpu.vector_store %arg12[%c1_224, %c0_225, %c0_226], %398 {strides = array<i32>} : memref<3x2x32xf32, #tpu.memory_space<vmem>>, vector<1x2x32xf32>,
    %c1_227 = arith.constant 1 : index
    %c0_228 = arith.constant 0 : index
    %c0_229 = arith.constant 0 : index
    %399 = vector.load %arg13[%c1_227, %c0_228, %c0_229] : memref<3x2x32xf32, #tpu.memory_space<vmem>>, vector<1x2x32xf32>
    %400 = vector.shape_cast %399 : vector<1x2x32xf32> to vector<2x32xf32>
    %401 = vector.shape_cast %393 : vector<2x32xf32> to vector<1x2x32xf32>
    tpu.vector_store %arg13[%c1_227, %c0_228, %c0_229], %401 {strides = array<i32>} : memref<3x2x32xf32, #tpu.memory_space<vmem>>, vector<1x2x32xf32>,
    %c2_230 = arith.constant 2 : index
    %c0_231 = arith.constant 0 : index
    %c0_232 = arith.constant 0 : index
    %402 = vector.load %arg12[%c2_230, %c0_231, %c0_232] : memref<3x2x32xf32, #tpu.memory_space<vmem>>, vector<1x2x32xf32>
    %403 = vector.shape_cast %402 : vector<1x2x32xf32> to vector<2x32xf32>
    %404 = tpu.concatenate %395, %403 in 1 : vector<2x32xf32>, vector<2x32xf32> -> vector<2x64xf32>
    %405 = arith.truncf %404 : vector<2x64xf32> to vector<2x64xbf16>
    %c0_233 = arith.constant 0 : index
    %c0_234 = arith.constant 0 : index
    %406 = vector.load %arg7[%c0_233, %c0_234] : memref<64x128xbf16, #tpu.memory_space<vmem>>, vector<64x128xbf16>
    %cst_235 = arith.constant dense<0.000000e+00> : vector<2x128xf32>
    %407 = tpu.matmul %405, %406, %cst_235 {dimension_numbers = #tpu.dot_dimension_numbers<[1], [0], [0], [1], [0, 0, 1, 1], [], []>} : vector<2x64xbf16>, vector<64x128xbf16>, vector<2x128xf32> -> vector<2x128xf32>
    %c0_236 = arith.constant 0 : index
    %c0_237 = arith.constant 0 : index
    %408 = vector.load %arg8[%c0_236, %c0_237] : memref<1x128xf32, #tpu.memory_space<vmem>>, vector<1x128xf32>
    %409 = vector.broadcast %408 : vector<1x128xf32> to vector<2x128xf32>
    %410 = arith.addf %407, %409 : vector<2x128xf32>
    %c2_238 = arith.constant 2 : index
    %c0_239 = arith.constant 0 : index
    %c0_240 = arith.constant 0 : index
    %411 = vector.load %arg13[%c2_238, %c0_239, %c0_240] : memref<3x2x32xf32, #tpu.memory_space<vmem>>, vector<1x2x32xf32>
    %412 = vector.shape_cast %411 : vector<1x2x32xf32> to vector<2x32xf32>
    %413 = arith.negf %410 : vector<2x128xf32>
    %414 = math.exp %413 : vector<2x128xf32>
    %cst_241 = arith.constant 1.000000e+00 : f32
    %415 = vector.broadcast %cst_241 : f32 to vector<2x128xf32>
    %416 = arith.addf %415, %414 : vector<2x128xf32>
    %417 = arith.divf %415, %416 : vector<2x128xf32>
    %418 = vector.extract_strided_slice %417 {offsets = [0, 0], sizes = [2, 32], strides = [1, 1]} : vector<2x128xf32> to vector<2x32xf32>
    %419 = vector.extract_strided_slice %417 {offsets = [0, 32], sizes = [2, 32], strides = [1, 1]} : vector<2x128xf32> to vector<2x32xf32>
    %420 = vector.extract_strided_slice %417 {offsets = [0, 64], sizes = [2, 32], strides = [1, 1]} : vector<2x128xf32> to vector<2x32xf32>
    %cst_242 = arith.constant 2.000000e+00 : f32
    %421 = vector.broadcast %cst_242 : f32 to vector<2x32xf32>
    %422 = arith.mulf %421, %420 : vector<2x32xf32>
    %cst_243 = arith.constant 1.000000e+00 : f32
    %423 = vector.broadcast %cst_243 : f32 to vector<2x32xf32>
    %424 = arith.subf %422, %423 : vector<2x32xf32>
    %425 = vector.extract_strided_slice %417 {offsets = [0, 96], sizes = [2, 32], strides = [1, 1]} : vector<2x128xf32> to vector<2x32xf32>
    %426 = arith.mulf %419, %412 : vector<2x32xf32>
    %427 = arith.mulf %418, %424 : vector<2x32xf32>
    %428 = arith.addf %426, %427 : vector<2x32xf32>
    %429 = math.tanh %428 : vector<2x32xf32>
    %430 = arith.mulf %425, %429 : vector<2x32xf32>
    %c2_244 = arith.constant 2 : index
    %c0_245 = arith.constant 0 : index
    %c0_246 = arith.constant 0 : index
    %431 = vector.load %arg12[%c2_244, %c0_245, %c0_246] : memref<3x2x32xf32, #tpu.memory_space<vmem>>, vector<1x2x32xf32>
    %432 = vector.shape_cast %431 : vector<1x2x32xf32> to vector<2x32xf32>
    %433 = vector.shape_cast %430 : vector<2x32xf32> to vector<1x2x32xf32>
    tpu.vector_store %arg12[%c2_244, %c0_245, %c0_246], %433 {strides = array<i32>} : memref<3x2x32xf32, #tpu.memory_space<vmem>>, vector<1x2x32xf32>,
    %c2_247 = arith.constant 2 : index
    %c0_248 = arith.constant 0 : index
    %c0_249 = arith.constant 0 : index
    %434 = vector.load %arg13[%c2_247, %c0_248, %c0_249] : memref<3x2x32xf32, #tpu.memory_space<vmem>>, vector<1x2x32xf32>
    %435 = vector.shape_cast %434 : vector<1x2x32xf32> to vector<2x32xf32>
    %436 = vector.shape_cast %428 : vector<2x32xf32> to vector<1x2x32xf32>
    tpu.vector_store %arg13[%c2_247, %c0_248, %c0_249], %436 {strides = array<i32>} : memref<3x2x32xf32, #tpu.memory_space<vmem>>, vector<1x2x32xf32>,
    %437 = arith.index_cast %332 : i32 to index
    %c0_250 = arith.constant 0 : index
    %438 = vector.load %arg15[%437, %c0_250] : memref<16x32xf32, #tpu.memory_space<vmem>>, vector<2x32xf32>
    tpu.vector_store %arg15[%437, %c0_250], %430 {strides = array<i32>} : memref<16x32xf32, #tpu.memory_space<vmem>>, vector<2x32xf32>,
    %c4_i32 = arith.constant 4 : i32
    %c2_i32_251 = arith.constant 2 : i32
    %439 = arith.muli %c4_i32, %c2_i32_251 : i32
    %440 = arith.index_cast %439 : i32 to index
    %c0_252 = arith.constant 0 : index
    %441 = vector.load %arg14[%440, %c0_252] : memref<16x128xf32, #tpu.memory_space<vmem>>, vector<2x128xf32>
    %c0_253 = arith.constant 0 : index
    %c0_254 = arith.constant 0 : index
    %c0_255 = arith.constant 0 : index
    %442 = vector.load %arg12[%c0_253, %c0_254, %c0_255] : memref<3x2x32xf32, #tpu.memory_space<vmem>>, vector<1x2x32xf32>
    %443 = vector.shape_cast %442 : vector<1x2x32xf32> to vector<2x32xf32>
    %444 = arith.truncf %443 : vector<2x32xf32> to vector<2x32xbf16>
    %c0_256 = arith.constant 0 : index
    %c0_257 = arith.constant 0 : index
    %445 = vector.load %arg3[%c0_256, %c0_257] : memref<32x128xbf16, #tpu.memory_space<vmem>>, vector<32x128xbf16>
    %cst_258 = arith.constant dense<0.000000e+00> : vector<2x128xf32>
    %446 = tpu.matmul %444, %445, %cst_258 {dimension_numbers = #tpu.dot_dimension_numbers<[1], [0], [0], [1], [0, 0, 1, 1], [], []>} : vector<2x32xbf16>, vector<32x128xbf16>, vector<2x128xf32> -> vector<2x128xf32>
    %447 = arith.addf %441, %446 : vector<2x128xf32>
    %c0_259 = arith.constant 0 : index
    %c0_260 = arith.constant 0 : index
    %c0_261 = arith.constant 0 : index
    %448 = vector.load %arg13[%c0_259, %c0_260, %c0_261] : memref<3x2x32xf32, #tpu.memory_space<vmem>>, vector<1x2x32xf32>
    %449 = vector.shape_cast %448 : vector<1x2x32xf32> to vector<2x32xf32>
    %450 = arith.negf %447 : vector<2x128xf32>
    %451 = math.exp %450 : vector<2x128xf32>
    %cst_262 = arith.constant 1.000000e+00 : f32
    %452 = vector.broadcast %cst_262 : f32 to vector<2x128xf32>
    %453 = arith.addf %452, %451 : vector<2x128xf32>
    %454 = arith.divf %452, %453 : vector<2x128xf32>
    %455 = vector.extract_strided_slice %454 {offsets = [0, 0], sizes = [2, 32], strides = [1, 1]} : vector<2x128xf32> to vector<2x32xf32>
    %456 = vector.extract_strided_slice %454 {offsets = [0, 32], sizes = [2, 32], strides = [1, 1]} : vector<2x128xf32> to vector<2x32xf32>
    %457 = vector.extract_strided_slice %454 {offsets = [0, 64], sizes = [2, 32], strides = [1, 1]} : vector<2x128xf32> to vector<2x32xf32>
    %cst_263 = arith.constant 2.000000e+00 : f32
    %458 = vector.broadcast %cst_263 : f32 to vector<2x32xf32>
    %459 = arith.mulf %458, %457 : vector<2x32xf32>
    %cst_264 = arith.constant 1.000000e+00 : f32
    %460 = vector.broadcast %cst_264 : f32 to vector<2x32xf32>
    %461 = arith.subf %459, %460 : vector<2x32xf32>
    %462 = vector.extract_strided_slice %454 {offsets = [0, 96], sizes = [2, 32], strides = [1, 1]} : vector<2x128xf32> to vector<2x32xf32>
    %463 = arith.mulf %456, %449 : vector<2x32xf32>
    %464 = arith.mulf %455, %461 : vector<2x32xf32>
    %465 = arith.addf %463, %464 : vector<2x32xf32>
    %466 = math.tanh %465 : vector<2x32xf32>
    %467 = arith.mulf %462, %466 : vector<2x32xf32>
    %c0_265 = arith.constant 0 : index
    %c0_266 = arith.constant 0 : index
    %c0_267 = arith.constant 0 : index
    %468 = vector.load %arg12[%c0_265, %c0_266, %c0_267] : memref<3x2x32xf32, #tpu.memory_space<vmem>>, vector<1x2x32xf32>
    %469 = vector.shape_cast %468 : vector<1x2x32xf32> to vector<2x32xf32>
    %470 = vector.shape_cast %467 : vector<2x32xf32> to vector<1x2x32xf32>
    tpu.vector_store %arg12[%c0_265, %c0_266, %c0_267], %470 {strides = array<i32>} : memref<3x2x32xf32, #tpu.memory_space<vmem>>, vector<1x2x32xf32>,
    %c0_268 = arith.constant 0 : index
    %c0_269 = arith.constant 0 : index
    %c0_270 = arith.constant 0 : index
    %471 = vector.load %arg13[%c0_268, %c0_269, %c0_270] : memref<3x2x32xf32, #tpu.memory_space<vmem>>, vector<1x2x32xf32>
    %472 = vector.shape_cast %471 : vector<1x2x32xf32> to vector<2x32xf32>
    %473 = vector.shape_cast %465 : vector<2x32xf32> to vector<1x2x32xf32>
    tpu.vector_store %arg13[%c0_268, %c0_269, %c0_270], %473 {strides = array<i32>} : memref<3x2x32xf32, #tpu.memory_space<vmem>>, vector<1x2x32xf32>,
    %c1_271 = arith.constant 1 : index
    %c0_272 = arith.constant 0 : index
    %c0_273 = arith.constant 0 : index
    %474 = vector.load %arg12[%c1_271, %c0_272, %c0_273] : memref<3x2x32xf32, #tpu.memory_space<vmem>>, vector<1x2x32xf32>
    %475 = vector.shape_cast %474 : vector<1x2x32xf32> to vector<2x32xf32>
    %476 = tpu.concatenate %467, %475 in 1 : vector<2x32xf32>, vector<2x32xf32> -> vector<2x64xf32>
    %477 = arith.truncf %476 : vector<2x64xf32> to vector<2x64xbf16>
    %c0_274 = arith.constant 0 : index
    %c0_275 = arith.constant 0 : index
    %478 = vector.load %arg5[%c0_274, %c0_275] : memref<64x128xbf16, #tpu.memory_space<vmem>>, vector<64x128xbf16>
    %cst_276 = arith.constant dense<0.000000e+00> : vector<2x128xf32>
    %479 = tpu.matmul %477, %478, %cst_276 {dimension_numbers = #tpu.dot_dimension_numbers<[1], [0], [0], [1], [0, 0, 1, 1], [], []>} : vector<2x64xbf16>, vector<64x128xbf16>, vector<2x128xf32> -> vector<2x128xf32>
    %c0_277 = arith.constant 0 : index
    %c0_278 = arith.constant 0 : index
    %480 = vector.load %arg6[%c0_277, %c0_278] : memref<1x128xf32, #tpu.memory_space<vmem>>, vector<1x128xf32>
    %481 = vector.broadcast %480 : vector<1x128xf32> to vector<2x128xf32>
    %482 = arith.addf %479, %481 : vector<2x128xf32>
    %c1_279 = arith.constant 1 : index
    %c0_280 = arith.constant 0 : index
    %c0_281 = arith.constant 0 : index
    %483 = vector.load %arg13[%c1_279, %c0_280, %c0_281] : memref<3x2x32xf32, #tpu.memory_space<vmem>>, vector<1x2x32xf32>
    %484 = vector.shape_cast %483 : vector<1x2x32xf32> to vector<2x32xf32>
    %485 = arith.negf %482 : vector<2x128xf32>
    %486 = math.exp %485 : vector<2x128xf32>
    %cst_282 = arith.constant 1.000000e+00 : f32
    %487 = vector.broadcast %cst_282 : f32 to vector<2x128xf32>
    %488 = arith.addf %487, %486 : vector<2x128xf32>
    %489 = arith.divf %487, %488 : vector<2x128xf32>
    %490 = vector.extract_strided_slice %489 {offsets = [0, 0], sizes = [2, 32], strides = [1, 1]} : vector<2x128xf32> to vector<2x32xf32>
    %491 = vector.extract_strided_slice %489 {offsets = [0, 32], sizes = [2, 32], strides = [1, 1]} : vector<2x128xf32> to vector<2x32xf32>
    %492 = vector.extract_strided_slice %489 {offsets = [0, 64], sizes = [2, 32], strides = [1, 1]} : vector<2x128xf32> to vector<2x32xf32>
    %cst_283 = arith.constant 2.000000e+00 : f32
    %493 = vector.broadcast %cst_283 : f32 to vector<2x32xf32>
    %494 = arith.mulf %493, %492 : vector<2x32xf32>
    %cst_284 = arith.constant 1.000000e+00 : f32
    %495 = vector.broadcast %cst_284 : f32 to vector<2x32xf32>
    %496 = arith.subf %494, %495 : vector<2x32xf32>
    %497 = vector.extract_strided_slice %489 {offsets = [0, 96], sizes = [2, 32], strides = [1, 1]} : vector<2x128xf32> to vector<2x32xf32>
    %498 = arith.mulf %491, %484 : vector<2x32xf32>
    %499 = arith.mulf %490, %496 : vector<2x32xf32>
    %500 = arith.addf %498, %499 : vector<2x32xf32>
    %501 = math.tanh %500 : vector<2x32xf32>
    %502 = arith.mulf %497, %501 : vector<2x32xf32>
    %c1_285 = arith.constant 1 : index
    %c0_286 = arith.constant 0 : index
    %c0_287 = arith.constant 0 : index
    %503 = vector.load %arg12[%c1_285, %c0_286, %c0_287] : memref<3x2x32xf32, #tpu.memory_space<vmem>>, vector<1x2x32xf32>
    %504 = vector.shape_cast %503 : vector<1x2x32xf32> to vector<2x32xf32>
    %505 = vector.shape_cast %502 : vector<2x32xf32> to vector<1x2x32xf32>
    tpu.vector_store %arg12[%c1_285, %c0_286, %c0_287], %505 {strides = array<i32>} : memref<3x2x32xf32, #tpu.memory_space<vmem>>, vector<1x2x32xf32>,
    %c1_288 = arith.constant 1 : index
    %c0_289 = arith.constant 0 : index
    %c0_290 = arith.constant 0 : index
    %506 = vector.load %arg13[%c1_288, %c0_289, %c0_290] : memref<3x2x32xf32, #tpu.memory_space<vmem>>, vector<1x2x32xf32>
    %507 = vector.shape_cast %506 : vector<1x2x32xf32> to vector<2x32xf32>
    %508 = vector.shape_cast %500 : vector<2x32xf32> to vector<1x2x32xf32>
    tpu.vector_store %arg13[%c1_288, %c0_289, %c0_290], %508 {strides = array<i32>} : memref<3x2x32xf32, #tpu.memory_space<vmem>>, vector<1x2x32xf32>,
    %c2_291 = arith.constant 2 : index
    %c0_292 = arith.constant 0 : index
    %c0_293 = arith.constant 0 : index
    %509 = vector.load %arg12[%c2_291, %c0_292, %c0_293] : memref<3x2x32xf32, #tpu.memory_space<vmem>>, vector<1x2x32xf32>
    %510 = vector.shape_cast %509 : vector<1x2x32xf32> to vector<2x32xf32>
    %511 = tpu.concatenate %502, %510 in 1 : vector<2x32xf32>, vector<2x32xf32> -> vector<2x64xf32>
    %512 = arith.truncf %511 : vector<2x64xf32> to vector<2x64xbf16>
    %c0_294 = arith.constant 0 : index
    %c0_295 = arith.constant 0 : index
    %513 = vector.load %arg7[%c0_294, %c0_295] : memref<64x128xbf16, #tpu.memory_space<vmem>>, vector<64x128xbf16>
    %cst_296 = arith.constant dense<0.000000e+00> : vector<2x128xf32>
    %514 = tpu.matmul %512, %513, %cst_296 {dimension_numbers = #tpu.dot_dimension_numbers<[1], [0], [0], [1], [0, 0, 1, 1], [], []>} : vector<2x64xbf16>, vector<64x128xbf16>, vector<2x128xf32> -> vector<2x128xf32>
    %c0_297 = arith.constant 0 : index
    %c0_298 = arith.constant 0 : index
    %515 = vector.load %arg8[%c0_297, %c0_298] : memref<1x128xf32, #tpu.memory_space<vmem>>, vector<1x128xf32>
    %516 = vector.broadcast %515 : vector<1x128xf32> to vector<2x128xf32>
    %517 = arith.addf %514, %516 : vector<2x128xf32>
    %c2_299 = arith.constant 2 : index
    %c0_300 = arith.constant 0 : index
    %c0_301 = arith.constant 0 : index
    %518 = vector.load %arg13[%c2_299, %c0_300, %c0_301] : memref<3x2x32xf32, #tpu.memory_space<vmem>>, vector<1x2x32xf32>
    %519 = vector.shape_cast %518 : vector<1x2x32xf32> to vector<2x32xf32>
    %520 = arith.negf %517 : vector<2x128xf32>
    %521 = math.exp %520 : vector<2x128xf32>
    %cst_302 = arith.constant 1.000000e+00 : f32
    %522 = vector.broadcast %cst_302 : f32 to vector<2x128xf32>
    %523 = arith.addf %522, %521 : vector<2x128xf32>
    %524 = arith.divf %522, %523 : vector<2x128xf32>
    %525 = vector.extract_strided_slice %524 {offsets = [0, 0], sizes = [2, 32], strides = [1, 1]} : vector<2x128xf32> to vector<2x32xf32>
    %526 = vector.extract_strided_slice %524 {offsets = [0, 32], sizes = [2, 32], strides = [1, 1]} : vector<2x128xf32> to vector<2x32xf32>
    %527 = vector.extract_strided_slice %524 {offsets = [0, 64], sizes = [2, 32], strides = [1, 1]} : vector<2x128xf32> to vector<2x32xf32>
    %cst_303 = arith.constant 2.000000e+00 : f32
    %528 = vector.broadcast %cst_303 : f32 to vector<2x32xf32>
    %529 = arith.mulf %528, %527 : vector<2x32xf32>
    %cst_304 = arith.constant 1.000000e+00 : f32
    %530 = vector.broadcast %cst_304 : f32 to vector<2x32xf32>
    %531 = arith.subf %529, %530 : vector<2x32xf32>
    %532 = vector.extract_strided_slice %524 {offsets = [0, 96], sizes = [2, 32], strides = [1, 1]} : vector<2x128xf32> to vector<2x32xf32>
    %533 = arith.mulf %526, %519 : vector<2x32xf32>
    %534 = arith.mulf %525, %531 : vector<2x32xf32>
    %535 = arith.addf %533, %534 : vector<2x32xf32>
    %536 = math.tanh %535 : vector<2x32xf32>
    %537 = arith.mulf %532, %536 : vector<2x32xf32>
    %c2_305 = arith.constant 2 : index
    %c0_306 = arith.constant 0 : index
    %c0_307 = arith.constant 0 : index
    %538 = vector.load %arg12[%c2_305, %c0_306, %c0_307] : memref<3x2x32xf32, #tpu.memory_space<vmem>>, vector<1x2x32xf32>
    %539 = vector.shape_cast %538 : vector<1x2x32xf32> to vector<2x32xf32>
    %540 = vector.shape_cast %537 : vector<2x32xf32> to vector<1x2x32xf32>
    tpu.vector_store %arg12[%c2_305, %c0_306, %c0_307], %540 {strides = array<i32>} : memref<3x2x32xf32, #tpu.memory_space<vmem>>, vector<1x2x32xf32>,
    %c2_308 = arith.constant 2 : index
    %c0_309 = arith.constant 0 : index
    %c0_310 = arith.constant 0 : index
    %541 = vector.load %arg13[%c2_308, %c0_309, %c0_310] : memref<3x2x32xf32, #tpu.memory_space<vmem>>, vector<1x2x32xf32>
    %542 = vector.shape_cast %541 : vector<1x2x32xf32> to vector<2x32xf32>
    %543 = vector.shape_cast %535 : vector<2x32xf32> to vector<1x2x32xf32>
    tpu.vector_store %arg13[%c2_308, %c0_309, %c0_310], %543 {strides = array<i32>} : memref<3x2x32xf32, #tpu.memory_space<vmem>>, vector<1x2x32xf32>,
    %544 = arith.index_cast %439 : i32 to index
    %c0_311 = arith.constant 0 : index
    %545 = vector.load %arg15[%544, %c0_311] : memref<16x32xf32, #tpu.memory_space<vmem>>, vector<2x32xf32>
    tpu.vector_store %arg15[%544, %c0_311], %537 {strides = array<i32>} : memref<16x32xf32, #tpu.memory_space<vmem>>, vector<2x32xf32>,
    %c5_i32 = arith.constant 5 : i32
    %c2_i32_312 = arith.constant 2 : i32
    %546 = arith.muli %c5_i32, %c2_i32_312 : i32
    %547 = arith.index_cast %546 : i32 to index
    %c0_313 = arith.constant 0 : index
    %548 = vector.load %arg14[%547, %c0_313] : memref<16x128xf32, #tpu.memory_space<vmem>>, vector<2x128xf32>
    %c0_314 = arith.constant 0 : index
    %c0_315 = arith.constant 0 : index
    %c0_316 = arith.constant 0 : index
    %549 = vector.load %arg12[%c0_314, %c0_315, %c0_316] : memref<3x2x32xf32, #tpu.memory_space<vmem>>, vector<1x2x32xf32>
    %550 = vector.shape_cast %549 : vector<1x2x32xf32> to vector<2x32xf32>
    %551 = arith.truncf %550 : vector<2x32xf32> to vector<2x32xbf16>
    %c0_317 = arith.constant 0 : index
    %c0_318 = arith.constant 0 : index
    %552 = vector.load %arg3[%c0_317, %c0_318] : memref<32x128xbf16, #tpu.memory_space<vmem>>, vector<32x128xbf16>
    %cst_319 = arith.constant dense<0.000000e+00> : vector<2x128xf32>
    %553 = tpu.matmul %551, %552, %cst_319 {dimension_numbers = #tpu.dot_dimension_numbers<[1], [0], [0], [1], [0, 0, 1, 1], [], []>} : vector<2x32xbf16>, vector<32x128xbf16>, vector<2x128xf32> -> vector<2x128xf32>
    %554 = arith.addf %548, %553 : vector<2x128xf32>
    %c0_320 = arith.constant 0 : index
    %c0_321 = arith.constant 0 : index
    %c0_322 = arith.constant 0 : index
    %555 = vector.load %arg13[%c0_320, %c0_321, %c0_322] : memref<3x2x32xf32, #tpu.memory_space<vmem>>, vector<1x2x32xf32>
    %556 = vector.shape_cast %555 : vector<1x2x32xf32> to vector<2x32xf32>
    %557 = arith.negf %554 : vector<2x128xf32>
    %558 = math.exp %557 : vector<2x128xf32>
    %cst_323 = arith.constant 1.000000e+00 : f32
    %559 = vector.broadcast %cst_323 : f32 to vector<2x128xf32>
    %560 = arith.addf %559, %558 : vector<2x128xf32>
    %561 = arith.divf %559, %560 : vector<2x128xf32>
    %562 = vector.extract_strided_slice %561 {offsets = [0, 0], sizes = [2, 32], strides = [1, 1]} : vector<2x128xf32> to vector<2x32xf32>
    %563 = vector.extract_strided_slice %561 {offsets = [0, 32], sizes = [2, 32], strides = [1, 1]} : vector<2x128xf32> to vector<2x32xf32>
    %564 = vector.extract_strided_slice %561 {offsets = [0, 64], sizes = [2, 32], strides = [1, 1]} : vector<2x128xf32> to vector<2x32xf32>
    %cst_324 = arith.constant 2.000000e+00 : f32
    %565 = vector.broadcast %cst_324 : f32 to vector<2x32xf32>
    %566 = arith.mulf %565, %564 : vector<2x32xf32>
    %cst_325 = arith.constant 1.000000e+00 : f32
    %567 = vector.broadcast %cst_325 : f32 to vector<2x32xf32>
    %568 = arith.subf %566, %567 : vector<2x32xf32>
    %569 = vector.extract_strided_slice %561 {offsets = [0, 96], sizes = [2, 32], strides = [1, 1]} : vector<2x128xf32> to vector<2x32xf32>
    %570 = arith.mulf %563, %556 : vector<2x32xf32>
    %571 = arith.mulf %562, %568 : vector<2x32xf32>
    %572 = arith.addf %570, %571 : vector<2x32xf32>
    %573 = math.tanh %572 : vector<2x32xf32>
    %574 = arith.mulf %569, %573 : vector<2x32xf32>
    %c0_326 = arith.constant 0 : index
    %c0_327 = arith.constant 0 : index
    %c0_328 = arith.constant 0 : index
    %575 = vector.load %arg12[%c0_326, %c0_327, %c0_328] : memref<3x2x32xf32, #tpu.memory_space<vmem>>, vector<1x2x32xf32>
    %576 = vector.shape_cast %575 : vector<1x2x32xf32> to vector<2x32xf32>
    %577 = vector.shape_cast %574 : vector<2x32xf32> to vector<1x2x32xf32>
    tpu.vector_store %arg12[%c0_326, %c0_327, %c0_328], %577 {strides = array<i32>} : memref<3x2x32xf32, #tpu.memory_space<vmem>>, vector<1x2x32xf32>,
    %c0_329 = arith.constant 0 : index
    %c0_330 = arith.constant 0 : index
    %c0_331 = arith.constant 0 : index
    %578 = vector.load %arg13[%c0_329, %c0_330, %c0_331] : memref<3x2x32xf32, #tpu.memory_space<vmem>>, vector<1x2x32xf32>
    %579 = vector.shape_cast %578 : vector<1x2x32xf32> to vector<2x32xf32>
    %580 = vector.shape_cast %572 : vector<2x32xf32> to vector<1x2x32xf32>
    tpu.vector_store %arg13[%c0_329, %c0_330, %c0_331], %580 {strides = array<i32>} : memref<3x2x32xf32, #tpu.memory_space<vmem>>, vector<1x2x32xf32>,
    %c1_332 = arith.constant 1 : index
    %c0_333 = arith.constant 0 : index
    %c0_334 = arith.constant 0 : index
    %581 = vector.load %arg12[%c1_332, %c0_333, %c0_334] : memref<3x2x32xf32, #tpu.memory_space<vmem>>, vector<1x2x32xf32>
    %582 = vector.shape_cast %581 : vector<1x2x32xf32> to vector<2x32xf32>
    %583 = tpu.concatenate %574, %582 in 1 : vector<2x32xf32>, vector<2x32xf32> -> vector<2x64xf32>
    %584 = arith.truncf %583 : vector<2x64xf32> to vector<2x64xbf16>
    %c0_335 = arith.constant 0 : index
    %c0_336 = arith.constant 0 : index
    %585 = vector.load %arg5[%c0_335, %c0_336] : memref<64x128xbf16, #tpu.memory_space<vmem>>, vector<64x128xbf16>
    %cst_337 = arith.constant dense<0.000000e+00> : vector<2x128xf32>
    %586 = tpu.matmul %584, %585, %cst_337 {dimension_numbers = #tpu.dot_dimension_numbers<[1], [0], [0], [1], [0, 0, 1, 1], [], []>} : vector<2x64xbf16>, vector<64x128xbf16>, vector<2x128xf32> -> vector<2x128xf32>
    %c0_338 = arith.constant 0 : index
    %c0_339 = arith.constant 0 : index
    %587 = vector.load %arg6[%c0_338, %c0_339] : memref<1x128xf32, #tpu.memory_space<vmem>>, vector<1x128xf32>
    %588 = vector.broadcast %587 : vector<1x128xf32> to vector<2x128xf32>
    %589 = arith.addf %586, %588 : vector<2x128xf32>
    %c1_340 = arith.constant 1 : index
    %c0_341 = arith.constant 0 : index
    %c0_342 = arith.constant 0 : index
    %590 = vector.load %arg13[%c1_340, %c0_341, %c0_342] : memref<3x2x32xf32, #tpu.memory_space<vmem>>, vector<1x2x32xf32>
    %591 = vector.shape_cast %590 : vector<1x2x32xf32> to vector<2x32xf32>
    %592 = arith.negf %589 : vector<2x128xf32>
    %593 = math.exp %592 : vector<2x128xf32>
    %cst_343 = arith.constant 1.000000e+00 : f32
    %594 = vector.broadcast %cst_343 : f32 to vector<2x128xf32>
    %595 = arith.addf %594, %593 : vector<2x128xf32>
    %596 = arith.divf %594, %595 : vector<2x128xf32>
    %597 = vector.extract_strided_slice %596 {offsets = [0, 0], sizes = [2, 32], strides = [1, 1]} : vector<2x128xf32> to vector<2x32xf32>
    %598 = vector.extract_strided_slice %596 {offsets = [0, 32], sizes = [2, 32], strides = [1, 1]} : vector<2x128xf32> to vector<2x32xf32>
    %599 = vector.extract_strided_slice %596 {offsets = [0, 64], sizes = [2, 32], strides = [1, 1]} : vector<2x128xf32> to vector<2x32xf32>
    %cst_344 = arith.constant 2.000000e+00 : f32
    %600 = vector.broadcast %cst_344 : f32 to vector<2x32xf32>
    %601 = arith.mulf %600, %599 : vector<2x32xf32>
    %cst_345 = arith.constant 1.000000e+00 : f32
    %602 = vector.broadcast %cst_345 : f32 to vector<2x32xf32>
    %603 = arith.subf %601, %602 : vector<2x32xf32>
    %604 = vector.extract_strided_slice %596 {offsets = [0, 96], sizes = [2, 32], strides = [1, 1]} : vector<2x128xf32> to vector<2x32xf32>
    %605 = arith.mulf %598, %591 : vector<2x32xf32>
    %606 = arith.mulf %597, %603 : vector<2x32xf32>
    %607 = arith.addf %605, %606 : vector<2x32xf32>
    %608 = math.tanh %607 : vector<2x32xf32>
    %609 = arith.mulf %604, %608 : vector<2x32xf32>
    %c1_346 = arith.constant 1 : index
    %c0_347 = arith.constant 0 : index
    %c0_348 = arith.constant 0 : index
    %610 = vector.load %arg12[%c1_346, %c0_347, %c0_348] : memref<3x2x32xf32, #tpu.memory_space<vmem>>, vector<1x2x32xf32>
    %611 = vector.shape_cast %610 : vector<1x2x32xf32> to vector<2x32xf32>
    %612 = vector.shape_cast %609 : vector<2x32xf32> to vector<1x2x32xf32>
    tpu.vector_store %arg12[%c1_346, %c0_347, %c0_348], %612 {strides = array<i32>} : memref<3x2x32xf32, #tpu.memory_space<vmem>>, vector<1x2x32xf32>,
    %c1_349 = arith.constant 1 : index
    %c0_350 = arith.constant 0 : index
    %c0_351 = arith.constant 0 : index
    %613 = vector.load %arg13[%c1_349, %c0_350, %c0_351] : memref<3x2x32xf32, #tpu.memory_space<vmem>>, vector<1x2x32xf32>
    %614 = vector.shape_cast %613 : vector<1x2x32xf32> to vector<2x32xf32>
    %615 = vector.shape_cast %607 : vector<2x32xf32> to vector<1x2x32xf32>
    tpu.vector_store %arg13[%c1_349, %c0_350, %c0_351], %615 {strides = array<i32>} : memref<3x2x32xf32, #tpu.memory_space<vmem>>, vector<1x2x32xf32>,
    %c2_352 = arith.constant 2 : index
    %c0_353 = arith.constant 0 : index
    %c0_354 = arith.constant 0 : index
    %616 = vector.load %arg12[%c2_352, %c0_353, %c0_354] : memref<3x2x32xf32, #tpu.memory_space<vmem>>, vector<1x2x32xf32>
    %617 = vector.shape_cast %616 : vector<1x2x32xf32> to vector<2x32xf32>
    %618 = tpu.concatenate %609, %617 in 1 : vector<2x32xf32>, vector<2x32xf32> -> vector<2x64xf32>
    %619 = arith.truncf %618 : vector<2x64xf32> to vector<2x64xbf16>
    %c0_355 = arith.constant 0 : index
    %c0_356 = arith.constant 0 : index
    %620 = vector.load %arg7[%c0_355, %c0_356] : memref<64x128xbf16, #tpu.memory_space<vmem>>, vector<64x128xbf16>
    %cst_357 = arith.constant dense<0.000000e+00> : vector<2x128xf32>
    %621 = tpu.matmul %619, %620, %cst_357 {dimension_numbers = #tpu.dot_dimension_numbers<[1], [0], [0], [1], [0, 0, 1, 1], [], []>} : vector<2x64xbf16>, vector<64x128xbf16>, vector<2x128xf32> -> vector<2x128xf32>
    %c0_358 = arith.constant 0 : index
    %c0_359 = arith.constant 0 : index
    %622 = vector.load %arg8[%c0_358, %c0_359] : memref<1x128xf32, #tpu.memory_space<vmem>>, vector<1x128xf32>
    %623 = vector.broadcast %622 : vector<1x128xf32> to vector<2x128xf32>
    %624 = arith.addf %621, %623 : vector<2x128xf32>
    %c2_360 = arith.constant 2 : index
    %c0_361 = arith.constant 0 : index
    %c0_362 = arith.constant 0 : index
    %625 = vector.load %arg13[%c2_360, %c0_361, %c0_362] : memref<3x2x32xf32, #tpu.memory_space<vmem>>, vector<1x2x32xf32>
    %626 = vector.shape_cast %625 : vector<1x2x32xf32> to vector<2x32xf32>
    %627 = arith.negf %624 : vector<2x128xf32>
    %628 = math.exp %627 : vector<2x128xf32>
    %cst_363 = arith.constant 1.000000e+00 : f32
    %629 = vector.broadcast %cst_363 : f32 to vector<2x128xf32>
    %630 = arith.addf %629, %628 : vector<2x128xf32>
    %631 = arith.divf %629, %630 : vector<2x128xf32>
    %632 = vector.extract_strided_slice %631 {offsets = [0, 0], sizes = [2, 32], strides = [1, 1]} : vector<2x128xf32> to vector<2x32xf32>
    %633 = vector.extract_strided_slice %631 {offsets = [0, 32], sizes = [2, 32], strides = [1, 1]} : vector<2x128xf32> to vector<2x32xf32>
    %634 = vector.extract_strided_slice %631 {offsets = [0, 64], sizes = [2, 32], strides = [1, 1]} : vector<2x128xf32> to vector<2x32xf32>
    %cst_364 = arith.constant 2.000000e+00 : f32
    %635 = vector.broadcast %cst_364 : f32 to vector<2x32xf32>
    %636 = arith.mulf %635, %634 : vector<2x32xf32>
    %cst_365 = arith.constant 1.000000e+00 : f32
    %637 = vector.broadcast %cst_365 : f32 to vector<2x32xf32>
    %638 = arith.subf %636, %637 : vector<2x32xf32>
    %639 = vector.extract_strided_slice %631 {offsets = [0, 96], sizes = [2, 32], strides = [1, 1]} : vector<2x128xf32> to vector<2x32xf32>
    %640 = arith.mulf %633, %626 : vector<2x32xf32>
    %641 = arith.mulf %632, %638 : vector<2x32xf32>
    %642 = arith.addf %640, %641 : vector<2x32xf32>
    %643 = math.tanh %642 : vector<2x32xf32>
    %644 = arith.mulf %639, %643 : vector<2x32xf32>
    %c2_366 = arith.constant 2 : index
    %c0_367 = arith.constant 0 : index
    %c0_368 = arith.constant 0 : index
    %645 = vector.load %arg12[%c2_366, %c0_367, %c0_368] : memref<3x2x32xf32, #tpu.memory_space<vmem>>, vector<1x2x32xf32>
    %646 = vector.shape_cast %645 : vector<1x2x32xf32> to vector<2x32xf32>
    %647 = vector.shape_cast %644 : vector<2x32xf32> to vector<1x2x32xf32>
    tpu.vector_store %arg12[%c2_366, %c0_367, %c0_368], %647 {strides = array<i32>} : memref<3x2x32xf32, #tpu.memory_space<vmem>>, vector<1x2x32xf32>,
    %c2_369 = arith.constant 2 : index
    %c0_370 = arith.constant 0 : index
    %c0_371 = arith.constant 0 : index
    %648 = vector.load %arg13[%c2_369, %c0_370, %c0_371] : memref<3x2x32xf32, #tpu.memory_space<vmem>>, vector<1x2x32xf32>
    %649 = vector.shape_cast %648 : vector<1x2x32xf32> to vector<2x32xf32>
    %650 = vector.shape_cast %642 : vector<2x32xf32> to vector<1x2x32xf32>
    tpu.vector_store %arg13[%c2_369, %c0_370, %c0_371], %650 {strides = array<i32>} : memref<3x2x32xf32, #tpu.memory_space<vmem>>, vector<1x2x32xf32>,
    %651 = arith.index_cast %546 : i32 to index
    %c0_372 = arith.constant 0 : index
    %652 = vector.load %arg15[%651, %c0_372] : memref<16x32xf32, #tpu.memory_space<vmem>>, vector<2x32xf32>
    tpu.vector_store %arg15[%651, %c0_372], %644 {strides = array<i32>} : memref<16x32xf32, #tpu.memory_space<vmem>>, vector<2x32xf32>,
    %c6_i32 = arith.constant 6 : i32
    %c2_i32_373 = arith.constant 2 : i32
    %653 = arith.muli %c6_i32, %c2_i32_373 : i32
    %654 = arith.index_cast %653 : i32 to index
    %c0_374 = arith.constant 0 : index
    %655 = vector.load %arg14[%654, %c0_374] : memref<16x128xf32, #tpu.memory_space<vmem>>, vector<2x128xf32>
    %c0_375 = arith.constant 0 : index
    %c0_376 = arith.constant 0 : index
    %c0_377 = arith.constant 0 : index
    %656 = vector.load %arg12[%c0_375, %c0_376, %c0_377] : memref<3x2x32xf32, #tpu.memory_space<vmem>>, vector<1x2x32xf32>
    %657 = vector.shape_cast %656 : vector<1x2x32xf32> to vector<2x32xf32>
    %658 = arith.truncf %657 : vector<2x32xf32> to vector<2x32xbf16>
    %c0_378 = arith.constant 0 : index
    %c0_379 = arith.constant 0 : index
    %659 = vector.load %arg3[%c0_378, %c0_379] : memref<32x128xbf16, #tpu.memory_space<vmem>>, vector<32x128xbf16>
    %cst_380 = arith.constant dense<0.000000e+00> : vector<2x128xf32>
    %660 = tpu.matmul %658, %659, %cst_380 {dimension_numbers = #tpu.dot_dimension_numbers<[1], [0], [0], [1], [0, 0, 1, 1], [], []>} : vector<2x32xbf16>, vector<32x128xbf16>, vector<2x128xf32> -> vector<2x128xf32>
    %661 = arith.addf %655, %660 : vector<2x128xf32>
    %c0_381 = arith.constant 0 : index
    %c0_382 = arith.constant 0 : index
    %c0_383 = arith.constant 0 : index
    %662 = vector.load %arg13[%c0_381, %c0_382, %c0_383] : memref<3x2x32xf32, #tpu.memory_space<vmem>>, vector<1x2x32xf32>
    %663 = vector.shape_cast %662 : vector<1x2x32xf32> to vector<2x32xf32>
    %664 = arith.negf %661 : vector<2x128xf32>
    %665 = math.exp %664 : vector<2x128xf32>
    %cst_384 = arith.constant 1.000000e+00 : f32
    %666 = vector.broadcast %cst_384 : f32 to vector<2x128xf32>
    %667 = arith.addf %666, %665 : vector<2x128xf32>
    %668 = arith.divf %666, %667 : vector<2x128xf32>
    %669 = vector.extract_strided_slice %668 {offsets = [0, 0], sizes = [2, 32], strides = [1, 1]} : vector<2x128xf32> to vector<2x32xf32>
    %670 = vector.extract_strided_slice %668 {offsets = [0, 32], sizes = [2, 32], strides = [1, 1]} : vector<2x128xf32> to vector<2x32xf32>
    %671 = vector.extract_strided_slice %668 {offsets = [0, 64], sizes = [2, 32], strides = [1, 1]} : vector<2x128xf32> to vector<2x32xf32>
    %cst_385 = arith.constant 2.000000e+00 : f32
    %672 = vector.broadcast %cst_385 : f32 to vector<2x32xf32>
    %673 = arith.mulf %672, %671 : vector<2x32xf32>
    %cst_386 = arith.constant 1.000000e+00 : f32
    %674 = vector.broadcast %cst_386 : f32 to vector<2x32xf32>
    %675 = arith.subf %673, %674 : vector<2x32xf32>
    %676 = vector.extract_strided_slice %668 {offsets = [0, 96], sizes = [2, 32], strides = [1, 1]} : vector<2x128xf32> to vector<2x32xf32>
    %677 = arith.mulf %670, %663 : vector<2x32xf32>
    %678 = arith.mulf %669, %675 : vector<2x32xf32>
    %679 = arith.addf %677, %678 : vector<2x32xf32>
    %680 = math.tanh %679 : vector<2x32xf32>
    %681 = arith.mulf %676, %680 : vector<2x32xf32>
    %c0_387 = arith.constant 0 : index
    %c0_388 = arith.constant 0 : index
    %c0_389 = arith.constant 0 : index
    %682 = vector.load %arg12[%c0_387, %c0_388, %c0_389] : memref<3x2x32xf32, #tpu.memory_space<vmem>>, vector<1x2x32xf32>
    %683 = vector.shape_cast %682 : vector<1x2x32xf32> to vector<2x32xf32>
    %684 = vector.shape_cast %681 : vector<2x32xf32> to vector<1x2x32xf32>
    tpu.vector_store %arg12[%c0_387, %c0_388, %c0_389], %684 {strides = array<i32>} : memref<3x2x32xf32, #tpu.memory_space<vmem>>, vector<1x2x32xf32>,
    %c0_390 = arith.constant 0 : index
    %c0_391 = arith.constant 0 : index
    %c0_392 = arith.constant 0 : index
    %685 = vector.load %arg13[%c0_390, %c0_391, %c0_392] : memref<3x2x32xf32, #tpu.memory_space<vmem>>, vector<1x2x32xf32>
    %686 = vector.shape_cast %685 : vector<1x2x32xf32> to vector<2x32xf32>
    %687 = vector.shape_cast %679 : vector<2x32xf32> to vector<1x2x32xf32>
    tpu.vector_store %arg13[%c0_390, %c0_391, %c0_392], %687 {strides = array<i32>} : memref<3x2x32xf32, #tpu.memory_space<vmem>>, vector<1x2x32xf32>,
    %c1_393 = arith.constant 1 : index
    %c0_394 = arith.constant 0 : index
    %c0_395 = arith.constant 0 : index
    %688 = vector.load %arg12[%c1_393, %c0_394, %c0_395] : memref<3x2x32xf32, #tpu.memory_space<vmem>>, vector<1x2x32xf32>
    %689 = vector.shape_cast %688 : vector<1x2x32xf32> to vector<2x32xf32>
    %690 = tpu.concatenate %681, %689 in 1 : vector<2x32xf32>, vector<2x32xf32> -> vector<2x64xf32>
    %691 = arith.truncf %690 : vector<2x64xf32> to vector<2x64xbf16>
    %c0_396 = arith.constant 0 : index
    %c0_397 = arith.constant 0 : index
    %692 = vector.load %arg5[%c0_396, %c0_397] : memref<64x128xbf16, #tpu.memory_space<vmem>>, vector<64x128xbf16>
    %cst_398 = arith.constant dense<0.000000e+00> : vector<2x128xf32>
    %693 = tpu.matmul %691, %692, %cst_398 {dimension_numbers = #tpu.dot_dimension_numbers<[1], [0], [0], [1], [0, 0, 1, 1], [], []>} : vector<2x64xbf16>, vector<64x128xbf16>, vector<2x128xf32> -> vector<2x128xf32>
    %c0_399 = arith.constant 0 : index
    %c0_400 = arith.constant 0 : index
    %694 = vector.load %arg6[%c0_399, %c0_400] : memref<1x128xf32, #tpu.memory_space<vmem>>, vector<1x128xf32>
    %695 = vector.broadcast %694 : vector<1x128xf32> to vector<2x128xf32>
    %696 = arith.addf %693, %695 : vector<2x128xf32>
    %c1_401 = arith.constant 1 : index
    %c0_402 = arith.constant 0 : index
    %c0_403 = arith.constant 0 : index
    %697 = vector.load %arg13[%c1_401, %c0_402, %c0_403] : memref<3x2x32xf32, #tpu.memory_space<vmem>>, vector<1x2x32xf32>
    %698 = vector.shape_cast %697 : vector<1x2x32xf32> to vector<2x32xf32>
    %699 = arith.negf %696 : vector<2x128xf32>
    %700 = math.exp %699 : vector<2x128xf32>
    %cst_404 = arith.constant 1.000000e+00 : f32
    %701 = vector.broadcast %cst_404 : f32 to vector<2x128xf32>
    %702 = arith.addf %701, %700 : vector<2x128xf32>
    %703 = arith.divf %701, %702 : vector<2x128xf32>
    %704 = vector.extract_strided_slice %703 {offsets = [0, 0], sizes = [2, 32], strides = [1, 1]} : vector<2x128xf32> to vector<2x32xf32>
    %705 = vector.extract_strided_slice %703 {offsets = [0, 32], sizes = [2, 32], strides = [1, 1]} : vector<2x128xf32> to vector<2x32xf32>
    %706 = vector.extract_strided_slice %703 {offsets = [0, 64], sizes = [2, 32], strides = [1, 1]} : vector<2x128xf32> to vector<2x32xf32>
    %cst_405 = arith.constant 2.000000e+00 : f32
    %707 = vector.broadcast %cst_405 : f32 to vector<2x32xf32>
    %708 = arith.mulf %707, %706 : vector<2x32xf32>
    %cst_406 = arith.constant 1.000000e+00 : f32
    %709 = vector.broadcast %cst_406 : f32 to vector<2x32xf32>
    %710 = arith.subf %708, %709 : vector<2x32xf32>
    %711 = vector.extract_strided_slice %703 {offsets = [0, 96], sizes = [2, 32], strides = [1, 1]} : vector<2x128xf32> to vector<2x32xf32>
    %712 = arith.mulf %705, %698 : vector<2x32xf32>
    %713 = arith.mulf %704, %710 : vector<2x32xf32>
    %714 = arith.addf %712, %713 : vector<2x32xf32>
    %715 = math.tanh %714 : vector<2x32xf32>
    %716 = arith.mulf %711, %715 : vector<2x32xf32>
    %c1_407 = arith.constant 1 : index
    %c0_408 = arith.constant 0 : index
    %c0_409 = arith.constant 0 : index
    %717 = vector.load %arg12[%c1_407, %c0_408, %c0_409] : memref<3x2x32xf32, #tpu.memory_space<vmem>>, vector<1x2x32xf32>
    %718 = vector.shape_cast %717 : vector<1x2x32xf32> to vector<2x32xf32>
    %719 = vector.shape_cast %716 : vector<2x32xf32> to vector<1x2x32xf32>
    tpu.vector_store %arg12[%c1_407, %c0_408, %c0_409], %719 {strides = array<i32>} : memref<3x2x32xf32, #tpu.memory_space<vmem>>, vector<1x2x32xf32>,
    %c1_410 = arith.constant 1 : index
    %c0_411 = arith.constant 0 : index
    %c0_412 = arith.constant 0 : index
    %720 = vector.load %arg13[%c1_410, %c0_411, %c0_412] : memref<3x2x32xf32, #tpu.memory_space<vmem>>, vector<1x2x32xf32>
    %721 = vector.shape_cast %720 : vector<1x2x32xf32> to vector<2x32xf32>
    %722 = vector.shape_cast %714 : vector<2x32xf32> to vector<1x2x32xf32>
    tpu.vector_store %arg13[%c1_410, %c0_411, %c0_412], %722 {strides = array<i32>} : memref<3x2x32xf32, #tpu.memory_space<vmem>>, vector<1x2x32xf32>,
    %c2_413 = arith.constant 2 : index
    %c0_414 = arith.constant 0 : index
    %c0_415 = arith.constant 0 : index
    %723 = vector.load %arg12[%c2_413, %c0_414, %c0_415] : memref<3x2x32xf32, #tpu.memory_space<vmem>>, vector<1x2x32xf32>
    %724 = vector.shape_cast %723 : vector<1x2x32xf32> to vector<2x32xf32>
    %725 = tpu.concatenate %716, %724 in 1 : vector<2x32xf32>, vector<2x32xf32> -> vector<2x64xf32>
    %726 = arith.truncf %725 : vector<2x64xf32> to vector<2x64xbf16>
    %c0_416 = arith.constant 0 : index
    %c0_417 = arith.constant 0 : index
    %727 = vector.load %arg7[%c0_416, %c0_417] : memref<64x128xbf16, #tpu.memory_space<vmem>>, vector<64x128xbf16>
    %cst_418 = arith.constant dense<0.000000e+00> : vector<2x128xf32>
    %728 = tpu.matmul %726, %727, %cst_418 {dimension_numbers = #tpu.dot_dimension_numbers<[1], [0], [0], [1], [0, 0, 1, 1], [], []>} : vector<2x64xbf16>, vector<64x128xbf16>, vector<2x128xf32> -> vector<2x128xf32>
    %c0_419 = arith.constant 0 : index
    %c0_420 = arith.constant 0 : index
    %729 = vector.load %arg8[%c0_419, %c0_420] : memref<1x128xf32, #tpu.memory_space<vmem>>, vector<1x128xf32>
    %730 = vector.broadcast %729 : vector<1x128xf32> to vector<2x128xf32>
    %731 = arith.addf %728, %730 : vector<2x128xf32>
    %c2_421 = arith.constant 2 : index
    %c0_422 = arith.constant 0 : index
    %c0_423 = arith.constant 0 : index
    %732 = vector.load %arg13[%c2_421, %c0_422, %c0_423] : memref<3x2x32xf32, #tpu.memory_space<vmem>>, vector<1x2x32xf32>
    %733 = vector.shape_cast %732 : vector<1x2x32xf32> to vector<2x32xf32>
    %734 = arith.negf %731 : vector<2x128xf32>
    %735 = math.exp %734 : vector<2x128xf32>
    %cst_424 = arith.constant 1.000000e+00 : f32
    %736 = vector.broadcast %cst_424 : f32 to vector<2x128xf32>
    %737 = arith.addf %736, %735 : vector<2x128xf32>
    %738 = arith.divf %736, %737 : vector<2x128xf32>
    %739 = vector.extract_strided_slice %738 {offsets = [0, 0], sizes = [2, 32], strides = [1, 1]} : vector<2x128xf32> to vector<2x32xf32>
    %740 = vector.extract_strided_slice %738 {offsets = [0, 32], sizes = [2, 32], strides = [1, 1]} : vector<2x128xf32> to vector<2x32xf32>
    %741 = vector.extract_strided_slice %738 {offsets = [0, 64], sizes = [2, 32], strides = [1, 1]} : vector<2x128xf32> to vector<2x32xf32>
    %cst_425 = arith.constant 2.000000e+00 : f32
    %742 = vector.broadcast %cst_425 : f32 to vector<2x32xf32>
    %743 = arith.mulf %742, %741 : vector<2x32xf32>
    %cst_426 = arith.constant 1.000000e+00 : f32
    %744 = vector.broadcast %cst_426 : f32 to vector<2x32xf32>
    %745 = arith.subf %743, %744 : vector<2x32xf32>
    %746 = vector.extract_strided_slice %738 {offsets = [0, 96], sizes = [2, 32], strides = [1, 1]} : vector<2x128xf32> to vector<2x32xf32>
    %747 = arith.mulf %740, %733 : vector<2x32xf32>
    %748 = arith.mulf %739, %745 : vector<2x32xf32>
    %749 = arith.addf %747, %748 : vector<2x32xf32>
    %750 = math.tanh %749 : vector<2x32xf32>
    %751 = arith.mulf %746, %750 : vector<2x32xf32>
    %c2_427 = arith.constant 2 : index
    %c0_428 = arith.constant 0 : index
    %c0_429 = arith.constant 0 : index
    %752 = vector.load %arg12[%c2_427, %c0_428, %c0_429] : memref<3x2x32xf32, #tpu.memory_space<vmem>>, vector<1x2x32xf32>
    %753 = vector.shape_cast %752 : vector<1x2x32xf32> to vector<2x32xf32>
    %754 = vector.shape_cast %751 : vector<2x32xf32> to vector<1x2x32xf32>
    tpu.vector_store %arg12[%c2_427, %c0_428, %c0_429], %754 {strides = array<i32>} : memref<3x2x32xf32, #tpu.memory_space<vmem>>, vector<1x2x32xf32>,
    %c2_430 = arith.constant 2 : index
    %c0_431 = arith.constant 0 : index
    %c0_432 = arith.constant 0 : index
    %755 = vector.load %arg13[%c2_430, %c0_431, %c0_432] : memref<3x2x32xf32, #tpu.memory_space<vmem>>, vector<1x2x32xf32>
    %756 = vector.shape_cast %755 : vector<1x2x32xf32> to vector<2x32xf32>
    %757 = vector.shape_cast %749 : vector<2x32xf32> to vector<1x2x32xf32>
    tpu.vector_store %arg13[%c2_430, %c0_431, %c0_432], %757 {strides = array<i32>} : memref<3x2x32xf32, #tpu.memory_space<vmem>>, vector<1x2x32xf32>,
    %758 = arith.index_cast %653 : i32 to index
    %c0_433 = arith.constant 0 : index
    %759 = vector.load %arg15[%758, %c0_433] : memref<16x32xf32, #tpu.memory_space<vmem>>, vector<2x32xf32>
    tpu.vector_store %arg15[%758, %c0_433], %751 {strides = array<i32>} : memref<16x32xf32, #tpu.memory_space<vmem>>, vector<2x32xf32>,
    %c7_i32 = arith.constant 7 : i32
    %c2_i32_434 = arith.constant 2 : i32
    %760 = arith.muli %c7_i32, %c2_i32_434 : i32
    %761 = arith.index_cast %760 : i32 to index
    %c0_435 = arith.constant 0 : index
    %762 = vector.load %arg14[%761, %c0_435] : memref<16x128xf32, #tpu.memory_space<vmem>>, vector<2x128xf32>
    %c0_436 = arith.constant 0 : index
    %c0_437 = arith.constant 0 : index
    %c0_438 = arith.constant 0 : index
    %763 = vector.load %arg12[%c0_436, %c0_437, %c0_438] : memref<3x2x32xf32, #tpu.memory_space<vmem>>, vector<1x2x32xf32>
    %764 = vector.shape_cast %763 : vector<1x2x32xf32> to vector<2x32xf32>
    %765 = arith.truncf %764 : vector<2x32xf32> to vector<2x32xbf16>
    %c0_439 = arith.constant 0 : index
    %c0_440 = arith.constant 0 : index
    %766 = vector.load %arg3[%c0_439, %c0_440] : memref<32x128xbf16, #tpu.memory_space<vmem>>, vector<32x128xbf16>
    %cst_441 = arith.constant dense<0.000000e+00> : vector<2x128xf32>
    %767 = tpu.matmul %765, %766, %cst_441 {dimension_numbers = #tpu.dot_dimension_numbers<[1], [0], [0], [1], [0, 0, 1, 1], [], []>} : vector<2x32xbf16>, vector<32x128xbf16>, vector<2x128xf32> -> vector<2x128xf32>
    %768 = arith.addf %762, %767 : vector<2x128xf32>
    %c0_442 = arith.constant 0 : index
    %c0_443 = arith.constant 0 : index
    %c0_444 = arith.constant 0 : index
    %769 = vector.load %arg13[%c0_442, %c0_443, %c0_444] : memref<3x2x32xf32, #tpu.memory_space<vmem>>, vector<1x2x32xf32>
    %770 = vector.shape_cast %769 : vector<1x2x32xf32> to vector<2x32xf32>
    %771 = arith.negf %768 : vector<2x128xf32>
    %772 = math.exp %771 : vector<2x128xf32>
    %cst_445 = arith.constant 1.000000e+00 : f32
    %773 = vector.broadcast %cst_445 : f32 to vector<2x128xf32>
    %774 = arith.addf %773, %772 : vector<2x128xf32>
    %775 = arith.divf %773, %774 : vector<2x128xf32>
    %776 = vector.extract_strided_slice %775 {offsets = [0, 0], sizes = [2, 32], strides = [1, 1]} : vector<2x128xf32> to vector<2x32xf32>
    %777 = vector.extract_strided_slice %775 {offsets = [0, 32], sizes = [2, 32], strides = [1, 1]} : vector<2x128xf32> to vector<2x32xf32>
    %778 = vector.extract_strided_slice %775 {offsets = [0, 64], sizes = [2, 32], strides = [1, 1]} : vector<2x128xf32> to vector<2x32xf32>
    %cst_446 = arith.constant 2.000000e+00 : f32
    %779 = vector.broadcast %cst_446 : f32 to vector<2x32xf32>
    %780 = arith.mulf %779, %778 : vector<2x32xf32>
    %cst_447 = arith.constant 1.000000e+00 : f32
    %781 = vector.broadcast %cst_447 : f32 to vector<2x32xf32>
    %782 = arith.subf %780, %781 : vector<2x32xf32>
    %783 = vector.extract_strided_slice %775 {offsets = [0, 96], sizes = [2, 32], strides = [1, 1]} : vector<2x128xf32> to vector<2x32xf32>
    %784 = arith.mulf %777, %770 : vector<2x32xf32>
    %785 = arith.mulf %776, %782 : vector<2x32xf32>
    %786 = arith.addf %784, %785 : vector<2x32xf32>
    %787 = math.tanh %786 : vector<2x32xf32>
    %788 = arith.mulf %783, %787 : vector<2x32xf32>
    %c0_448 = arith.constant 0 : index
    %c0_449 = arith.constant 0 : index
    %c0_450 = arith.constant 0 : index
    %789 = vector.load %arg12[%c0_448, %c0_449, %c0_450] : memref<3x2x32xf32, #tpu.memory_space<vmem>>, vector<1x2x32xf32>
    %790 = vector.shape_cast %789 : vector<1x2x32xf32> to vector<2x32xf32>
    %791 = vector.shape_cast %788 : vector<2x32xf32> to vector<1x2x32xf32>
    tpu.vector_store %arg12[%c0_448, %c0_449, %c0_450], %791 {strides = array<i32>} : memref<3x2x32xf32, #tpu.memory_space<vmem>>, vector<1x2x32xf32>,
    %c0_451 = arith.constant 0 : index
    %c0_452 = arith.constant 0 : index
    %c0_453 = arith.constant 0 : index
    %792 = vector.load %arg13[%c0_451, %c0_452, %c0_453] : memref<3x2x32xf32, #tpu.memory_space<vmem>>, vector<1x2x32xf32>
    %793 = vector.shape_cast %792 : vector<1x2x32xf32> to vector<2x32xf32>
    %794 = vector.shape_cast %786 : vector<2x32xf32> to vector<1x2x32xf32>
    tpu.vector_store %arg13[%c0_451, %c0_452, %c0_453], %794 {strides = array<i32>} : memref<3x2x32xf32, #tpu.memory_space<vmem>>, vector<1x2x32xf32>,
    %c1_454 = arith.constant 1 : index
    %c0_455 = arith.constant 0 : index
    %c0_456 = arith.constant 0 : index
    %795 = vector.load %arg12[%c1_454, %c0_455, %c0_456] : memref<3x2x32xf32, #tpu.memory_space<vmem>>, vector<1x2x32xf32>
    %796 = vector.shape_cast %795 : vector<1x2x32xf32> to vector<2x32xf32>
    %797 = tpu.concatenate %788, %796 in 1 : vector<2x32xf32>, vector<2x32xf32> -> vector<2x64xf32>
    %798 = arith.truncf %797 : vector<2x64xf32> to vector<2x64xbf16>
    %c0_457 = arith.constant 0 : index
    %c0_458 = arith.constant 0 : index
    %799 = vector.load %arg5[%c0_457, %c0_458] : memref<64x128xbf16, #tpu.memory_space<vmem>>, vector<64x128xbf16>
    %cst_459 = arith.constant dense<0.000000e+00> : vector<2x128xf32>
    %800 = tpu.matmul %798, %799, %cst_459 {dimension_numbers = #tpu.dot_dimension_numbers<[1], [0], [0], [1], [0, 0, 1, 1], [], []>} : vector<2x64xbf16>, vector<64x128xbf16>, vector<2x128xf32> -> vector<2x128xf32>
    %c0_460 = arith.constant 0 : index
    %c0_461 = arith.constant 0 : index
    %801 = vector.load %arg6[%c0_460, %c0_461] : memref<1x128xf32, #tpu.memory_space<vmem>>, vector<1x128xf32>
    %802 = vector.broadcast %801 : vector<1x128xf32> to vector<2x128xf32>
    %803 = arith.addf %800, %802 : vector<2x128xf32>
    %c1_462 = arith.constant 1 : index
    %c0_463 = arith.constant 0 : index
    %c0_464 = arith.constant 0 : index
    %804 = vector.load %arg13[%c1_462, %c0_463, %c0_464] : memref<3x2x32xf32, #tpu.memory_space<vmem>>, vector<1x2x32xf32>
    %805 = vector.shape_cast %804 : vector<1x2x32xf32> to vector<2x32xf32>
    %806 = arith.negf %803 : vector<2x128xf32>
    %807 = math.exp %806 : vector<2x128xf32>
    %cst_465 = arith.constant 1.000000e+00 : f32
    %808 = vector.broadcast %cst_465 : f32 to vector<2x128xf32>
    %809 = arith.addf %808, %807 : vector<2x128xf32>
    %810 = arith.divf %808, %809 : vector<2x128xf32>
    %811 = vector.extract_strided_slice %810 {offsets = [0, 0], sizes = [2, 32], strides = [1, 1]} : vector<2x128xf32> to vector<2x32xf32>
    %812 = vector.extract_strided_slice %810 {offsets = [0, 32], sizes = [2, 32], strides = [1, 1]} : vector<2x128xf32> to vector<2x32xf32>
    %813 = vector.extract_strided_slice %810 {offsets = [0, 64], sizes = [2, 32], strides = [1, 1]} : vector<2x128xf32> to vector<2x32xf32>
    %cst_466 = arith.constant 2.000000e+00 : f32
    %814 = vector.broadcast %cst_466 : f32 to vector<2x32xf32>
    %815 = arith.mulf %814, %813 : vector<2x32xf32>
    %cst_467 = arith.constant 1.000000e+00 : f32
    %816 = vector.broadcast %cst_467 : f32 to vector<2x32xf32>
    %817 = arith.subf %815, %816 : vector<2x32xf32>
    %818 = vector.extract_strided_slice %810 {offsets = [0, 96], sizes = [2, 32], strides = [1, 1]} : vector<2x128xf32> to vector<2x32xf32>
    %819 = arith.mulf %812, %805 : vector<2x32xf32>
    %820 = arith.mulf %811, %817 : vector<2x32xf32>
    %821 = arith.addf %819, %820 : vector<2x32xf32>
    %822 = math.tanh %821 : vector<2x32xf32>
    %823 = arith.mulf %818, %822 : vector<2x32xf32>
    %c1_468 = arith.constant 1 : index
    %c0_469 = arith.constant 0 : index
    %c0_470 = arith.constant 0 : index
    %824 = vector.load %arg12[%c1_468, %c0_469, %c0_470] : memref<3x2x32xf32, #tpu.memory_space<vmem>>, vector<1x2x32xf32>
    %825 = vector.shape_cast %824 : vector<1x2x32xf32> to vector<2x32xf32>
    %826 = vector.shape_cast %823 : vector<2x32xf32> to vector<1x2x32xf32>
    tpu.vector_store %arg12[%c1_468, %c0_469, %c0_470], %826 {strides = array<i32>} : memref<3x2x32xf32, #tpu.memory_space<vmem>>, vector<1x2x32xf32>,
    %c1_471 = arith.constant 1 : index
    %c0_472 = arith.constant 0 : index
    %c0_473 = arith.constant 0 : index
    %827 = vector.load %arg13[%c1_471, %c0_472, %c0_473] : memref<3x2x32xf32, #tpu.memory_space<vmem>>, vector<1x2x32xf32>
    %828 = vector.shape_cast %827 : vector<1x2x32xf32> to vector<2x32xf32>
    %829 = vector.shape_cast %821 : vector<2x32xf32> to vector<1x2x32xf32>
    tpu.vector_store %arg13[%c1_471, %c0_472, %c0_473], %829 {strides = array<i32>} : memref<3x2x32xf32, #tpu.memory_space<vmem>>, vector<1x2x32xf32>,
    %c2_474 = arith.constant 2 : index
    %c0_475 = arith.constant 0 : index
    %c0_476 = arith.constant 0 : index
    %830 = vector.load %arg12[%c2_474, %c0_475, %c0_476] : memref<3x2x32xf32, #tpu.memory_space<vmem>>, vector<1x2x32xf32>
    %831 = vector.shape_cast %830 : vector<1x2x32xf32> to vector<2x32xf32>
    %832 = tpu.concatenate %823, %831 in 1 : vector<2x32xf32>, vector<2x32xf32> -> vector<2x64xf32>
    %833 = arith.truncf %832 : vector<2x64xf32> to vector<2x64xbf16>
    %c0_477 = arith.constant 0 : index
    %c0_478 = arith.constant 0 : index
    %834 = vector.load %arg7[%c0_477, %c0_478] : memref<64x128xbf16, #tpu.memory_space<vmem>>, vector<64x128xbf16>
    %cst_479 = arith.constant dense<0.000000e+00> : vector<2x128xf32>
    %835 = tpu.matmul %833, %834, %cst_479 {dimension_numbers = #tpu.dot_dimension_numbers<[1], [0], [0], [1], [0, 0, 1, 1], [], []>} : vector<2x64xbf16>, vector<64x128xbf16>, vector<2x128xf32> -> vector<2x128xf32>
    %c0_480 = arith.constant 0 : index
    %c0_481 = arith.constant 0 : index
    %836 = vector.load %arg8[%c0_480, %c0_481] : memref<1x128xf32, #tpu.memory_space<vmem>>, vector<1x128xf32>
    %837 = vector.broadcast %836 : vector<1x128xf32> to vector<2x128xf32>
    %838 = arith.addf %835, %837 : vector<2x128xf32>
    %c2_482 = arith.constant 2 : index
    %c0_483 = arith.constant 0 : index
    %c0_484 = arith.constant 0 : index
    %839 = vector.load %arg13[%c2_482, %c0_483, %c0_484] : memref<3x2x32xf32, #tpu.memory_space<vmem>>, vector<1x2x32xf32>
    %840 = vector.shape_cast %839 : vector<1x2x32xf32> to vector<2x32xf32>
    %841 = arith.negf %838 : vector<2x128xf32>
    %842 = math.exp %841 : vector<2x128xf32>
    %cst_485 = arith.constant 1.000000e+00 : f32
    %843 = vector.broadcast %cst_485 : f32 to vector<2x128xf32>
    %844 = arith.addf %843, %842 : vector<2x128xf32>
    %845 = arith.divf %843, %844 : vector<2x128xf32>
    %846 = vector.extract_strided_slice %845 {offsets = [0, 0], sizes = [2, 32], strides = [1, 1]} : vector<2x128xf32> to vector<2x32xf32>
    %847 = vector.extract_strided_slice %845 {offsets = [0, 32], sizes = [2, 32], strides = [1, 1]} : vector<2x128xf32> to vector<2x32xf32>
    %848 = vector.extract_strided_slice %845 {offsets = [0, 64], sizes = [2, 32], strides = [1, 1]} : vector<2x128xf32> to vector<2x32xf32>
    %cst_486 = arith.constant 2.000000e+00 : f32
    %849 = vector.broadcast %cst_486 : f32 to vector<2x32xf32>
    %850 = arith.mulf %849, %848 : vector<2x32xf32>
    %cst_487 = arith.constant 1.000000e+00 : f32
    %851 = vector.broadcast %cst_487 : f32 to vector<2x32xf32>
    %852 = arith.subf %850, %851 : vector<2x32xf32>
    %853 = vector.extract_strided_slice %845 {offsets = [0, 96], sizes = [2, 32], strides = [1, 1]} : vector<2x128xf32> to vector<2x32xf32>
    %854 = arith.mulf %847, %840 : vector<2x32xf32>
    %855 = arith.mulf %846, %852 : vector<2x32xf32>
    %856 = arith.addf %854, %855 : vector<2x32xf32>
    %857 = math.tanh %856 : vector<2x32xf32>
    %858 = arith.mulf %853, %857 : vector<2x32xf32>
    %c2_488 = arith.constant 2 : index
    %c0_489 = arith.constant 0 : index
    %c0_490 = arith.constant 0 : index
    %859 = vector.load %arg12[%c2_488, %c0_489, %c0_490] : memref<3x2x32xf32, #tpu.memory_space<vmem>>, vector<1x2x32xf32>
    %860 = vector.shape_cast %859 : vector<1x2x32xf32> to vector<2x32xf32>
    %861 = vector.shape_cast %858 : vector<2x32xf32> to vector<1x2x32xf32>
    tpu.vector_store %arg12[%c2_488, %c0_489, %c0_490], %861 {strides = array<i32>} : memref<3x2x32xf32, #tpu.memory_space<vmem>>, vector<1x2x32xf32>,
    %c2_491 = arith.constant 2 : index
    %c0_492 = arith.constant 0 : index
    %c0_493 = arith.constant 0 : index
    %862 = vector.load %arg13[%c2_491, %c0_492, %c0_493] : memref<3x2x32xf32, #tpu.memory_space<vmem>>, vector<1x2x32xf32>
    %863 = vector.shape_cast %862 : vector<1x2x32xf32> to vector<2x32xf32>
    %864 = vector.shape_cast %856 : vector<2x32xf32> to vector<1x2x32xf32>
    tpu.vector_store %arg13[%c2_491, %c0_492, %c0_493], %864 {strides = array<i32>} : memref<3x2x32xf32, #tpu.memory_space<vmem>>, vector<1x2x32xf32>,
    %865 = arith.index_cast %760 : i32 to index
    %c0_494 = arith.constant 0 : index
    %866 = vector.load %arg15[%865, %c0_494] : memref<16x32xf32, #tpu.memory_space<vmem>>, vector<2x32xf32>
    tpu.vector_store %arg15[%865, %c0_494], %858 {strides = array<i32>} : memref<16x32xf32, #tpu.memory_space<vmem>>, vector<2x32xf32>,
    %c8_i32 = arith.constant 8 : i32
    %c0_495 = arith.constant 0 : index
    %c0_496 = arith.constant 0 : index
    %867 = vector.load %arg15[%c0_495, %c0_496] : memref<16x32xf32, #tpu.memory_space<vmem>>, vector<16x32xf32>
    %868 = arith.truncf %867 : vector<16x32xf32> to vector<16x32xbf16>
    %c0_497 = arith.constant 0 : index
    %c0_498 = arith.constant 0 : index
    %869 = vector.load %arg9[%c0_497, %c0_498] : memref<32x128xbf16, #tpu.memory_space<vmem>>, vector<32x128xbf16>
    %cst_499 = arith.constant dense<0.000000e+00> : vector<16x128xf32>
    %870 = tpu.matmul %868, %869, %cst_499 {dimension_numbers = #tpu.dot_dimension_numbers<[1], [0], [0], [1], [0, 0, 1, 1], [], []>} : vector<16x32xbf16>, vector<32x128xbf16>, vector<16x128xf32> -> vector<16x128xf32>
    %c0_500 = arith.constant 0 : index
    %c0_501 = arith.constant 0 : index
    %871 = vector.load %arg10[%c0_500, %c0_501] : memref<1x128xf32, #tpu.memory_space<vmem>>, vector<1x128xf32>
    %872 = vector.broadcast %871 : vector<1x128xf32> to vector<16x128xf32>
    %873 = arith.addf %870, %872 : vector<16x128xf32>
    %874 = arith.negf %873 : vector<16x128xf32>
    %875 = math.exp %874 : vector<16x128xf32>
    %cst_502 = arith.constant 1.000000e+00 : f32
    %876 = vector.broadcast %cst_502 : f32 to vector<16x128xf32>
    %877 = arith.addf %876, %875 : vector<16x128xf32>
    %878 = arith.divf %876, %877 : vector<16x128xf32>
    %c0_503 = arith.constant 0 : index
    %c0_504 = arith.constant 0 : index
    %879 = vector.load %arg11[%c0_503, %c0_504] : memref<16x128xf32, #tpu.memory_space<vmem>>, vector<16x128xf32>
    tpu.vector_store %arg11[%c0_503, %c0_504], %878 {strides = array<i32>} : memref<16x128xf32, #tpu.memory_space<vmem>>, vector<16x128xf32>,
    return
  }
  func.func @transform_0(%arg0: i32) -> (i32, i32) {
    %c0_i32 = arith.constant 0 : i32
    %c0_i32_0 = arith.constant 0 : i32
    return %arg0, %c0_i32 : i32, i32
  }
  func.func @transform_1(%arg0: i32) -> (i32, i32) {
    %c0_i32 = arith.constant 0 : i32
    %c0_i32_0 = arith.constant 0 : i32
    %c0_i32_1 = arith.constant 0 : i32
    return %c0_i32, %c0_i32_0 : i32, i32
  }
  func.func @transform_2(%arg0: i32) -> (i32, i32) {
    %c0_i32 = arith.constant 0 : i32
    %c0_i32_0 = arith.constant 0 : i32
    %c0_i32_1 = arith.constant 0 : i32
    return %c0_i32, %c0_i32_0 : i32, i32
  }
  func.func @transform_3(%arg0: i32) -> (i32, i32) {
    %c0_i32 = arith.constant 0 : i32
    %c0_i32_0 = arith.constant 0 : i32
    %c0_i32_1 = arith.constant 0 : i32
    return %c0_i32, %c0_i32_0 : i32, i32
  }
  func.func @transform_4(%arg0: i32) -> (i32, i32) {
    %c0_i32 = arith.constant 0 : i32
    %c0_i32_0 = arith.constant 0 : i32
    %c0_i32_1 = arith.constant 0 : i32
    return %c0_i32, %c0_i32_0 : i32, i32
  }
  func.func @transform_5(%arg0: i32) -> (i32, i32) {
    %c0_i32 = arith.constant 0 : i32
    %c0_i32_0 = arith.constant 0 : i32
    %c0_i32_1 = arith.constant 0 : i32
    return %c0_i32, %c0_i32_0 : i32, i32
  }
  func.func @transform_6(%arg0: i32) -> (i32, i32) {
    %c0_i32 = arith.constant 0 : i32
    %c0_i32_0 = arith.constant 0 : i32
    %c0_i32_1 = arith.constant 0 : i32
    return %c0_i32, %c0_i32_0 : i32, i32
  }
  func.func @transform_7(%arg0: i32) -> (i32, i32) {
    %c0_i32 = arith.constant 0 : i32
    %c0_i32_0 = arith.constant 0 : i32
    %c0_i32_1 = arith.constant 0 : i32
    return %c0_i32, %c0_i32_0 : i32, i32
  }
  func.func @transform_8(%arg0: i32) -> (i32, i32) {
    %c0_i32 = arith.constant 0 : i32
    %c0_i32_0 = arith.constant 0 : i32
    %c0_i32_1 = arith.constant 0 : i32
    return %c0_i32, %c0_i32_0 : i32, i32
  }
  func.func @transform_9(%arg0: i32) -> (i32, i32) {
    %c0_i32 = arith.constant 0 : i32
    %c0_i32_0 = arith.constant 0 : i32
    %c0_i32_1 = arith.constant 0 : i32
    return %c0_i32, %c0_i32_0 : i32, i32
  }
  func.func @transform_10(%arg0: i32) -> (i32, i32) {
    %c0_i32 = arith.constant 0 : i32
    %c0_i32_0 = arith.constant 0 : i32
    return %arg0, %c0_i32 : i32, i32
  }
}

</mosaic_0001>

<bundles_post_ra>
// kernel: tpu_custom_call.1
= control target key start
LH: loop header
LB: loop body
LE: loop exit
PB: predicated region body
PF: predicated region fallthrough
CT: control target
= control target key end

     0   :  { %15 = vsyncpa [#allocation7], 0  ;;  %s4844_s0 = inlined_call_operand.hbm [shape: f32[16,16], index: 0, kind: input, shape index: {}]   ;;  %s4845_s1 = inlined_call_operand.hbm [shape: bf16[16,128], index: 1, kind: input, shape index: {}]   ;;  %s4846_s2 = inlined_call_operand.hbm [shape: bf16[32,128], index: 2, kind: input, shape index: {}]   ;;  %s4847_s3 = inlined_call_operand.vmem [shape: f32[1,128], index: 3, kind: input, shape index: {}]   ;;  %s4848_s4 = inlined_call_operand.hbm [shape: bf16[64,128], index: 4, kind: input, shape index: {}]   ;;  %s4849_s5 = inlined_call_operand.vmem [shape: f32[1,128], index: 5, kind: input, shape index: {}]   ;;  %s4850_s6 = inlined_call_operand.hbm [shape: bf16[64,128], index: 6, kind: input, shape index: {}]   ;;  %s4851_s7 = inlined_call_operand.vmem [shape: f32[1,128], index: 7, kind: input, shape index: {}]   ;;  %s4852_s8 = inlined_call_operand.hbm [shape: bf16[32,128], index: 8, kind: input, shape index: {}]   ;;  %s4853_s9 = inlined_call_operand.vmem [shape: f32[1,128], index: 9, kind: input, shape index: {}]   ;;  %s4854_s10 = inlined_call_operand.hbm [shape: f32[16,128], index: 10, kind: output, shape index: {}]  }
   0x1   :  { %16 = vsyncpa [#allocation10], 0 }
   0x2   :  { %17 = vsyncpa [#allocation13], 0 }
   0x3   :  { %18 = vsyncpa [#allocation16], 0 }
   0x4   :  { %19 = vsyncpa [#allocation8], 0  ;;  %s4158_s13 = smov [#allocation9]  }
   0x5   :  { %s37_s14 = sshll.u32 %s4158_s13, 4  ;;  %s38_s14 = int_to_ptr.vmem [resolvable:$true] %s37_s14 }
   0x6   :  { %s4016_s15 = scalar_lea.vmem %s38_s14, 128  ;;  %p4021_p1 = scmp.lt.s32.totalorder %s38_s14, %s38_s14 }
   0x7   :  { %p4017_p0 = scmp.ne.s32.totalorder %s38_s14, %s4016_s15  ;;  %p4022_p2 = scmp.lt.s32.totalorder %s4016_s15, %s4016_s15 }
   0x9   :  { %p4023_p3 = por %p4022_p2, %p4021_p1 }
   0xb   :  { %p4024_p4 = pnand %p4023_p3, %p4017_p0 }
   0xd   :  { %4027 = shalt.err (!%p4024_p4)
}
   0xe   :  { %s4159_s16 = smov 64   ;;  %s4160_s17 = smov 4  }
   0xf   :  { %43 = dma.hbm_to_vmem [thread:$0]  %s4845_s1, 128, %s38_s14, [#allocation10], %s4159_s16, %s4159_s16, %s4160_s17  }
  0x10   :  { %s4161_s20 = smov [#allocation12]   ;;  %s4162_s22 = smov [#allocation6]  }
  0x11   :  { %s63_s21 = sshll.u32 %s4161_s20, 4  ;;  %s25_s23 = sshll.u32 %s4162_s22, 4  ;;  %s64_s21 = int_to_ptr.vmem [resolvable:$true] %s63_s21  ;;  %s26_s23 = int_to_ptr.vmem [resolvable:$true] %s25_s23 }
  0x12   :  { %s4036_s24 = scalar_lea.vmem %s64_s21, 512  ;;  %p4041_p6 = scmp.lt.s32.totalorder %s64_s21, %s64_s21 }
  0x13   :  { %p4037_p5 = scmp.ne.s32.totalorder %s64_s21, %s4036_s24  ;;  %p4042_p7 = scmp.lt.s32.totalorder %s4036_s24, %s4036_s24 }
  0x15   :  { %p4043_p8 = por %p4042_p7, %p4041_p6 }
  0x17   :  { %p4044_p9 = pnand %p4043_p8, %p4037_p5 }
  0x19   :  { %4047 = shalt.err (!%p4044_p9)
}
  0x1a   :  { %69 = dma.hbm_to_vmem [thread:$0]  %s4848_s4, 512, %s64_s21, [#allocation13], %s4159_s16, %s4159_s16, %s4160_s17  }
  0x1b   :  { %s4056_s1 = scalar_lea.vmem %s26_s23, 256  ;;  %p4061_p11 = scmp.lt.s32.totalorder %s26_s23, %s26_s23 }
  0x1c   :  { %p4057_p10 = scmp.ne.s32.totalorder %s26_s23, %s4056_s1  ;;  %p4062_p12 = scmp.lt.s32.totalorder %s4056_s1, %s4056_s1 }
  0x1e   :  { %p4063_p13 = por %p4062_p12, %p4061_p11 }
  0x20   :  { %p4064_p0 = pnand %p4063_p13, %p4057_p10 }
  0x22   :  { %4067 = shalt.err (!%p4064_p0)
}
  0x23   :  { %s4163_s27 = smov 128   ;;  %s4164_s28 = smov 8  }
  0x24   :  { %31 = dma.hbm_to_vmem [thread:$0]  %s4844_s0, 256, %s26_s23, [#allocation7], %s4163_s27, %s4163_s27, %s4164_s28  }
  0x25   :  { %s4165_s11 = smov [#allocation11]   ;;  %s4166_s4 = smov [#allocation14]  }
  0x26   :  { %s49_s12 = sshll.u32 %s4165_s11, 4  ;;  %s77_s13 = sshll.u32 %s4166_s4, 4  ;;  %s50_s12 = int_to_ptr.vmem [resolvable:$true] %s49_s12  ;;  %s78_s13 = int_to_ptr.vmem [resolvable:$true] %s77_s13 }
  0x27   :  { %s4076_s14 = scalar_lea.vmem %s50_s12, 256  ;;  %p4081_p2 = scmp.lt.s32.totalorder %s50_s12, %s50_s12 }
  0x28   :  { %p4077_p1 = scmp.ne.s32.totalorder %s50_s12, %s4076_s14  ;;  %p4082_p3 = scmp.lt.s32.totalorder %s4076_s14, %s4076_s14 }
  0x2a   :  { %p4083_p4 = por %p4082_p3, %p4081_p2 }
  0x2c   :  { %p4084_p5 = pnand %p4083_p4, %p4077_p1 }
  0x2e   :  { %4087 = shalt.err (!%p4084_p5)
}
  0x2f   :  { %55 = dma.hbm_to_vmem [thread:$0]  %s4846_s2, 256, %s50_s12, [#allocation10], %s4159_s16, %s4159_s16, %s4160_s17  }
  0x30   :  { %s4096_s0 = scalar_lea.vmem %s78_s13, 512  ;;  %p4101_p7 = scmp.lt.s32.totalorder %s78_s13, %s78_s13 }
  0x31   :  { %p4097_p6 = scmp.ne.s32.totalorder %s78_s13, %s4096_s0  ;;  %p4102_p8 = scmp.lt.s32.totalorder %s4096_s0, %s4096_s0 }
  0x33   :  { %p4103_p9 = por %p4102_p8, %p4101_p7 }
  0x35   :  { %p4104_p10 = pnand %p4103_p9, %p4097_p6 }
  0x37   :  { %4107 = shalt.err (!%p4104_p10)
}
  0x38   :  { %83 = dma.hbm_to_vmem [thread:$0]  %s4850_s6, 512, %s78_s13, [#allocation13], %s4159_s16, %s4159_s16, %s4160_s17  }
  0x39   :  { %s4167_s21 = smov [#allocation15]  }
  0x3a   :  { %s91_s22 = sshll.u32 %s4167_s21, 4  ;;  %s92_s22 = int_to_ptr.vmem [resolvable:$true] %s91_s22 }
  0x3b   :  { %s4116_s23 = scalar_lea.vmem %s92_s22, 256  ;;  %p4121_p12 = scmp.lt.s32.totalorder %s92_s22, %s92_s22 }
  0x3c   :  { %p4117_p11 = scmp.ne.s32.totalorder %s92_s22, %s4116_s23  ;;  %p4122_p13 = scmp.lt.s32.totalorder %s4116_s23, %s4116_s23 }
  0x3e   :  { %p4123_p0 = por %p4122_p13, %p4121_p12 }
  0x40   :  { %p4124_p1 = pnand %p4123_p0, %p4117_p11 }
  0x42   :  { %4127 = shalt.err (!%p4124_p1)
}
  0x43   :  { %97 = dma.hbm_to_vmem [thread:$0]  %s4852_s8, 256, %s92_s22, [#allocation16], %s4159_s16, %s4159_s16, %s4160_s17  }
  0x44   :  { %4148 = dma.done.wait [#allocation7], 256  }
  0x45   :  { %4149 = vsyncadd [#allocation7], 4294967040 }
  0x46   :  { %4150 = dma.done.wait [#allocation10], 384  }
  0x47   :  { %4151 = vsyncadd [#allocation10], 4294966912 }
  0x48   :  { %4152 = dma.done.wait [#allocation13], 1024  }
  0x49   :  { %4153 = vsyncadd [#allocation13], 4294966272 }
  0x4a   :  { %4154 = dma.done.wait [#allocation16], 256  }
  0x4b   :  { %4155 = vsyncadd [#allocation16], 4294967040  ;;  %vm123_vm0 = vcmask 254976   ;;  %v4168_v0 = vmov 0.0   ;;  %vm4169_vm1 = vmmov 0   ;;  %v3773_v1 = vld [vmem:[#allocation9] sm:$0xff]  }
  0x4c   :  { %3488 = vmatprep.subr.bf16.mxu0 %v4168_v0  ;;  %3494 = vmatprep.subr.bf16.mxu1 %v4168_v0  ;;  %124 = vst.msk [vmem:[#allocation2] sm:$0x3] %vm123_vm0, %v4168_v0  ;;  %125 = vst.msk [vmem:[#allocation2 + $0x2] sm:$0x3] %vm123_vm0, %v4168_v0  ;;  %v3774_v2 = vld [vmem:[#allocation11 + $0x8] sm:$0xff]   ;;  %v131_v4 = vld [vmem:[#allocation6 + $0x8] sm:$0xff] }
  0x4d   :  { %126 = vst.msk [vmem:[#allocation2 + $0x4] sm:$0x3] %vm123_vm0, %v4168_v0  ;;  %127 = vst.msk [vmem:[#allocation3] sm:$0x3] %vm123_vm0, %v4168_v0  ;;  %3490 = vmatprep.mubr.msk.bf16.mxu0 %vm4169_vm1, %v4168_v0  ;;  %3498 = vmatprep.mubr.msk.bf16.mxu1 %vm4169_vm1, %v4168_v0  ;;  %v130_v3 = vld [vmem:[#allocation6] sm:$0xff]  ;;  %vm148_vm2 = vcmask 130048  }
  0x4e   :  { %128 = vst.msk [vmem:[#allocation3 + $0x2] sm:$0x3] %vm123_vm0, %v4168_v0  ;;  %129 = vst.msk [vmem:[#allocation3 + $0x4] sm:$0x3] %vm123_vm0, %v4168_v0  ;;  %3489 = vmatpush3.bf16.msra.mxu0 %v3773_v1  ;;  %3495 = vmatpush3.bf16.msra.mxu1 %v3774_v2  ;;  %v132_v5 = vpack.c.bf16 %v131_v4, %v130_v3  ;;  %v3775_v6 = vld [vmem:[#allocation11] sm:$0xff]   ;;  %vm214_vm3 = vcmask 261120  }
  0x4f   :  { %3502 = vmatprep.subr.bf16.mxu0 %v4168_v0  ;;  %3496 = vmatprep.subr.bf16.mxu1 %v4168_v0  ;;  %v3202_v9 = vld [vmem:[%s4847_s3] ss:$0 sm:$0xff]  ;;  %s4170_s3 = smov 32   ;;  %v3776_v35 = vld [vmem:[#allocation12 + $0x18] sm:$0xff]   ;;  %v3777_v36 = vld [vmem:[#allocation12 + $0x10] sm:$0xff]   ;;  %s4171_s17 = smov 96  }
  0x50   :  { %v3778_v39 = vld [vmem:[#allocation12 + $0x8] sm:$0xff]   ;;  %v3779_v40 = vld [vmem:[#allocation12] sm:$0xff]   ;;  %vm347_vm4 = vcmask 523264   ;;  %v3780_v47 = vld [vmem:[#allocation11 + $0x8] sm:$0xff]   ;;  %s4172_s4 = smov [#allocation17]  }
  0x51   :  { %3491 = vmatmul.mubr.msk.bf16.vlgmr.msra.gmra.mxu0 %vm148_vm2, %v132_v5  ;;  %v3781_v49 = vld [vmem:[#allocation11] sm:$0xff]   ;;  %v4318_v52 = vld [vmem:[%s4849_s5] ss:$0 sm:$0xff]  ;;  %s3187_s13 = sshll.u32 %s4172_s4, 4  ;;  %s3188_s13 = int_to_ptr.vmem [resolvable:$true] %s3187_s13 }
  0x52   :  { %3510 = vmatprep.mubr.msk.bf16.mxu0 %vm4169_vm1, %v4168_v0  ;;  %3497 = vmatpush3.bf16.msra.mxu1 %v3775_v6  ;;  %p4133_p3 = scmp.lt.s32.totalorder %s3188_s13, %s3188_s13 }
  0x53   :  { %v196_v7 = vld [vmem:[#allocation2] sm:$0x3]  ;;  %3514 = vmatprep.subr.bf16.mxu1 %v4168_v0  ;;  %3503 = vmatpush3.bf16.msra.mxu0 %v3776_v35  ;;  %v301_v38 = vld [vmem:[#allocation2 + $0x2] sm:$0x3] }
  0x54   :  { %v197_v8 = vpack.c.bf16 %v196_v7, %v196_v7  ;;  %v259_v28 = vld [vmem:[#allocation3] sm:$0x3]  ;;  %3504 = vmatprep.subr.bf16.mxu0 %v4168_v0 }
  0x56   :  { %3499 = vmatmul.mubr.msk.bf16.vlgmr.msra.gmra.mxu1 %vm214_vm3, %v197_v8 }
  0x57   :  { %3522 = vmatprep.mubr.msk.bf16.mxu1 %vm4169_vm1, %v4168_v0  ;;  %3505 = vmatpush3.bf16.msra.mxu0 %v3777_v36 }
  0x58   :  { %3506 = vmatprep.subr.bf16.mxu0 %v4168_v0 }
  0x5b   :  { %3507 = vmatpush3.bf16.msra.mxu0 %v3778_v39  ;;  %v3786_v39 = vld [vmem:[#allocation12 + $0x18] sm:$0xff]  }
  0x5c   :  { %3508 = vmatprep.subr.bf16.mxu0 %v4168_v0 }
  0x5f   :  { %3509 = vmatpush3.bf16.msra.mxu0 %v3779_v40 }
  0x60   :  { %3526 = vmatprep.subr.bf16.mxu0 %v4168_v0 }
 0x111   :  { %v186_v10 = vpop.f32.mrf.mxu0 }
 0x112   :  { %v187_v11 = vadd.f32 %v3202_v9, %v186_v10  ;;  %v392_v10 = vld [vmem:[#allocation3 + $0x2] sm:$0x3] }
 0x113   :  { %v3492_v12 = vpop.f32.mrf.mxu0 }
 0x114   :  { %193 = vst [vmem:[#allocation4] sm:$0xff] %v187_v11 }
 0x115   :  { %v189_v13 = vpop.f32.mrf.mxu0 }
 0x116   :  { %v190_v14 = vadd.f32 %v3202_v9, %v189_v13  ;;  %v252_v15 = vpop.f32.mrf.mxu1 }
 0x117   :  { %v3493_v16 = vpop.f32.mrf.mxu0 }
 0x118   :  { %194 = vst [vmem:[#allocation4 + $0x8] sm:$0xff] %v190_v14  ;;  %v3500_v17 = vpop.f32.mrf.mxu1 }
 0x11a   :  { %v255_v18 = vpop.f32.mrf.mxu1 }
 0x11b   :  { %v195_v19 = vld [vmem:[#allocation4] sm:$0x3]  ;;  %v564_v59 = vld [vmem:[#allocation4 + $0x2] sm:$0x3] }
 0x11c   :  { %v258_v20 = vadd.f32 %v252_v15, %v195_v19  ;;  %v3501_v21 = vpop.f32.mrf.mxu1 }
 0x11e   :  { %v3208_v22 = vmul.f32 -1.442695, %v258_v20 }
 0x120   :  { %3856 = vpow2.f32 %v3208_v22 }
 0x12d   :  { %v3857_v23 = vpop.eup %3856 }
 0x12e   :  { %v263_v24 = vadd.f32 1.0, %v3857_v23  ;;  %v3782_v23 = vld [vmem:[#allocation14 + $0x18] sm:$0xff]  }
 0x12f   :  { %3515 = vmatpush3.bf16.msra.mxu1 %v3782_v23 }
 0x130   :  { %3858 = vrcp.f32 %v263_v24  ;;  %v3783_v24 = vld [vmem:[#allocation14 + $0x10] sm:$0xff]   ;;  %3516 = vmatprep.subr.bf16.mxu1 %v4168_v0 }
 0x133   :  { %3517 = vmatpush3.bf16.msra.mxu1 %v3783_v24 }
 0x134   :  { %3518 = vmatprep.subr.bf16.mxu1 %v4168_v0 }
 0x13d   :  { %v3859_v25 = vpop.eup %3858 }
 0x13e   :  { %v266_v26 = vmul.f32 2.0, %v3859_v25 }
 0x140   :  { %v3209_v27 = vadd.f32 -1.0, %v266_v26  ;;  %v3784_v26 = vld [vmem:[#allocation14 + $0x8] sm:$0xff]  }
 0x141   :  { %3519 = vmatpush3.bf16.msra.mxu1 %v3784_v26 }
 0x142   :  { %274 = vrot.lane.b32.xlu0 %v3209_v27, %s4159_s16  ;;  %v433_v27 = vld [vmem:[#allocation2 + $0x4] sm:$0x3]  ;;  %3520 = vmatprep.subr.bf16.mxu1 %v4168_v0 }
 0x146   :  { %269 = vrot.lane.b32.xlu0 %v259_v28, %s4170_s3 }
 0x1b4   :  { %v275_v29 = vpop.permute.xlu0 %274 }
 0x1b5   :  { %v277_v30 = vmul.f32 %v3859_v25, %v275_v29 }
 0x1b7   :  { %279 = vrot.lane.b32.xlu1 %v277_v30, %s4170_s3 }
 0x1b8   :  { %v270_v31 = vpop.permute.xlu0 %269 }
 0x1b9   :  { %v272_v32 = vmul.f32 %v3859_v25, %v270_v31 }
 0x229   :  { %v280_v33 = vpop.permute.xlu1 %279 }
 0x22a   :  { %v282_v34 = vadd.f32 %v280_v33, %v272_v32  ;;  %v3785_v32 = vld [vmem:[#allocation14] sm:$0xff]  }
 0x22b   :  { %3521 = vmatpush3.bf16.msra.mxu1 %v3785_v32 }
 0x22c   :  { %3860 = vtanh.f32 %v282_v34  ;;  %3534 = vmatprep.subr.bf16.mxu1 %v4168_v0 }
 0x239   :  { %v3861_v37 = vpop.eup %3860 }
 0x23a   :  { %285 = vrot.lane.b32.xlu1 %v3861_v37, %s4159_s16 }
 0x23e   :  { %303 = vrot.lane.b32.xlu1 %v301_v38, %s4170_s3 }
 0x242   :  { %296 = vrot.lane.b32.xlu1 %v282_v34, %s4171_s17 }
 0x2ac   :  { %v286_v41 = vpop.permute.xlu1 %285 }
 0x2ad   :  { %v288_v42 = vmul.f32 %v3859_v25, %v286_v41 }
 0x2af   :  { %290 = vrot.lane.b32.xlu0 %v288_v42, %s4170_s3 }
 0x2b0   :  { %v304_v43 = vpop.permute.xlu1 %303 }
 0x2b4   :  { %v297_v44 = vpop.permute.xlu1 %296 }
 0x2b5   :  { %299 = vst.msk [vmem:[#allocation3] sm:$0x3] %vm123_vm0, %v297_v44 }
 0x2bc   :  { %v627_v17 = vld [vmem:[#allocation3] sm:$0x3] }
 0x321   :  { %v291_v45 = vpop.permute.xlu0 %290 }
 0x322   :  { %294 = vst.msk [vmem:[#allocation2] sm:$0x3] %vm123_vm0, %v291_v45  ;;  %v306_v46 = vsel %vm214_vm3, %v291_v45, %v304_v43  ;;  %v3787_v43 = vld [vmem:[#allocation12 + $0x10] sm:$0xff]   ;;  %v3788_v45 = vld [vmem:[#allocation12 + $0x8] sm:$0xff]  }
 0x323   :  { %v307_v48 = vpack.c.bf16 %v306_v46, %v306_v46  ;;  %v3789_v46 = vld [vmem:[#allocation12] sm:$0xff]  }
 0x325   :  { %3511 = vmatmul.mubr.msk.bf16.vlgmr.msra.gmra.mxu0 %vm347_vm4, %v307_v48 }
 0x326   :  { %3527 = vmatpush3.bf16.msra.mxu0 %v3780_v47  ;;  %3530 = vmatprep.mubr.msk.bf16.mxu0 %vm4169_vm1, %v4168_v0 }
 0x327   :  { %3528 = vmatprep.subr.bf16.mxu0 %v4168_v0 }
 0x329   :  { %v565_v50 = vld [vmem:[#allocation2] sm:$0x3] }
 0x32a   :  { %3529 = vmatpush3.bf16.msra.mxu0 %v3781_v49  ;;  %v566_v51 = vpack.c.bf16 %v565_v50, %v565_v50  ;;  %v3790_v50 = vld [vmem:[#allocation11 + $0x8] sm:$0xff]  }
 0x32b   :  { %3546 = vmatprep.subr.bf16.mxu0 %v4168_v0 }
 0x32d   :  { %3531 = vmatmul.mubr.msk.bf16.vlgmr.msra.gmra.mxu0 %vm214_vm3, %v566_v51 }
 0x32e   :  { %3554 = vmatprep.mubr.msk.bf16.mxu0 %vm4169_vm1, %v4168_v0 }
 0x3e5   :  { %v385_v53 = vpop.f32.mrf.mxu0 }
 0x3e6   :  { %v386_v54 = vadd.f32 %v4318_v52, %v385_v53 }
 0x3e7   :  { %v3512_v55 = vpop.f32.mrf.mxu0 }
 0x3e8   :  { %v3216_v56 = vmul.f32 -1.442695, %v386_v54  ;;  %v3791_v54 = vld [vmem:[#allocation11] sm:$0xff]  }
 0x3e9   :  { %v388_v57 = vpop.f32.mrf.mxu0 }
 0x3ea   :  { %3862 = vpow2.f32 %v3216_v56  ;;  %v4364_v57 = vld [vmem:[%s4851_s7] ss:$0 sm:$0xff] }
 0x3eb   :  { %v3513_v58 = vpop.f32.mrf.mxu0 }
 0x3ed   :  { %v620_v60 = vpop.f32.mrf.mxu0 }
 0x3ee   :  { %v626_v61 = vadd.f32 %v620_v60, %v564_v59 }
 0x3ef   :  { %v3532_v62 = vpop.f32.mrf.mxu0 }
 0x3f0   :  { %v3229_v63 = vmul.f32 -1.442695, %v626_v61 }
 0x3f1   :  { %v623_v1 = vpop.f32.mrf.mxu0 }
 0x3f2   :  { %3864 = vpow2.f32 %v3229_v63 }
 0x3f3   :  { %v3533_v2 = vpop.f32.mrf.mxu0 }
 0x3f7   :  { %v3863_v3 = vpop.eup %3862 }
 0x3f8   :  { %v396_v4 = vadd.f32 1.0, %v3863_v3 }
 0x3fa   :  { %3866 = vrcp.f32 %v396_v4 }
 0x3ff   :  { %v3865_v5 = vpop.eup %3864 }
 0x400   :  { %v631_v6 = vadd.f32 1.0, %v3865_v5 }
 0x402   :  { %3868 = vrcp.f32 %v631_v6  ;;  %v523_v6 = vld [vmem:[#allocation3 + $0x4] sm:$0x3] }
 0x407   :  { %v3867_v7 = vpop.eup %3866 }
 0x408   :  { %v399_v8 = vmul.f32 2.0, %v3867_v7 }
 0x40a   :  { %v3217_v9 = vadd.f32 -1.0, %v399_v8 }
 0x40c   :  { %407 = vrot.lane.b32.xlu0 %v3217_v9, %s4159_s16 }
 0x40f   :  { %v3869_v11 = vpop.eup %3868 }
 0x410   :  { %402 = vrot.lane.b32.xlu0 %v392_v10, %s4170_s3  ;;  %v634_v12 = vmul.f32 2.0, %v3869_v11 }
 0x412   :  { %v3230_v13 = vadd.f32 -1.0, %v634_v12 }
 0x414   :  { %642 = vrot.lane.b32.xlu0 %v3230_v13, %s4159_s16  ;;  %v926_v13 = vld [vmem:[#allocation4 + $0x4] sm:$0x3] }
 0x47e   :  { %v408_v14 = vpop.permute.xlu0 %407 }
 0x47f   :  { %v410_v15 = vmul.f32 %v3867_v7, %v408_v14 }
 0x481   :  { %412 = vrot.lane.b32.xlu1 %v410_v15, %s4170_s3 }
 0x482   :  { %v403_v16 = vpop.permute.xlu0 %402 }
 0x483   :  { %v405_v20 = vmul.f32 %v3867_v7, %v403_v16 }
 0x485   :  { %637 = vrot.lane.b32.xlu1 %v627_v17, %s4170_s3 }
 0x486   :  { %v643_v18 = vpop.permute.xlu0 %642 }
 0x487   :  { %v645_v19 = vmul.f32 %v3869_v11, %v643_v18 }
 0x489   :  { %647 = vrot.lane.b32.xlu0 %v645_v19, %s4170_s3 }
 0x4f3   :  { %v413_v21 = vpop.permute.xlu1 %412 }
 0x4f4   :  { %v415_v22 = vadd.f32 %v413_v21, %v405_v20 }
 0x4f6   :  { %3870 = vtanh.f32 %v415_v22 }
 0x4f7   :  { %v638_v28 = vpop.permute.xlu1 %637 }
 0x4f8   :  { %v640_v30 = vmul.f32 %v3869_v11, %v638_v28 }
 0x4fb   :  { %v648_v29 = vpop.permute.xlu0 %647 }
 0x4fc   :  { %v4332_v31 = vadd.f32 %v648_v29, %v640_v30 }
 0x4fe   :  { %3872 = vtanh.f32 %v4332_v31 }
 0x503   :  { %v3871_v25 = vpop.eup %3870 }
 0x504   :  { %418 = vrot.lane.b32.xlu1 %v3871_v25, %s4159_s16 }
 0x508   :  { %435 = vrot.lane.b32.xlu1 %v433_v27, %s4170_s3 }
 0x50b   :  { %v3873_v35 = vpop.eup %3872 }
 0x576   :  { %v419_v33 = vpop.permute.xlu1 %418 }
 0x577   :  { %v421_v34 = vmul.f32 %v3867_v7, %v419_v33 }
 0x579   :  { %423 = vrot.lane.b32.xlu0 %v421_v34, %s4170_s3 }
 0x57a   :  { %v436_v36 = vpop.permute.xlu1 %435 }
 0x57d   :  { %653 = vrot.lane.b32.xlu0 %v3873_v35, %s4159_s16 }
 0x5eb   :  { %v424_v37 = vpop.permute.xlu0 %423 }
 0x5ec   :  { %426 = vst.msk [vmem:[#allocation2 + $0x2] sm:$0x3] %vm123_vm0, %v424_v37  ;;  %v438_v38 = vsel %vm214_vm3, %v424_v37, %v436_v36 }
 0x5ed   :  { %v439_v40 = vpack.c.bf16 %v438_v38, %v438_v38 }
 0x5ef   :  { %v654_v41 = vpop.permute.xlu0 %653  ;;  %3523 = vmatmul.mubr.msk.bf16.vlgmr.msra.gmra.mxu1 %vm347_vm4, %v439_v40 }
 0x5f0   :  { %v656_v42 = vmul.f32 %v3869_v11, %v654_v41  ;;  %3535 = vmatpush3.bf16.msra.mxu1 %v3786_v39  ;;  %3542 = vmatprep.mubr.msk.bf16.mxu1 %vm4169_vm1, %v4168_v0 }
 0x5f1   :  { %3536 = vmatprep.subr.bf16.mxu1 %v4168_v0 }
 0x5f2   :  { %658 = vrot.lane.b32.xlu1 %v656_v42, %s4170_s3 }
 0x5f3   :  { %v667_v44 = vld [vmem:[#allocation2 + $0x2] sm:$0x3] }
 0x5f4   :  { %669 = vrot.lane.b32.xlu0 %v667_v44, %s4170_s3  ;;  %3537 = vmatpush3.bf16.msra.mxu1 %v3787_v43 }
 0x5f5   :  { %3538 = vmatprep.subr.bf16.mxu1 %v4168_v0 }
 0x5f8   :  { %428 = vrot.lane.b32.xlu0 %v415_v22, %s4171_s17  ;;  %3539 = vmatpush3.bf16.msra.mxu1 %v3788_v45 }
 0x5f9   :  { %3540 = vmatprep.subr.bf16.mxu1 %v4168_v0 }
 0x5fc   :  { %3541 = vmatpush3.bf16.msra.mxu1 %v3789_v46 }
 0x5fd   :  { %3558 = vmatprep.subr.bf16.mxu1 %v4168_v0 }
 0x664   :  { %v659_v47 = vpop.permute.xlu1 %658 }
 0x665   :  { %661 = vst.msk [vmem:[#allocation2] sm:$0x3] %vm123_vm0, %v659_v47 }
 0x666   :  { %v670_v48 = vpop.permute.xlu0 %669 }
 0x667   :  { %v672_v49 = vsel %vm214_vm3, %v659_v47, %v670_v48 }
 0x668   :  { %v673_v51 = vpack.c.bf16 %v672_v49, %v672_v49 }
 0x66a   :  { %v429_v53 = vpop.permute.xlu0 %428  ;;  %3543 = vmatmul.mubr.msk.bf16.vlgmr.msra.gmra.mxu1 %vm347_vm4, %v673_v51  ;;  %v3793_v51 = vld [vmem:[#allocation14 + $0x10] sm:$0xff]  }
 0x66b   :  { %431 = vst.msk [vmem:[#allocation3 + $0x2] sm:$0x3] %vm123_vm0, %v429_v53  ;;  %3559 = vmatpush3.bf16.msra.mxu1 %v3790_v50  ;;  %3562 = vmatprep.mubr.msk.bf16.mxu1 %vm4169_vm1, %v4168_v0  ;;  %v3792_v50 = vld [vmem:[#allocation14 + $0x18] sm:$0xff]  }
 0x66c   :  { %3560 = vmatprep.subr.bf16.mxu1 %v4168_v0  ;;  %v927_v55 = vld [vmem:[#allocation2] sm:$0x3]  ;;  %3547 = vmatpush3.bf16.msra.mxu0 %v3792_v50 }
 0x66d   :  { %v928_v56 = vpack.c.bf16 %v927_v55, %v927_v55  ;;  %3548 = vmatprep.subr.bf16.mxu0 %v4168_v0 }
 0x66f   :  { %3561 = vmatpush3.bf16.msra.mxu1 %v3791_v54  ;;  %v3794_v54 = vld [vmem:[#allocation14 + $0x8] sm:$0xff]  }
 0x670   :  { %3578 = vmatprep.subr.bf16.mxu1 %v4168_v0  ;;  %3549 = vmatpush3.bf16.msra.mxu0 %v3793_v51 }
 0x671   :  { %3550 = vmatprep.subr.bf16.mxu0 %v4168_v0 }
 0x672   :  { %3563 = vmatmul.mubr.msk.bf16.vlgmr.msra.gmra.mxu1 %vm214_vm3, %v928_v56  ;;  %v756_v30 = vld [vmem:[#allocation3 + $0x2] sm:$0x3] }
 0x673   :  { %3586 = vmatprep.mubr.msk.bf16.mxu1 %vm4169_vm1, %v4168_v0 }
 0x674   :  { %3551 = vmatpush3.bf16.msra.mxu0 %v3794_v54 }
 0x675   :  { %3552 = vmatprep.subr.bf16.mxu0 %v4168_v0 }
 0x6af   :  { %v516_v58 = vpop.f32.mrf.mxu1 }
 0x6b0   :  { %v517_v59 = vadd.f32 %v4364_v57, %v516_v58 }
 0x6b1   :  { %v3524_v60 = vpop.f32.mrf.mxu1 }
 0x6b2   :  { %v3224_v61 = vmul.f32 -1.442695, %v517_v59  ;;  %v3795_v60 = vld [vmem:[#allocation14] sm:$0xff]  }
 0x6b3   :  { %v519_v62 = vpop.f32.mrf.mxu1  ;;  %3553 = vmatpush3.bf16.msra.mxu0 %v3795_v60 }
 0x6b4   :  { %3874 = vpow2.f32 %v3224_v61  ;;  %3566 = vmatprep.subr.bf16.mxu0 %v4168_v0 }
 0x6b5   :  { %v3525_v63 = vpop.f32.mrf.mxu1 }
 0x6c1   :  { %v3875_v1 = vpop.eup %3874 }
 0x6c2   :  { %v527_v2 = vadd.f32 1.0, %v3875_v1 }
 0x6c4   :  { %3876 = vrcp.f32 %v527_v2 }
 0x6d1   :  { %v4367_v3 = vpop.eup %3876 }
 0x6d2   :  { %v530_v4 = vmul.f32 2.0, %v4367_v3 }
 0x6d4   :  { %v3225_v5 = vadd.f32 -1.0, %v530_v4 }
 0x6d6   :  { %538 = vrot.lane.b32.xlu1 %v3225_v5, %s4159_s16 }
 0x6da   :  { %533 = vrot.lane.b32.xlu1 %v523_v6, %s4170_s3  ;;  %v3796_v6 = vld [vmem:[#allocation12 + $0x18] sm:$0xff]  }
 0x72a   :  { %v750_v7 = vpop.f32.mrf.mxu1 }
 0x72b   :  { %v751_v8 = vadd.f32 %v4318_v52, %v750_v7 }
 0x72c   :  { %v3544_v9 = vpop.f32.mrf.mxu1 }
 0x72d   :  { %v3237_v10 = vmul.f32 -1.442695, %v751_v8 }
 0x72e   :  { %v753_v11 = vpop.f32.mrf.mxu1 }
 0x72f   :  { %3878 = vpow2.f32 %v3237_v10  ;;  %v3797_v10 = vld [vmem:[#allocation12 + $0x10] sm:$0xff]  }
 0x730   :  { %v3545_v12 = vpop.f32.mrf.mxu1 }
 0x731   :  { %v3798_v12 = vld [vmem:[#allocation12 + $0x8] sm:$0xff]  }
 0x732   :  { %v982_v14 = vpop.f32.mrf.mxu1 }
 0x733   :  { %v988_v15 = vadd.f32 %v982_v14, %v926_v13  ;;  %v3799_v13 = vld [vmem:[#allocation12] sm:$0xff]  }
 0x734   :  { %v3564_v16 = vpop.f32.mrf.mxu1 }
 0x735   :  { %v3250_v17 = vmul.f32 -1.442695, %v988_v15 }
 0x736   :  { %v985_v18 = vpop.f32.mrf.mxu1 }
 0x737   :  { %3880 = vpow2.f32 %v3250_v17  ;;  %v3800_v17 = vld [vmem:[#allocation11 + $0x8] sm:$0xff]  }
 0x738   :  { %v3565_v19 = vpop.f32.mrf.mxu1 }
 0x73c   :  { %v3879_v20 = vpop.eup %3878 }
 0x73d   :  { %v760_v21 = vadd.f32 1.0, %v3879_v20  ;;  %v3801_v20 = vld [vmem:[#allocation11] sm:$0xff]  }
 0x73f   :  { %3882 = vrcp.f32 %v760_v21 }
 0x744   :  { %v3881_v22 = vpop.eup %3880 }
 0x745   :  { %v993_v23 = vadd.f32 1.0, %v3881_v22 }
 0x747   :  { %3884 = vrcp.f32 %v993_v23 }
 0x748   :  { %v539_v24 = vpop.permute.xlu1 %538 }
 0x749   :  { %v541_v25 = vmul.f32 %v4367_v3, %v539_v24 }
 0x74b   :  { %543 = vrot.lane.b32.xlu0 %v541_v25, %s4170_s3 }
 0x74c   :  { %v3883_v26 = vpop.eup %3882  ;;  %v534_v34 = vpop.permute.xlu1 %533 }
 0x74d   :  { %v763_v27 = vmul.f32 2.0, %v3883_v26  ;;  %v536_v35 = vmul.f32 %v4367_v3, %v534_v34 }
 0x74f   :  { %663 = vrot.lane.b32.xlu0 %v4332_v31, %s4171_s17  ;;  %v3238_v28 = vadd.f32 -1.0, %v763_v27 }
 0x751   :  { %771 = vrot.lane.b32.xlu1 %v3238_v28, %s4159_s16 }
 0x754   :  { %v4378_v29 = vpop.eup %3884 }
 0x755   :  { %766 = vrot.lane.b32.xlu1 %v756_v30, %s4170_s3  ;;  %v996_v32 = vmul.f32 2.0, %v4378_v29 }
 0x757   :  { %v3251_v33 = vadd.f32 -1.0, %v996_v32 }
 0x759   :  { %1004 = vrot.lane.b32.xlu1 %v3251_v33, %s4159_s16 }
 0x7bd   :  { %v544_v36 = vpop.permute.xlu0 %543 }
 0x7be   :  { %v4384_v37 = vadd.f32 %v544_v36, %v536_v35 }
 0x7c0   :  { %3886 = vtanh.f32 %v4384_v37 }
 0x7c1   :  { %v664_v31 = vpop.permute.xlu0 %663 }
 0x7c2   :  { %666 = vst.msk [vmem:[#allocation3] sm:$0x3] %vm123_vm0, %v664_v31 }
 0x7c3   :  { %v772_v38 = vpop.permute.xlu1 %771 }
 0x7c4   :  { %v774_v39 = vmul.f32 %v3883_v26, %v772_v38 }
 0x7c6   :  { %776 = vrot.lane.b32.xlu0 %v774_v39, %s4170_s3 }
 0x7c7   :  { %v767_v40 = vpop.permute.xlu1 %766 }
 0x7c8   :  { %v769_v45 = vmul.f32 %v3883_v26, %v767_v40 }
 0x7c9   :  { %v989_v41 = vld [vmem:[#allocation3] sm:$0x3] }
 0x7ca   :  { %999 = vrot.lane.b32.xlu1 %v989_v41, %s4170_s3 }
 0x7cb   :  { %v1005_v43 = vpop.permute.xlu1 %1004 }
 0x7cc   :  { %v1007_v44 = vmul.f32 %v4378_v29, %v1005_v43 }
 0x7cd   :  { %v3887_v42 = vpop.eup %3886 }
 0x7ce   :  { %549 = vrot.lane.b32.xlu0 %v3887_v42, %s4159_s16  ;;  %v1288_v42 = vld [vmem:[#allocation4 + $0x6] sm:$0x3] }
 0x7d2   :  { %1009 = vrot.lane.b32.xlu0 %v1007_v44, %s4170_s3 }
 0x838   :  { %v777_v46 = vpop.permute.xlu0 %776 }
 0x839   :  { %v779_v47 = vadd.f32 %v777_v46, %v769_v45 }
 0x83b   :  { %3888 = vtanh.f32 %v779_v47 }
 0x83c   :  { %v1000_v55 = vpop.permute.xlu1 %999 }
 0x83d   :  { %v1002_v58 = vmul.f32 %v4378_v29, %v1000_v55 }
 0x840   :  { %v550_v48 = vpop.permute.xlu0 %549 }
 0x841   :  { %v552_v49 = vmul.f32 %v4367_v3, %v550_v48 }
 0x843   :  { %554 = vrot.lane.b32.xlu1 %v552_v49, %s4170_s3 }
 0x844   :  { %v1010_v56 = vpop.permute.xlu0 %1009 }
 0x845   :  { %v4400_v59 = vadd.f32 %v1010_v56, %v1002_v58 }
 0x847   :  { %3890 = vtanh.f32 %v4400_v59 }
 0x848   :  { %v3889_v53 = vpop.eup %3888 }
 0x849   :  { %782 = vrot.lane.b32.xlu0 %v3889_v53, %s4159_s16 }
 0x854   :  { %v3891_v2 = vpop.eup %3890 }
 0x8b5   :  { %v555_v61 = vpop.permute.xlu1 %554 }
 0x8b6   :  { %557 = vst.msk [vmem:[#allocation2 + $0x4] sm:$0x3] %vm123_vm0, %v555_v61  ;;  %563 = vst.msk [vmem:[#allocation5] sm:$0x3] %vm123_vm0, %v555_v61 }
 0x8bb   :  { %v783_v62 = vpop.permute.xlu0 %782 }
 0x8bc   :  { %v785_v63 = vmul.f32 %v3883_v26, %v783_v62 }
 0x8bd   :  { %v796_v1 = vld [vmem:[#allocation2 + $0x4] sm:$0x3] }
 0x8be   :  { %787 = vrot.lane.b32.xlu1 %v785_v63, %s4170_s3  ;;  %798 = vrot.lane.b32.xlu0 %v796_v1, %s4170_s3 }
 0x8c2   :  { %1015 = vrot.lane.b32.xlu1 %v3891_v2, %s4159_s16 }
 0x930   :  { %v799_v3 = vpop.permute.xlu0 %798  ;;  %v788_v4 = vpop.permute.xlu1 %787 }
 0x931   :  { %790 = vst.msk [vmem:[#allocation2 + $0x2] sm:$0x3] %vm123_vm0, %v788_v4  ;;  %v801_v5 = vsel %vm214_vm3, %v788_v4, %v799_v3 }
 0x932   :  { %v802_v7 = vpack.c.bf16 %v801_v5, %v801_v5 }
 0x934   :  { %3555 = vmatmul.mubr.msk.bf16.vlgmr.msra.gmra.mxu0 %vm347_vm4, %v802_v7  ;;  %v1016_v8 = vpop.permute.xlu1 %1015 }
 0x935   :  { %v1018_v9 = vmul.f32 %v4378_v29, %v1016_v8  ;;  %3567 = vmatpush3.bf16.msra.mxu0 %v3796_v6  ;;  %3574 = vmatprep.mubr.msk.bf16.mxu0 %vm4169_vm1, %v4168_v0 }
 0x936   :  { %3568 = vmatprep.subr.bf16.mxu0 %v4168_v0 }
 0x937   :  { %1020 = vrot.lane.b32.xlu0 %v1018_v9, %s4170_s3 }
 0x938   :  { %v1029_v11 = vld [vmem:[#allocation2 + $0x2] sm:$0x3] }
 0x939   :  { %1031 = vrot.lane.b32.xlu1 %v1029_v11, %s4170_s3  ;;  %3569 = vmatpush3.bf16.msra.mxu0 %v3797_v10 }
 0x93a   :  { %3570 = vmatprep.subr.bf16.mxu0 %v4168_v0 }
 0x93b   :  { %559 = vrot.lane.b32.xlu0 %v4384_v37, %s4171_s17 }
 0x93d   :  { %3571 = vmatpush3.bf16.msra.mxu0 %v3798_v12 }
 0x93e   :  { %3572 = vmatprep.subr.bf16.mxu0 %v4168_v0 }
 0x93f   :  { %792 = vrot.lane.b32.xlu0 %v779_v47, %s4171_s17 }
 0x941   :  { %3573 = vmatpush3.bf16.msra.mxu0 %v3799_v13 }
 0x942   :  { %3590 = vmatprep.subr.bf16.mxu0 %v4168_v0 }
 0x9a9   :  { %v1021_v14 = vpop.permute.xlu0 %1020 }
 0x9aa   :  { %1023 = vst.msk [vmem:[#allocation2] sm:$0x3] %vm123_vm0, %v1021_v14 }
 0x9ab   :  { %v1032_v15 = vpop.permute.xlu1 %1031 }
 0x9ac   :  { %v1034_v16 = vsel %vm214_vm3, %v1021_v14, %v1032_v15 }
 0x9ad   :  { %v1035_v18 = vpack.c.bf16 %v1034_v16, %v1034_v16  ;;  %v560_v19 = vpop.permute.xlu0 %559 }
 0x9ae   :  { %562 = vst.msk [vmem:[#allocation3 + $0x4] sm:$0x3] %vm123_vm0, %v560_v19  ;;  %v3803_v19 = vld [vmem:[#allocation14 + $0x10] sm:$0xff]  }
 0x9af   :  { %3575 = vmatmul.mubr.msk.bf16.vlgmr.msra.gmra.mxu0 %vm347_vm4, %v1035_v18  ;;  %v3802_v18 = vld [vmem:[#allocation14 + $0x18] sm:$0xff]  }
 0x9b0   :  { %3591 = vmatpush3.bf16.msra.mxu0 %v3800_v17  ;;  %3594 = vmatprep.mubr.msk.bf16.mxu0 %vm4169_vm1, %v4168_v0 }
 0x9b1   :  { %v793_v21 = vpop.permute.xlu0 %792  ;;  %3592 = vmatprep.subr.bf16.mxu0 %v4168_v0  ;;  %v1289_v22 = vld [vmem:[#allocation2] sm:$0x3]  ;;  %3579 = vmatpush3.bf16.msra.mxu1 %v3802_v18 }
 0x9b2   :  { %795 = vst.msk [vmem:[#allocation3 + $0x2] sm:$0x3] %vm123_vm0, %v793_v21  ;;  %v1290_v23 = vpack.c.bf16 %v1289_v22, %v1289_v22  ;;  %3580 = vmatprep.subr.bf16.mxu1 %v4168_v0  ;;  %v3804_v21 = vld [vmem:[#allocation14 + $0x8] sm:$0xff]  }
 0x9b4   :  { %3593 = vmatpush3.bf16.msra.mxu0 %v3801_v20 }
 0x9b5   :  { %3610 = vmatprep.subr.bf16.mxu0 %v4168_v0  ;;  %v885_v36 = vld [vmem:[#allocation3 + $0x4] sm:$0x3]  ;;  %3581 = vmatpush3.bf16.msra.mxu1 %v3803_v19 }
 0x9b6   :  { %3582 = vmatprep.subr.bf16.mxu1 %v4168_v0 }
 0x9b7   :  { %3595 = vmatmul.mubr.msk.bf16.vlgmr.msra.gmra.mxu0 %vm214_vm3, %v1290_v23 }
 0x9b8   :  { %3618 = vmatprep.mubr.msk.bf16.mxu0 %vm4169_vm1, %v4168_v0 }
 0x9b9   :  { %v1118_v62 = vld [vmem:[#allocation3 + $0x2] sm:$0x3]  ;;  %3583 = vmatpush3.bf16.msra.mxu1 %v3804_v21 }
 0x9ba   :  { %3584 = vmatprep.subr.bf16.mxu1 %v4168_v0 }
 0x9f4   :  { %v879_v24 = vpop.f32.mrf.mxu0 }
 0x9f5   :  { %v880_v25 = vadd.f32 %v4364_v57, %v879_v24 }
 0x9f6   :  { %v3556_v26 = vpop.f32.mrf.mxu0 }
 0x9f7   :  { %v3245_v27 = vmul.f32 -1.442695, %v880_v25  ;;  %v3805_v26 = vld [vmem:[#allocation14] sm:$0xff]  }
 0x9f8   :  { %v882_v28 = vpop.f32.mrf.mxu0  ;;  %3585 = vmatpush3.bf16.msra.mxu1 %v3805_v26 }
 0x9f9   :  { %3892 = vpow2.f32 %v3245_v27  ;;  %3598 = vmatprep.subr.bf16.mxu1 %v4168_v0 }
 0x9fa   :  { %v3557_v29 = vpop.f32.mrf.mxu0 }
 0xa06   :  { %v3893_v30 = vpop.eup %3892 }
 0xa07   :  { %v889_v32 = vadd.f32 1.0, %v3893_v30 }
 0xa09   :  { %3894 = vrcp.f32 %v889_v32 }
 0xa16   :  { %v4437_v33 = vpop.eup %3894 }
 0xa17   :  { %v892_v34 = vmul.f32 2.0, %v4437_v33 }
 0xa19   :  { %v3246_v35 = vadd.f32 -1.0, %v892_v34 }
 0xa1b   :  { %900 = vrot.lane.b32.xlu1 %v3246_v35, %s4159_s16 }
 0xa1f   :  { %895 = vrot.lane.b32.xlu1 %v885_v36, %s4170_s3  ;;  %v3806_v36 = vld [vmem:[#allocation12 + $0x18] sm:$0xff]  }
 0xa6f   :  { %v1112_v37 = vpop.f32.mrf.mxu0 }
 0xa70   :  { %v1113_v31 = vadd.f32 %v4318_v52, %v1112_v37 }
 0xa71   :  { %v3576_v38 = vpop.f32.mrf.mxu0 }
 0xa72   :  { %v3258_v39 = vmul.f32 -1.442695, %v1113_v31 }
 0xa73   :  { %v1115_v40 = vpop.f32.mrf.mxu0 }
 0xa74   :  { %3896 = vpow2.f32 %v3258_v39  ;;  %v3807_v39 = vld [vmem:[#allocation12 + $0x10] sm:$0xff]  }
 0xa75   :  { %v3577_v41 = vpop.f32.mrf.mxu0 }
 0xa76   :  { %v3808_v41 = vld [vmem:[#allocation12 + $0x8] sm:$0xff]  }
 0xa77   :  { %v1344_v43 = vpop.f32.mrf.mxu0 }
 0xa78   :  { %v1350_v44 = vadd.f32 %v1344_v43, %v1288_v42  ;;  %v3809_v42 = vld [vmem:[#allocation12] sm:$0xff]  }
 0xa79   :  { %v3596_v45 = vpop.f32.mrf.mxu0 }
 0xa7a   :  { %v3271_v46 = vmul.f32 -1.442695, %v1350_v44 }
 0xa7b   :  { %v1347_v47 = vpop.f32.mrf.mxu0 }
 0xa7c   :  { %3898 = vpow2.f32 %v3271_v46  ;;  %v3810_v46 = vld [vmem:[#allocation11 + $0x8] sm:$0xff]  }
 0xa7d   :  { %v3597_v48 = vpop.f32.mrf.mxu0 }
 0xa81   :  { %v3897_v49 = vpop.eup %3896 }
 0xa82   :  { %v1122_v50 = vadd.f32 1.0, %v3897_v49  ;;  %v3811_v49 = vld [vmem:[#allocation11] sm:$0xff]  }
 0xa84   :  { %3900 = vrcp.f32 %v1122_v50 }
 0xa89   :  { %v3899_v51 = vpop.eup %3898 }
 0xa8a   :  { %v1355_v53 = vadd.f32 1.0, %v3899_v51 }
 0xa8c   :  { %3902 = vrcp.f32 %v1355_v53 }
 0xa8d   :  { %v901_v54 = vpop.permute.xlu1 %900 }
 0xa8e   :  { %v903_v55 = vmul.f32 %v4437_v33, %v901_v54 }
 0xa90   :  { %905 = vrot.lane.b32.xlu0 %v903_v55, %s4170_s3 }
 0xa91   :  { %v3901_v56 = vpop.eup %3900  ;;  %v896_v2 = vpop.permute.xlu1 %895 }
 0xa92   :  { %v1125_v58 = vmul.f32 2.0, %v3901_v56  ;;  %v898_v3 = vmul.f32 %v4437_v33, %v896_v2 }
 0xa94   :  { %1025 = vrot.lane.b32.xlu0 %v4400_v59, %s4171_s17  ;;  %v3259_v60 = vadd.f32 -1.0, %v1125_v58 }
 0xa96   :  { %1133 = vrot.lane.b32.xlu1 %v3259_v60, %s4159_s16 }
 0xa99   :  { %v4448_v61 = vpop.eup %3902 }
 0xa9a   :  { %1128 = vrot.lane.b32.xlu1 %v1118_v62, %s4170_s3  ;;  %v1358_v63 = vmul.f32 2.0, %v4448_v61 }
 0xa9c   :  { %v3272_v1 = vadd.f32 -1.0, %v1358_v63 }
 0xa9e   :  { %1366 = vrot.lane.b32.xlu1 %v3272_v1, %s4159_s16 }
 0xb02   :  { %v906_v4 = vpop.permute.xlu0 %905 }
 0xb03   :  { %v4454_v5 = vadd.f32 %v906_v4, %v898_v3 }
 0xb05   :  { %3904 = vtanh.f32 %v4454_v5 }
 0xb06   :  { %v1026_v59 = vpop.permute.xlu0 %1025 }
 0xb07   :  { %1028 = vst.msk [vmem:[#allocation3] sm:$0x3] %vm123_vm0, %v1026_v59 }
 0xb08   :  { %v1134_v6 = vpop.permute.xlu1 %1133 }
 0xb09   :  { %v1136_v7 = vmul.f32 %v3901_v56, %v1134_v6 }
 0xb0b   :  { %1138 = vrot.lane.b32.xlu0 %v1136_v7, %s4170_s3 }
 0xb0c   :  { %v1129_v8 = vpop.permute.xlu1 %1128 }
 0xb0d   :  { %v1131_v13 = vmul.f32 %v3901_v56, %v1129_v8 }
 0xb0e   :  { %v1351_v9 = vld [vmem:[#allocation3] sm:$0x3] }
 0xb0f   :  { %1361 = vrot.lane.b32.xlu1 %v1351_v9, %s4170_s3 }
 0xb10   :  { %v1367_v11 = vpop.permute.xlu1 %1366 }
 0xb11   :  { %v1369_v12 = vmul.f32 %v4448_v61, %v1367_v11 }
 0xb12   :  { %v3905_v10 = vpop.eup %3904 }
 0xb13   :  { %911 = vrot.lane.b32.xlu0 %v3905_v10, %s4159_s16  ;;  %v1650_v10 = vld [vmem:[#allocation4 + $0x8] sm:$0x3] }
 0xb17   :  { %1371 = vrot.lane.b32.xlu0 %v1369_v12, %s4170_s3 }
 0xb7d   :  { %v1139_v14 = vpop.permute.xlu0 %1138 }
 0xb7e   :  { %v1141_v15 = vadd.f32 %v1139_v14, %v1131_v13 }
 0xb80   :  { %3906 = vtanh.f32 %v1141_v15 }
 0xb81   :  { %v1362_v22 = vpop.permute.xlu1 %1361 }
 0xb82   :  { %v1364_v24 = vmul.f32 %v4448_v61, %v1362_v22 }
 0xb85   :  { %v912_v16 = vpop.permute.xlu0 %911 }
 0xb86   :  { %v914_v17 = vmul.f32 %v4437_v33, %v912_v16 }
 0xb88   :  { %916 = vrot.lane.b32.xlu1 %v914_v17, %s4170_s3 }
 0xb89   :  { %v1372_v23 = vpop.permute.xlu0 %1371 }
 0xb8a   :  { %v4470_v25 = vadd.f32 %v1372_v23, %v1364_v24 }
 0xb8c   :  { %3908 = vtanh.f32 %v4470_v25 }
 0xb8d   :  { %v3907_v20 = vpop.eup %3906 }
 0xb8e   :  { %1144 = vrot.lane.b32.xlu0 %v3907_v20, %s4159_s16 }
 0xb99   :  { %v3909_v32 = vpop.eup %3908 }
 0xbfa   :  { %v917_v27 = vpop.permute.xlu1 %916 }
 0xbfb   :  { %919 = vst.msk [vmem:[#allocation2 + $0x4] sm:$0x3] %vm123_vm0, %v917_v27  ;;  %925 = vst.msk [vmem:[#allocation5 + $0x2] sm:$0x3] %vm123_vm0, %v917_v27 }
 0xc00   :  { %v1145_v28 = vpop.permute.xlu0 %1144 }
 0xc01   :  { %v1147_v29 = vmul.f32 %v3901_v56, %v1145_v28 }
 0xc02   :  { %v1158_v30 = vld [vmem:[#allocation2 + $0x4] sm:$0x3] }
 0xc03   :  { %1149 = vrot.lane.b32.xlu1 %v1147_v29, %s4170_s3  ;;  %1160 = vrot.lane.b32.xlu0 %v1158_v30, %s4170_s3 }
 0xc07   :  { %1377 = vrot.lane.b32.xlu1 %v3909_v32, %s4159_s16 }
 0xc75   :  { %v1161_v33 = vpop.permute.xlu0 %1160  ;;  %v1150_v34 = vpop.permute.xlu1 %1149 }
 0xc76   :  { %1152 = vst.msk [vmem:[#allocation2 + $0x2] sm:$0x3] %vm123_vm0, %v1150_v34  ;;  %v1163_v35 = vsel %vm214_vm3, %v1150_v34, %v1161_v33 }
 0xc77   :  { %v1164_v37 = vpack.c.bf16 %v1163_v35, %v1163_v35 }
 0xc79   :  { %3587 = vmatmul.mubr.msk.bf16.vlgmr.msra.gmra.mxu1 %vm347_vm4, %v1164_v37  ;;  %v1378_v31 = vpop.permute.xlu1 %1377 }
 0xc7a   :  { %v1380_v38 = vmul.f32 %v4448_v61, %v1378_v31  ;;  %3599 = vmatpush3.bf16.msra.mxu1 %v3806_v36  ;;  %3606 = vmatprep.mubr.msk.bf16.mxu1 %vm4169_vm1, %v4168_v0 }
 0xc7b   :  { %3600 = vmatprep.subr.bf16.mxu1 %v4168_v0 }
 0xc7c   :  { %1382 = vrot.lane.b32.xlu0 %v1380_v38, %s4170_s3 }
 0xc7d   :  { %v1391_v40 = vld [vmem:[#allocation2 + $0x2] sm:$0x3] }
 0xc7e   :  { %1393 = vrot.lane.b32.xlu1 %v1391_v40, %s4170_s3  ;;  %3601 = vmatpush3.bf16.msra.mxu1 %v3807_v39 }
 0xc7f   :  { %3602 = vmatprep.subr.bf16.mxu1 %v4168_v0 }
 0xc80   :  { %921 = vrot.lane.b32.xlu0 %v4454_v5, %s4171_s17 }
 0xc82   :  { %3603 = vmatpush3.bf16.msra.mxu1 %v3808_v41 }
 0xc83   :  { %3604 = vmatprep.subr.bf16.mxu1 %v4168_v0 }
 0xc84   :  { %1154 = vrot.lane.b32.xlu0 %v1141_v15, %s4171_s17 }
 0xc86   :  { %3605 = vmatpush3.bf16.msra.mxu1 %v3809_v42 }
 0xc87   :  { %3622 = vmatprep.subr.bf16.mxu1 %v4168_v0 }
 0xcee   :  { %v1383_v43 = vpop.permute.xlu0 %1382 }
 0xcef   :  { %1385 = vst.msk [vmem:[#allocation2] sm:$0x3] %vm123_vm0, %v1383_v43 }
 0xcf0   :  { %v1394_v44 = vpop.permute.xlu1 %1393 }
 0xcf1   :  { %v1396_v45 = vsel %vm214_vm3, %v1383_v43, %v1394_v44 }
 0xcf2   :  { %v1397_v47 = vpack.c.bf16 %v1396_v45, %v1396_v45  ;;  %v922_v48 = vpop.permute.xlu0 %921 }
 0xcf3   :  { %924 = vst.msk [vmem:[#allocation3 + $0x4] sm:$0x3] %vm123_vm0, %v922_v48 }
 0xcf4   :  { %3607 = vmatmul.mubr.msk.bf16.vlgmr.msra.gmra.mxu1 %vm347_vm4, %v1397_v47  ;;  %v3813_v47 = vld [vmem:[#allocation14 + $0x10] sm:$0xff]  }
 0xcf5   :  { %3623 = vmatpush3.bf16.msra.mxu1 %v3810_v46  ;;  %3626 = vmatprep.mubr.msk.bf16.mxu1 %vm4169_vm1, %v4168_v0  ;;  %v3812_v46 = vld [vmem:[#allocation14 + $0x18] sm:$0xff]  }
 0xcf6   :  { %v1155_v50 = vpop.permute.xlu0 %1154  ;;  %3624 = vmatprep.subr.bf16.mxu1 %v4168_v0  ;;  %v1651_v51 = vld [vmem:[#allocation2] sm:$0x3]  ;;  %3611 = vmatpush3.bf16.msra.mxu0 %v3812_v46 }
 0xcf7   :  { %1157 = vst.msk [vmem:[#allocation3 + $0x2] sm:$0x3] %vm123_vm0, %v1155_v50  ;;  %v1652_v53 = vpack.c.bf16 %v1651_v51, %v1651_v51  ;;  %3612 = vmatprep.subr.bf16.mxu0 %v4168_v0 }
 0xcf9   :  { %3625 = vmatpush3.bf16.msra.mxu1 %v3811_v49  ;;  %v3814_v49 = vld [vmem:[#allocation14 + $0x8] sm:$0xff]  }
 0xcfa   :  { %3642 = vmatprep.subr.bf16.mxu1 %v4168_v0  ;;  %v1247_v4 = vld [vmem:[#allocation3 + $0x4] sm:$0x3]  ;;  %3613 = vmatpush3.bf16.msra.mxu0 %v3813_v47 }
 0xcfb   :  { %3614 = vmatprep.subr.bf16.mxu0 %v4168_v0 }
 0xcfc   :  { %3627 = vmatmul.mubr.msk.bf16.vlgmr.msra.gmra.mxu1 %vm214_vm3, %v1652_v53 }
 0xcfd   :  { %3650 = vmatprep.mubr.msk.bf16.mxu1 %vm4169_vm1, %v4168_v0 }
 0xcfe   :  { %v1480_v27 = vld [vmem:[#allocation3 + $0x2] sm:$0x3]  ;;  %3615 = vmatpush3.bf16.msra.mxu0 %v3814_v49 }
 0xcff   :  { %3616 = vmatprep.subr.bf16.mxu0 %v4168_v0 }
 0xd39   :  { %v1241_v54 = vpop.f32.mrf.mxu1 }
 0xd3a   :  { %v1242_v55 = vadd.f32 %v4364_v57, %v1241_v54 }
 0xd3b   :  { %v3588_v56 = vpop.f32.mrf.mxu1 }
 0xd3c   :  { %v3266_v58 = vmul.f32 -1.442695, %v1242_v55  ;;  %v3815_v55 = vld [vmem:[#allocation14] sm:$0xff]  }
 0xd3d   :  { %v1244_v60 = vpop.f32.mrf.mxu1  ;;  %3617 = vmatpush3.bf16.msra.mxu0 %v3815_v55 }
 0xd3e   :  { %3910 = vpow2.f32 %v3266_v58  ;;  %3630 = vmatprep.subr.bf16.mxu0 %v4168_v0 }
 0xd3f   :  { %v3589_v61 = vpop.f32.mrf.mxu1 }
 0xd4b   :  { %v3911_v62 = vpop.eup %3910 }
 0xd4c   :  { %v1251_v63 = vadd.f32 1.0, %v3911_v62 }
 0xd4e   :  { %3912 = vrcp.f32 %v1251_v63 }
 0xd5b   :  { %v4507_v1 = vpop.eup %3912 }
 0xd5c   :  { %v1254_v2 = vmul.f32 2.0, %v4507_v1 }
 0xd5e   :  { %v3267_v3 = vadd.f32 -1.0, %v1254_v2 }
 0xd60   :  { %1262 = vrot.lane.b32.xlu1 %v3267_v3, %s4159_s16  ;;  %v3816_v3 = vld [vmem:[#allocation12 + $0x18] sm:$0xff]  }
 0xd64   :  { %1257 = vrot.lane.b32.xlu1 %v1247_v4, %s4170_s3 }
 0xdb4   :  { %v1474_v5 = vpop.f32.mrf.mxu1 }
 0xdb5   :  { %v1475_v59 = vadd.f32 %v4318_v52, %v1474_v5 }
 0xdb6   :  { %v3608_v6 = vpop.f32.mrf.mxu1 }
 0xdb7   :  { %v3279_v7 = vmul.f32 -1.442695, %v1475_v59  ;;  %v3817_v6 = vld [vmem:[#allocation12 + $0x10] sm:$0xff]  }
 0xdb8   :  { %v1477_v8 = vpop.f32.mrf.mxu1 }
 0xdb9   :  { %3914 = vpow2.f32 %v3279_v7  ;;  %v3818_v8 = vld [vmem:[#allocation12 + $0x8] sm:$0xff]  }
 0xdba   :  { %v3609_v9 = vpop.f32.mrf.mxu1 }
 0xdbb   :  { %v3819_v9 = vld [vmem:[#allocation12] sm:$0xff]  }
 0xdbc   :  { %v1706_v11 = vpop.f32.mrf.mxu1 }
 0xdbd   :  { %v1712_v12 = vadd.f32 %v1706_v11, %v1650_v10 }
 0xdbe   :  { %v3628_v13 = vpop.f32.mrf.mxu1 }
 0xdbf   :  { %v3292_v14 = vmul.f32 -1.442695, %v1712_v12  ;;  %v3820_v13 = vld [vmem:[#allocation11 + $0x8] sm:$0xff]  }
 0xdc0   :  { %v1709_v15 = vpop.f32.mrf.mxu1 }
 0xdc1   :  { %3916 = vpow2.f32 %v3292_v14 }
 0xdc2   :  { %v3629_v16 = vpop.f32.mrf.mxu1 }
 0xdc3   :  { %v3821_v16 = vld [vmem:[#allocation11] sm:$0xff]  }
 0xdc6   :  { %v3915_v17 = vpop.eup %3914 }
 0xdc7   :  { %v1484_v18 = vadd.f32 1.0, %v3915_v17 }
 0xdc9   :  { %3918 = vrcp.f32 %v1484_v18 }
 0xdce   :  { %v3917_v19 = vpop.eup %3916 }
 0xdcf   :  { %v1717_v20 = vadd.f32 1.0, %v3917_v19 }
 0xdd1   :  { %3920 = vrcp.f32 %v1717_v20 }
 0xdd2   :  { %v1263_v52 = vpop.permute.xlu1 %1262 }
 0xdd3   :  { %v1265_v21 = vmul.f32 %v4507_v1, %v1263_v52 }
 0xdd5   :  { %1267 = vrot.lane.b32.xlu0 %v1265_v21, %s4170_s3 }
 0xdd6   :  { %v3919_v22 = vpop.eup %3918  ;;  %v1258_v30 = vpop.permute.xlu1 %1257 }
 0xdd7   :  { %v1487_v23 = vmul.f32 2.0, %v3919_v22  ;;  %v1260_v32 = vmul.f32 %v4507_v1, %v1258_v30 }
 0xdd9   :  { %1387 = vrot.lane.b32.xlu0 %v4470_v25, %s4171_s17  ;;  %v3280_v24 = vadd.f32 -1.0, %v1487_v23 }
 0xddb   :  { %1495 = vrot.lane.b32.xlu1 %v3280_v24, %s4159_s16 }
 0xdde   :  { %v4518_v26 = vpop.eup %3920 }
 0xddf   :  { %1490 = vrot.lane.b32.xlu1 %v1480_v27, %s4170_s3  ;;  %v1720_v28 = vmul.f32 2.0, %v4518_v26 }
 0xde1   :  { %v3293_v29 = vadd.f32 -1.0, %v1720_v28 }
 0xde3   :  { %1728 = vrot.lane.b32.xlu1 %v3293_v29, %s4159_s16 }
 0xe47   :  { %v1268_v33 = vpop.permute.xlu0 %1267 }
 0xe48   :  { %v4524_v34 = vadd.f32 %v1268_v33, %v1260_v32 }
 0xe4a   :  { %3922 = vtanh.f32 %v4524_v34 }
 0xe4b   :  { %v1388_v25 = vpop.permute.xlu0 %1387 }
 0xe4c   :  { %1390 = vst.msk [vmem:[#allocation3] sm:$0x3] %vm123_vm0, %v1388_v25 }
 0xe4d   :  { %v1496_v35 = vpop.permute.xlu1 %1495 }
 0xe4e   :  { %v1498_v36 = vmul.f32 %v3919_v22, %v1496_v35 }
 0xe50   :  { %1500 = vrot.lane.b32.xlu0 %v1498_v36, %s4170_s3 }
 0xe51   :  { %v1491_v37 = vpop.permute.xlu1 %1490 }
 0xe52   :  { %v1493_v41 = vmul.f32 %v3919_v22, %v1491_v37 }
 0xe53   :  { %v1713_v31 = vld [vmem:[#allocation3] sm:$0x3] }
 0xe54   :  { %1723 = vrot.lane.b32.xlu1 %v1713_v31, %s4170_s3  ;;  %v2012_v31 = vld [vmem:[#allocation4 + $0xa] sm:$0x3] }
 0xe55   :  { %v1729_v39 = vpop.permute.xlu1 %1728 }
 0xe56   :  { %v1731_v40 = vmul.f32 %v4518_v26, %v1729_v39 }
 0xe57   :  { %v3923_v38 = vpop.eup %3922 }
 0xe58   :  { %1273 = vrot.lane.b32.xlu0 %v3923_v38, %s4159_s16 }
 0xe5c   :  { %1733 = vrot.lane.b32.xlu0 %v1731_v40, %s4170_s3 }
 0xec2   :  { %v1501_v42 = vpop.permute.xlu0 %1500 }
 0xec3   :  { %v1503_v43 = vadd.f32 %v1501_v42, %v1493_v41 }
 0xec5   :  { %3924 = vtanh.f32 %v1503_v43 }
 0xec6   :  { %v1724_v50 = vpop.permute.xlu1 %1723 }
 0xec7   :  { %v1726_v53 = vmul.f32 %v4518_v26, %v1724_v50 }
 0xeca   :  { %v1274_v44 = vpop.permute.xlu0 %1273 }
 0xecb   :  { %v1276_v45 = vmul.f32 %v4507_v1, %v1274_v44 }
 0xecd   :  { %1278 = vrot.lane.b32.xlu1 %v1276_v45, %s4170_s3 }
 0xece   :  { %v1734_v51 = vpop.permute.xlu0 %1733 }
 0xecf   :  { %v4540_v54 = vadd.f32 %v1734_v51, %v1726_v53 }
 0xed1   :  { %3926 = vtanh.f32 %v4540_v54 }
 0xed2   :  { %v3925_v48 = vpop.eup %3924 }
 0xed3   :  { %1506 = vrot.lane.b32.xlu0 %v3925_v48, %s4159_s16 }
 0xede   :  { %v3927_v62 = vpop.eup %3926 }
 0xf3f   :  { %v1279_v56 = vpop.permute.xlu1 %1278 }
 0xf40   :  { %1281 = vst.msk [vmem:[#allocation2 + $0x4] sm:$0x3] %vm123_vm0, %v1279_v56  ;;  %1287 = vst.msk [vmem:[#allocation5 + $0x4] sm:$0x3] %vm123_vm0, %v1279_v56 }
 0xf45   :  { %v1507_v58 = vpop.permute.xlu0 %1506 }
 0xf46   :  { %v1509_v60 = vmul.f32 %v3919_v22, %v1507_v58 }
 0xf47   :  { %v1520_v61 = vld [vmem:[#allocation2 + $0x4] sm:$0x3] }
 0xf48   :  { %1511 = vrot.lane.b32.xlu1 %v1509_v60, %s4170_s3  ;;  %1522 = vrot.lane.b32.xlu0 %v1520_v61, %s4170_s3 }
 0xf4c   :  { %1739 = vrot.lane.b32.xlu1 %v3927_v62, %s4159_s16 }
 0xfba   :  { %v1523_v63 = vpop.permute.xlu0 %1522  ;;  %v1512_v1 = vpop.permute.xlu1 %1511 }
 0xfbb   :  { %1514 = vst.msk [vmem:[#allocation2 + $0x2] sm:$0x3] %vm123_vm0, %v1512_v1  ;;  %v1525_v2 = vsel %vm214_vm3, %v1512_v1, %v1523_v63 }
 0xfbc   :  { %v1526_v4 = vpack.c.bf16 %v1525_v2, %v1525_v2 }
 0xfbe   :  { %3619 = vmatmul.mubr.msk.bf16.vlgmr.msra.gmra.mxu0 %vm347_vm4, %v1526_v4  ;;  %v1740_v5 = vpop.permute.xlu1 %1739 }
 0xfbf   :  { %v1742_v59 = vmul.f32 %v4518_v26, %v1740_v5  ;;  %3631 = vmatpush3.bf16.msra.mxu0 %v3816_v3  ;;  %3638 = vmatprep.mubr.msk.bf16.mxu0 %vm4169_vm1, %v4168_v0 }
 0xfc0   :  { %3632 = vmatprep.subr.bf16.mxu0 %v4168_v0 }
 0xfc1   :  { %1744 = vrot.lane.b32.xlu0 %v1742_v59, %s4170_s3 }
 0xfc2   :  { %v1753_v7 = vld [vmem:[#allocation2 + $0x2] sm:$0x3] }
 0xfc3   :  { %1755 = vrot.lane.b32.xlu1 %v1753_v7, %s4170_s3  ;;  %3633 = vmatpush3.bf16.msra.mxu0 %v3817_v6 }
 0xfc4   :  { %3634 = vmatprep.subr.bf16.mxu0 %v4168_v0 }
 0xfc5   :  { %1283 = vrot.lane.b32.xlu0 %v4524_v34, %s4171_s17 }
 0xfc7   :  { %3635 = vmatpush3.bf16.msra.mxu0 %v3818_v8 }
 0xfc8   :  { %3636 = vmatprep.subr.bf16.mxu0 %v4168_v0 }
 0xfc9   :  { %1516 = vrot.lane.b32.xlu0 %v1503_v43, %s4171_s17 }
 0xfcb   :  { %3637 = vmatpush3.bf16.msra.mxu0 %v3819_v9 }
 0xfcc   :  { %3654 = vmatprep.subr.bf16.mxu0 %v4168_v0 }
0x1033   :  { %v1745_v10 = vpop.permute.xlu0 %1744 }
0x1034   :  { %1747 = vst.msk [vmem:[#allocation2] sm:$0x3] %vm123_vm0, %v1745_v10 }
0x1035   :  { %v1756_v11 = vpop.permute.xlu1 %1755 }
0x1036   :  { %v1758_v12 = vsel %vm214_vm3, %v1745_v10, %v1756_v11 }
0x1037   :  { %v1759_v14 = vpack.c.bf16 %v1758_v12, %v1758_v12  ;;  %v1284_v15 = vpop.permute.xlu0 %1283 }
0x1038   :  { %1286 = vst.msk [vmem:[#allocation3 + $0x4] sm:$0x3] %vm123_vm0, %v1284_v15 }
0x1039   :  { %3639 = vmatmul.mubr.msk.bf16.vlgmr.msra.gmra.mxu0 %vm347_vm4, %v1759_v14  ;;  %v3823_v14 = vld [vmem:[#allocation14 + $0x10] sm:$0xff]  }
0x103a   :  { %3655 = vmatpush3.bf16.msra.mxu0 %v3820_v13  ;;  %3658 = vmatprep.mubr.msk.bf16.mxu0 %vm4169_vm1, %v4168_v0  ;;  %v3822_v13 = vld [vmem:[#allocation14 + $0x18] sm:$0xff]  }
0x103b   :  { %v1517_v17 = vpop.permute.xlu0 %1516  ;;  %3656 = vmatprep.subr.bf16.mxu0 %v4168_v0  ;;  %v2013_v18 = vld [vmem:[#allocation2] sm:$0x3]  ;;  %3643 = vmatpush3.bf16.msra.mxu1 %v3822_v13 }
0x103c   :  { %1519 = vst.msk [vmem:[#allocation3 + $0x2] sm:$0x3] %vm123_vm0, %v1517_v17  ;;  %v2014_v19 = vpack.c.bf16 %v2013_v18, %v2013_v18  ;;  %3644 = vmatprep.subr.bf16.mxu1 %v4168_v0 }
0x103e   :  { %3657 = vmatpush3.bf16.msra.mxu0 %v3821_v16  ;;  %v3824_v16 = vld [vmem:[#allocation14 + $0x8] sm:$0xff]  }
0x103f   :  { %3674 = vmatprep.subr.bf16.mxu0 %v4168_v0  ;;  %v1609_v32 = vld [vmem:[#allocation3 + $0x4] sm:$0x3]  ;;  %3645 = vmatpush3.bf16.msra.mxu1 %v3823_v14 }
0x1040   :  { %3646 = vmatprep.subr.bf16.mxu1 %v4168_v0 }
0x1041   :  { %3659 = vmatmul.mubr.msk.bf16.vlgmr.msra.gmra.mxu0 %vm214_vm3, %v2014_v19 }
0x1042   :  { %3682 = vmatprep.mubr.msk.bf16.mxu0 %vm4169_vm1, %v4168_v0 }
0x1043   :  { %v1842_v56 = vld [vmem:[#allocation3 + $0x2] sm:$0x3]  ;;  %3647 = vmatpush3.bf16.msra.mxu1 %v3824_v16 }
0x1044   :  { %3648 = vmatprep.subr.bf16.mxu1 %v4168_v0 }
0x107e   :  { %v1603_v20 = vpop.f32.mrf.mxu0 }
0x107f   :  { %v1604_v52 = vadd.f32 %v4364_v57, %v1603_v20  ;;  %v4585_v57 = vld [vmem:[%s4849_s5] ss:$0 sm:$0xff] }
0x1080   :  { %v3620_v21 = vpop.f32.mrf.mxu0 }
0x1081   :  { %v3287_v22 = vmul.f32 -1.442695, %v1604_v52  ;;  %v3825_v52 = vld [vmem:[#allocation14] sm:$0xff]  }
0x1082   :  { %v1606_v23 = vpop.f32.mrf.mxu0  ;;  %3649 = vmatpush3.bf16.msra.mxu1 %v3825_v52 }
0x1083   :  { %3928 = vpow2.f32 %v3287_v22  ;;  %3662 = vmatprep.subr.bf16.mxu1 %v4168_v0 }
0x1084   :  { %v3621_v24 = vpop.f32.mrf.mxu0 }
0x1090   :  { %v3929_v26 = vpop.eup %3928 }
0x1091   :  { %v1613_v27 = vadd.f32 1.0, %v3929_v26 }
0x1093   :  { %3930 = vrcp.f32 %v1613_v27 }
0x10a0   :  { %v4577_v28 = vpop.eup %3930 }
0x10a1   :  { %v1616_v29 = vmul.f32 2.0, %v4577_v28 }
0x10a3   :  { %v3288_v30 = vadd.f32 -1.0, %v1616_v29 }
0x10a5   :  { %1624 = vrot.lane.b32.xlu1 %v3288_v30, %s4159_s16  ;;  %v3826_v30 = vld [vmem:[#allocation12 + $0x18] sm:$0xff]  }
0x10a9   :  { %1619 = vrot.lane.b32.xlu1 %v1609_v32, %s4170_s3 }
0x10f9   :  { %v1836_v33 = vpop.f32.mrf.mxu0 }
0x10fa   :  { %v1837_v34 = vadd.f32 %v4585_v57, %v1836_v33 }
0x10fb   :  { %v3640_v25 = vpop.f32.mrf.mxu0 }
0x10fc   :  { %v3300_v35 = vmul.f32 -1.442695, %v1837_v34  ;;  %v3827_v25 = vld [vmem:[#allocation12 + $0x10] sm:$0xff]  }
0x10fd   :  { %v1839_v36 = vpop.f32.mrf.mxu0 }
0x10fe   :  { %3932 = vpow2.f32 %v3300_v35  ;;  %v3828_v36 = vld [vmem:[#allocation12 + $0x8] sm:$0xff]  }
0x10ff   :  { %v3641_v37 = vpop.f32.mrf.mxu0 }
0x1100   :  { %v3829_v37 = vld [vmem:[#allocation12] sm:$0xff]  }
0x1101   :  { %v2068_v38 = vpop.f32.mrf.mxu0 }
0x1102   :  { %v2074_v39 = vadd.f32 %v2068_v38, %v2012_v31 }
0x1103   :  { %v3660_v40 = vpop.f32.mrf.mxu0 }
0x1104   :  { %v3313_v41 = vmul.f32 -1.442695, %v2074_v39  ;;  %v3830_v40 = vld [vmem:[#allocation11 + $0x8] sm:$0xff]  }
0x1105   :  { %v2071_v42 = vpop.f32.mrf.mxu0 }
0x1106   :  { %3934 = vpow2.f32 %v3313_v41 }
0x1107   :  { %v3661_v43 = vpop.f32.mrf.mxu0 }
0x1108   :  { %v3831_v43 = vld [vmem:[#allocation11] sm:$0xff]  }
0x110b   :  { %v3933_v44 = vpop.eup %3932 }
0x110c   :  { %v1846_v45 = vadd.f32 1.0, %v3933_v44 }
0x110e   :  { %3936 = vrcp.f32 %v1846_v45 }
0x1113   :  { %v3935_v46 = vpop.eup %3934 }
0x1114   :  { %v2079_v47 = vadd.f32 1.0, %v3935_v46 }
0x1116   :  { %3938 = vrcp.f32 %v2079_v47  ;;  %v4654_v47 = vld [vmem:[%s4851_s7] ss:$0 sm:$0xff] }
0x1117   :  { %v1625_v48 = vpop.permute.xlu1 %1624 }
0x1118   :  { %v1627_v49 = vmul.f32 %v4577_v28, %v1625_v48 }
0x111a   :  { %1629 = vrot.lane.b32.xlu0 %v1627_v49, %s4170_s3 }
0x111b   :  { %v3937_v50 = vpop.eup %3936  ;;  %v1620_v61 = vpop.permute.xlu1 %1619 }
0x111c   :  { %v1849_v51 = vmul.f32 2.0, %v3937_v50  ;;  %v1622_v62 = vmul.f32 %v4577_v28, %v1620_v61 }
0x111e   :  { %1749 = vrot.lane.b32.xlu0 %v4540_v54, %s4171_s17  ;;  %v3301_v53 = vadd.f32 -1.0, %v1849_v51 }
0x1120   :  { %1857 = vrot.lane.b32.xlu1 %v3301_v53, %s4159_s16 }
0x1123   :  { %v4593_v55 = vpop.eup %3938 }
0x1124   :  { %1852 = vrot.lane.b32.xlu1 %v1842_v56, %s4170_s3  ;;  %v2082_v58 = vmul.f32 2.0, %v4593_v55 }
0x1126   :  { %v3314_v60 = vadd.f32 -1.0, %v2082_v58 }
0x1128   :  { %2090 = vrot.lane.b32.xlu1 %v3314_v60, %s4159_s16 }
0x118c   :  { %v1630_v63 = vpop.permute.xlu0 %1629 }
0x118d   :  { %v4599_v1 = vadd.f32 %v1630_v63, %v1622_v62 }
0x118f   :  { %3940 = vtanh.f32 %v4599_v1 }
0x1190   :  { %v1750_v54 = vpop.permute.xlu0 %1749 }
0x1191   :  { %1752 = vst.msk [vmem:[#allocation3] sm:$0x3] %vm123_vm0, %v1750_v54 }
0x1192   :  { %v1858_v2 = vpop.permute.xlu1 %1857 }
0x1193   :  { %v1860_v3 = vmul.f32 %v3937_v50, %v1858_v2 }
0x1195   :  { %1862 = vrot.lane.b32.xlu0 %v1860_v3, %s4170_s3 }
0x1196   :  { %v1853_v4 = vpop.permute.xlu1 %1852 }
0x1197   :  { %v1855_v8 = vmul.f32 %v3937_v50, %v1853_v4 }
0x1198   :  { %v2075_v5 = vld [vmem:[#allocation3] sm:$0x3] }
0x1199   :  { %2085 = vrot.lane.b32.xlu1 %v2075_v5, %s4170_s3 }
0x119a   :  { %v2091_v6 = vpop.permute.xlu1 %2090 }
0x119b   :  { %v2093_v7 = vmul.f32 %v4593_v55, %v2091_v6 }
0x119c   :  { %v3941_v59 = vpop.eup %3940 }
0x119d   :  { %1635 = vrot.lane.b32.xlu0 %v3941_v59, %s4159_s16  ;;  %v2374_v59 = vld [vmem:[#allocation4 + $0xc] sm:$0x3] }
0x11a1   :  { %2095 = vrot.lane.b32.xlu0 %v2093_v7, %s4170_s3 }
0x1207   :  { %v1863_v9 = vpop.permute.xlu0 %1862 }
0x1208   :  { %v1865_v10 = vadd.f32 %v1863_v9, %v1855_v8 }
0x120a   :  { %3942 = vtanh.f32 %v1865_v10 }
0x120b   :  { %v2086_v17 = vpop.permute.xlu1 %2085 }
0x120c   :  { %v2088_v19 = vmul.f32 %v4593_v55, %v2086_v17 }
0x120f   :  { %v1636_v11 = vpop.permute.xlu0 %1635 }
0x1210   :  { %v1638_v12 = vmul.f32 %v4577_v28, %v1636_v11 }
0x1212   :  { %1640 = vrot.lane.b32.xlu1 %v1638_v12, %s4170_s3 }
0x1213   :  { %v2096_v18 = vpop.permute.xlu0 %2095 }
0x1214   :  { %v4615_v20 = vadd.f32 %v2096_v18, %v2088_v19 }
0x1216   :  { %3944 = vtanh.f32 %v4615_v20 }
0x1217   :  { %v3943_v15 = vpop.eup %3942 }
0x1218   :  { %1868 = vrot.lane.b32.xlu0 %v3943_v15, %s4159_s16 }
0x1223   :  { %v3945_v26 = vpop.eup %3944 }
0x1284   :  { %v1641_v21 = vpop.permute.xlu1 %1640 }
0x1285   :  { %1643 = vst.msk [vmem:[#allocation2 + $0x4] sm:$0x3] %vm123_vm0, %v1641_v21  ;;  %1649 = vst.msk [vmem:[#allocation5 + $0x6] sm:$0x3] %vm123_vm0, %v1641_v21 }
0x128a   :  { %v1869_v22 = vpop.permute.xlu0 %1868 }
0x128b   :  { %v1871_v23 = vmul.f32 %v3937_v50, %v1869_v22 }
0x128c   :  { %v1882_v24 = vld [vmem:[#allocation2 + $0x4] sm:$0x3] }
0x128d   :  { %1873 = vrot.lane.b32.xlu1 %v1871_v23, %s4170_s3  ;;  %1884 = vrot.lane.b32.xlu0 %v1882_v24, %s4170_s3 }
0x1291   :  { %2101 = vrot.lane.b32.xlu1 %v3945_v26, %s4159_s16 }
0x12ff   :  { %v1885_v27 = vpop.permute.xlu0 %1884  ;;  %v1874_v28 = vpop.permute.xlu1 %1873 }
0x1300   :  { %1876 = vst.msk [vmem:[#allocation2 + $0x2] sm:$0x3] %vm123_vm0, %v1874_v28  ;;  %v1887_v29 = vsel %vm214_vm3, %v1874_v28, %v1885_v27 }
0x1301   :  { %v1888_v32 = vpack.c.bf16 %v1887_v29, %v1887_v29 }
0x1303   :  { %3651 = vmatmul.mubr.msk.bf16.vlgmr.msra.gmra.mxu1 %vm347_vm4, %v1888_v32  ;;  %v2102_v33 = vpop.permute.xlu1 %2101 }
0x1304   :  { %v2104_v34 = vmul.f32 %v4593_v55, %v2102_v33  ;;  %3663 = vmatpush3.bf16.msra.mxu1 %v3826_v30  ;;  %3670 = vmatprep.mubr.msk.bf16.mxu1 %vm4169_vm1, %v4168_v0 }
0x1305   :  { %3664 = vmatprep.subr.bf16.mxu1 %v4168_v0 }
0x1306   :  { %2106 = vrot.lane.b32.xlu0 %v2104_v34, %s4170_s3 }
0x1307   :  { %v2115_v35 = vld [vmem:[#allocation2 + $0x2] sm:$0x3] }
0x1308   :  { %2117 = vrot.lane.b32.xlu1 %v2115_v35, %s4170_s3  ;;  %3665 = vmatpush3.bf16.msra.mxu1 %v3827_v25 }
0x1309   :  { %3666 = vmatprep.subr.bf16.mxu1 %v4168_v0 }
0x130a   :  { %1645 = vrot.lane.b32.xlu0 %v4599_v1, %s4171_s17 }
0x130c   :  { %3667 = vmatpush3.bf16.msra.mxu1 %v3828_v36 }
0x130d   :  { %3668 = vmatprep.subr.bf16.mxu1 %v4168_v0 }
0x130e   :  { %1878 = vrot.lane.b32.xlu0 %v1865_v10, %s4171_s17 }
0x1310   :  { %3669 = vmatpush3.bf16.msra.mxu1 %v3829_v37 }
0x1311   :  { %3686 = vmatprep.subr.bf16.mxu1 %v4168_v0 }
0x1378   :  { %v2107_v31 = vpop.permute.xlu0 %2106 }
0x1379   :  { %2109 = vst.msk [vmem:[#allocation2] sm:$0x3] %vm123_vm0, %v2107_v31 }
0x137a   :  { %v2118_v38 = vpop.permute.xlu1 %2117 }
0x137b   :  { %v2120_v39 = vsel %vm214_vm3, %v2107_v31, %v2118_v38 }
0x137c   :  { %v2121_v41 = vpack.c.bf16 %v2120_v39, %v2120_v39  ;;  %v1646_v42 = vpop.permute.xlu0 %1645 }
0x137d   :  { %1648 = vst.msk [vmem:[#allocation3 + $0x4] sm:$0x3] %vm123_vm0, %v1646_v42  ;;  %v3833_v42 = vld [vmem:[#allocation14 + $0x10] sm:$0xff]  }
0x137e   :  { %3671 = vmatmul.mubr.msk.bf16.vlgmr.msra.gmra.mxu1 %vm347_vm4, %v2121_v41  ;;  %v3832_v41 = vld [vmem:[#allocation14 + $0x18] sm:$0xff]  }
0x137f   :  { %3687 = vmatpush3.bf16.msra.mxu1 %v3830_v40  ;;  %3690 = vmatprep.mubr.msk.bf16.mxu1 %vm4169_vm1, %v4168_v0 }
0x1380   :  { %v1879_v44 = vpop.permute.xlu0 %1878  ;;  %3688 = vmatprep.subr.bf16.mxu1 %v4168_v0  ;;  %v2375_v45 = vld [vmem:[#allocation2] sm:$0x3]  ;;  %3675 = vmatpush3.bf16.msra.mxu0 %v3832_v41 }
0x1381   :  { %1881 = vst.msk [vmem:[#allocation3 + $0x2] sm:$0x3] %vm123_vm0, %v1879_v44  ;;  %v2376_v46 = vpack.c.bf16 %v2375_v45, %v2375_v45  ;;  %3676 = vmatprep.subr.bf16.mxu0 %v4168_v0  ;;  %v3834_v44 = vld [vmem:[#allocation14 + $0x8] sm:$0xff]  }
0x1383   :  { %3689 = vmatpush3.bf16.msra.mxu1 %v3831_v43 }
0x1384   :  { %3706 = vmatprep.subr.bf16.mxu1 %v4168_v0  ;;  %v1971_v63 = vld [vmem:[#allocation3 + $0x4] sm:$0x3]  ;;  %3677 = vmatpush3.bf16.msra.mxu0 %v3833_v42 }
0x1385   :  { %3678 = vmatprep.subr.bf16.mxu0 %v4168_v0 }
0x1386   :  { %3691 = vmatmul.mubr.msk.bf16.vlgmr.msra.gmra.mxu1 %vm214_vm3, %v2376_v46 }
0x1387   :  { %3714 = vmatprep.mubr.msk.bf16.mxu1 %vm4169_vm1, %v4168_v0 }
0x1388   :  { %v2204_v22 = vld [vmem:[#allocation3 + $0x2] sm:$0x3]  ;;  %3679 = vmatpush3.bf16.msra.mxu0 %v3834_v44 }
0x1389   :  { %3680 = vmatprep.subr.bf16.mxu0 %v4168_v0 }
0x13c3   :  { %v1965_v48 = vpop.f32.mrf.mxu1 }
0x13c4   :  { %v1966_v49 = vadd.f32 %v4654_v47, %v1965_v48 }
0x13c5   :  { %v3652_v50 = vpop.f32.mrf.mxu1 }
0x13c6   :  { %v3308_v51 = vmul.f32 -1.442695, %v1966_v49  ;;  %v3835_v50 = vld [vmem:[#allocation14] sm:$0xff]  }
0x13c7   :  { %v1968_v53 = vpop.f32.mrf.mxu1  ;;  %3681 = vmatpush3.bf16.msra.mxu0 %v3835_v50 }
0x13c8   :  { %3946 = vpow2.f32 %v3308_v51  ;;  %3694 = vmatprep.subr.bf16.mxu0 %v4168_v0 }
0x13c9   :  { %v3653_v55 = vpop.f32.mrf.mxu1 }
0x13d5   :  { %v3947_v56 = vpop.eup %3946 }
0x13d6   :  { %v1975_v58 = vadd.f32 1.0, %v3947_v56 }
0x13d8   :  { %3948 = vrcp.f32 %v1975_v58 }
0x13e5   :  { %v4657_v60 = vpop.eup %3948 }
0x13e6   :  { %v1978_v61 = vmul.f32 2.0, %v4657_v60 }
0x13e8   :  { %v3309_v62 = vadd.f32 -1.0, %v1978_v61 }
0x13ea   :  { %1986 = vrot.lane.b32.xlu1 %v3309_v62, %s4159_s16 }
0x13ee   :  { %1981 = vrot.lane.b32.xlu1 %v1971_v63, %s4170_s3  ;;  %v3836_v63 = vld [vmem:[#allocation12 + $0x18] sm:$0xff]  }
0x143e   :  { %v2198_v1 = vpop.f32.mrf.mxu1 }
0x143f   :  { %v2199_v54 = vadd.f32 %v4585_v57, %v2198_v1 }
0x1440   :  { %v3672_v2 = vpop.f32.mrf.mxu1 }
0x1441   :  { %v3321_v3 = vmul.f32 -1.442695, %v2199_v54 }
0x1442   :  { %v2201_v4 = vpop.f32.mrf.mxu1 }
0x1443   :  { %3950 = vpow2.f32 %v3321_v3  ;;  %v3837_v3 = vld [vmem:[#allocation12 + $0x10] sm:$0xff]  }
0x1444   :  { %v3673_v5 = vpop.f32.mrf.mxu1 }
0x1445   :  { %v3838_v5 = vld [vmem:[#allocation12 + $0x8] sm:$0xff]  }
0x1446   :  { %v2430_v6 = vpop.f32.mrf.mxu1 }
0x1447   :  { %v2436_v7 = vadd.f32 %v2430_v6, %v2374_v59  ;;  %v3839_v59 = vld [vmem:[#allocation12] sm:$0xff]  }
0x1448   :  { %v3692_v8 = vpop.f32.mrf.mxu1 }
0x1449   :  { %v3334_v9 = vmul.f32 -1.442695, %v2436_v7 }
0x144a   :  { %v2433_v10 = vpop.f32.mrf.mxu1 }
0x144b   :  { %3952 = vpow2.f32 %v3334_v9  ;;  %v3840_v9 = vld [vmem:[#allocation11 + $0x8] sm:$0xff]  }
0x144c   :  { %v3693_v11 = vpop.f32.mrf.mxu1 }
0x1450   :  { %v3951_v12 = vpop.eup %3950 }
0x1451   :  { %v2208_v13 = vadd.f32 1.0, %v3951_v12  ;;  %v3841_v12 = vld [vmem:[#allocation11] sm:$0xff]  }
0x1453   :  { %3954 = vrcp.f32 %v2208_v13 }
0x1458   :  { %v3953_v14 = vpop.eup %3952 }
0x1459   :  { %v2441_v15 = vadd.f32 1.0, %v3953_v14 }
0x145b   :  { %3956 = vrcp.f32 %v2441_v15 }
0x145c   :  { %v1987_v16 = vpop.permute.xlu1 %1986 }
0x145d   :  { %v1989_v17 = vmul.f32 %v4657_v60, %v1987_v16 }
0x145f   :  { %1991 = vrot.lane.b32.xlu0 %v1989_v17, %s4170_s3 }
0x1460   :  { %v3955_v18 = vpop.eup %3954  ;;  %v1982_v26 = vpop.permute.xlu1 %1981 }
0x1461   :  { %v2211_v19 = vmul.f32 2.0, %v3955_v18  ;;  %v1984_v27 = vmul.f32 %v4657_v60, %v1982_v26 }
0x1463   :  { %2111 = vrot.lane.b32.xlu0 %v4615_v20, %s4171_s17  ;;  %v3322_v52 = vadd.f32 -1.0, %v2211_v19 }
0x1465   :  { %2219 = vrot.lane.b32.xlu1 %v3322_v52, %s4159_s16 }
0x1468   :  { %v4668_v21 = vpop.eup %3956 }
0x1469   :  { %2214 = vrot.lane.b32.xlu1 %v2204_v22, %s4170_s3  ;;  %v2444_v23 = vmul.f32 2.0, %v4668_v21 }
0x146b   :  { %v3335_v24 = vadd.f32 -1.0, %v2444_v23 }
0x146d   :  { %2452 = vrot.lane.b32.xlu1 %v3335_v24, %s4159_s16 }
0x14d1   :  { %v1992_v28 = vpop.permute.xlu0 %1991 }
0x14d2   :  { %v4674_v29 = vadd.f32 %v1992_v28, %v1984_v27 }
0x14d4   :  { %3958 = vtanh.f32 %v4674_v29 }
0x14d5   :  { %v2112_v20 = vpop.permute.xlu0 %2111 }
0x14d6   :  { %2114 = vst.msk [vmem:[#allocation3] sm:$0x3] %vm123_vm0, %v2112_v20 }
0x14d7   :  { %v2220_v30 = vpop.permute.xlu1 %2219 }
0x14d8   :  { %v2222_v32 = vmul.f32 %v3955_v18, %v2220_v30 }
0x14da   :  { %2224 = vrot.lane.b32.xlu0 %v2222_v32, %s4170_s3 }
0x14db   :  { %v2215_v33 = vpop.permute.xlu1 %2214 }
0x14dc   :  { %v2217_v37 = vmul.f32 %v3955_v18, %v2215_v33 }
0x14dd   :  { %v2437_v34 = vld [vmem:[#allocation3] sm:$0x3] }
0x14de   :  { %2447 = vrot.lane.b32.xlu1 %v2437_v34, %s4170_s3 }
0x14df   :  { %v2453_v35 = vpop.permute.xlu1 %2452 }
0x14e0   :  { %v2455_v36 = vmul.f32 %v4668_v21, %v2453_v35 }
0x14e1   :  { %v3959_v25 = vpop.eup %3958 }
0x14e2   :  { %1997 = vrot.lane.b32.xlu0 %v3959_v25, %s4159_s16  ;;  %v2736_v25 = vld [vmem:[#allocation4 + $0xe] sm:$0x3] }
0x14e6   :  { %2457 = vrot.lane.b32.xlu0 %v2455_v36, %s4170_s3 }
0x154c   :  { %v2225_v31 = vpop.permute.xlu0 %2224 }
0x154d   :  { %v2227_v38 = vadd.f32 %v2225_v31, %v2217_v37 }
0x154f   :  { %3960 = vtanh.f32 %v2227_v38 }
0x1550   :  { %v2448_v45 = vpop.permute.xlu1 %2447 }
0x1551   :  { %v2450_v48 = vmul.f32 %v4668_v21, %v2448_v45 }
0x1554   :  { %v1998_v39 = vpop.permute.xlu0 %1997 }
0x1555   :  { %v2000_v40 = vmul.f32 %v4657_v60, %v1998_v39 }
0x1557   :  { %2002 = vrot.lane.b32.xlu1 %v2000_v40, %s4170_s3 }
0x1558   :  { %v2458_v46 = vpop.permute.xlu0 %2457 }
0x1559   :  { %v4690_v49 = vadd.f32 %v2458_v46, %v2450_v48 }
0x155b   :  { %3962 = vtanh.f32 %v4690_v49 }
0x155c   :  { %v3961_v43 = vpop.eup %3960 }
0x155d   :  { %2230 = vrot.lane.b32.xlu0 %v3961_v43, %s4159_s16 }
0x1568   :  { %v3963_v58 = vpop.eup %3962 }
0x15c9   :  { %v2003_v51 = vpop.permute.xlu1 %2002 }
0x15ca   :  { %2005 = vst.msk [vmem:[#allocation2 + $0x4] sm:$0x3] %vm123_vm0, %v2003_v51  ;;  %2011 = vst.msk [vmem:[#allocation5 + $0x8] sm:$0x3] %vm123_vm0, %v2003_v51 }
0x15cf   :  { %v2231_v53 = vpop.permute.xlu0 %2230 }
0x15d0   :  { %v2233_v55 = vmul.f32 %v3955_v18, %v2231_v53 }
0x15d1   :  { %v2244_v56 = vld [vmem:[#allocation2 + $0x4] sm:$0x3] }
0x15d2   :  { %2235 = vrot.lane.b32.xlu1 %v2233_v55, %s4170_s3  ;;  %2246 = vrot.lane.b32.xlu0 %v2244_v56, %s4170_s3 }
0x15d6   :  { %2463 = vrot.lane.b32.xlu1 %v3963_v58, %s4159_s16 }
0x1644   :  { %v2247_v60 = vpop.permute.xlu0 %2246  ;;  %v2236_v61 = vpop.permute.xlu1 %2235 }
0x1645   :  { %2238 = vst.msk [vmem:[#allocation2 + $0x2] sm:$0x3] %vm123_vm0, %v2236_v61  ;;  %v2249_v62 = vsel %vm214_vm3, %v2236_v61, %v2247_v60 }
0x1646   :  { %v2250_v1 = vpack.c.bf16 %v2249_v62, %v2249_v62 }
0x1648   :  { %3683 = vmatmul.mubr.msk.bf16.vlgmr.msra.gmra.mxu0 %vm347_vm4, %v2250_v1  ;;  %v2464_v54 = vpop.permute.xlu1 %2463 }
0x1649   :  { %v2466_v2 = vmul.f32 %v4668_v21, %v2464_v54  ;;  %3695 = vmatpush3.bf16.msra.mxu0 %v3836_v63  ;;  %3702 = vmatprep.mubr.msk.bf16.mxu0 %vm4169_vm1, %v4168_v0 }
0x164a   :  { %3696 = vmatprep.subr.bf16.mxu0 %v4168_v0 }
0x164b   :  { %2468 = vrot.lane.b32.xlu0 %v2466_v2, %s4170_s3 }
0x164c   :  { %v2477_v4 = vld [vmem:[#allocation2 + $0x2] sm:$0x3] }
0x164d   :  { %2479 = vrot.lane.b32.xlu1 %v2477_v4, %s4170_s3  ;;  %3697 = vmatpush3.bf16.msra.mxu0 %v3837_v3 }
0x164e   :  { %3698 = vmatprep.subr.bf16.mxu0 %v4168_v0 }
0x164f   :  { %2007 = vrot.lane.b32.xlu0 %v4674_v29, %s4171_s17 }
0x1651   :  { %3699 = vmatpush3.bf16.msra.mxu0 %v3838_v5 }
0x1652   :  { %3700 = vmatprep.subr.bf16.mxu0 %v4168_v0 }
0x1653   :  { %2240 = vrot.lane.b32.xlu0 %v2227_v38, %s4171_s17 }
0x1655   :  { %3701 = vmatpush3.bf16.msra.mxu0 %v3839_v59 }
0x1656   :  { %3718 = vmatprep.subr.bf16.mxu0 %v4168_v0 }
0x16bd   :  { %v2469_v6 = vpop.permute.xlu0 %2468 }
0x16be   :  { %2471 = vst.msk [vmem:[#allocation2] sm:$0x3] %vm123_vm0, %v2469_v6 }
0x16bf   :  { %v2480_v7 = vpop.permute.xlu1 %2479 }
0x16c0   :  { %v2482_v8 = vsel %vm214_vm3, %v2469_v6, %v2480_v7 }
0x16c1   :  { %v2483_v10 = vpack.c.bf16 %v2482_v8, %v2482_v8  ;;  %v2008_v11 = vpop.permute.xlu0 %2007 }
0x16c2   :  { %2010 = vst.msk [vmem:[#allocation3 + $0x4] sm:$0x3] %vm123_vm0, %v2008_v11  ;;  %v3843_v11 = vld [vmem:[#allocation14 + $0x10] sm:$0xff]  }
0x16c3   :  { %3703 = vmatmul.mubr.msk.bf16.vlgmr.msra.gmra.mxu0 %vm347_vm4, %v2483_v10  ;;  %v3842_v10 = vld [vmem:[#allocation14 + $0x18] sm:$0xff]  }
0x16c4   :  { %3719 = vmatpush3.bf16.msra.mxu0 %v3840_v9  ;;  %3722 = vmatprep.mubr.msk.bf16.mxu0 %vm4169_vm1, %v4168_v0 }
0x16c5   :  { %v2241_v13 = vpop.permute.xlu0 %2240  ;;  %3720 = vmatprep.subr.bf16.mxu0 %v4168_v0  ;;  %v2737_v14 = vld [vmem:[#allocation2] sm:$0x3]  ;;  %3707 = vmatpush3.bf16.msra.mxu1 %v3842_v10 }
0x16c6   :  { %2243 = vst.msk [vmem:[#allocation3 + $0x2] sm:$0x3] %vm123_vm0, %v2241_v13  ;;  %v2738_v15 = vpack.c.bf16 %v2737_v14, %v2737_v14  ;;  %3708 = vmatprep.subr.bf16.mxu1 %v4168_v0  ;;  %v3844_v13 = vld [vmem:[#allocation14 + $0x8] sm:$0xff]  }
0x16c8   :  { %3721 = vmatpush3.bf16.msra.mxu0 %v3841_v12 }
0x16c9   :  { %3738 = vmatprep.subr.bf16.mxu0 %v4168_v0  ;;  %v2333_v28 = vld [vmem:[#allocation3 + $0x4] sm:$0x3]  ;;  %3709 = vmatpush3.bf16.msra.mxu1 %v3843_v11 }
0x16ca   :  { %3710 = vmatprep.subr.bf16.mxu1 %v4168_v0 }
0x16cb   :  { %3723 = vmatmul.mubr.msk.bf16.vlgmr.msra.gmra.mxu0 %vm214_vm3, %v2738_v15 }
0x16cc   :  { %3746 = vmatprep.mubr.msk.bf16.mxu0 %vm4169_vm1, %v4168_v0 }
0x16cd   :  { %v2566_v53 = vld [vmem:[#allocation3 + $0x2] sm:$0x3]  ;;  %3711 = vmatpush3.bf16.msra.mxu1 %v3844_v13 }
0x16ce   :  { %3712 = vmatprep.subr.bf16.mxu1 %v4168_v0 }
0x1708   :  { %v2327_v16 = vpop.f32.mrf.mxu0 }
0x1709   :  { %v2328_v17 = vadd.f32 %v4654_v47, %v2327_v16 }
0x170a   :  { %v3684_v18 = vpop.f32.mrf.mxu0 }
0x170b   :  { %v3329_v19 = vmul.f32 -1.442695, %v2328_v17  ;;  %v3845_v18 = vld [vmem:[#allocation14] sm:$0xff]  }
0x170c   :  { %v2330_v52 = vpop.f32.mrf.mxu0  ;;  %3713 = vmatpush3.bf16.msra.mxu1 %v3845_v18 }
0x170d   :  { %3964 = vpow2.f32 %v3329_v19  ;;  %3726 = vmatprep.subr.bf16.mxu1 %v4168_v0 }
0x170e   :  { %v3685_v21 = vpop.f32.mrf.mxu0 }
0x171a   :  { %v3965_v22 = vpop.eup %3964 }
0x171b   :  { %v2337_v23 = vadd.f32 1.0, %v3965_v22 }
0x171d   :  { %3966 = vrcp.f32 %v2337_v23 }
0x172a   :  { %v4727_v24 = vpop.eup %3966 }
0x172b   :  { %v2340_v26 = vmul.f32 2.0, %v4727_v24 }
0x172d   :  { %v3330_v27 = vadd.f32 -1.0, %v2340_v26 }
0x172f   :  { %2348 = vrot.lane.b32.xlu1 %v3330_v27, %s4159_s16 }
0x1733   :  { %2343 = vrot.lane.b32.xlu1 %v2333_v28, %s4170_s3  ;;  %v3846_v28 = vld [vmem:[#allocation12 + $0x18] sm:$0xff]  }
0x1783   :  { %v2560_v29 = vpop.f32.mrf.mxu0 }
0x1784   :  { %v2561_v20 = vadd.f32 %v4585_v57, %v2560_v29 }
0x1785   :  { %v3704_v30 = vpop.f32.mrf.mxu0 }
0x1786   :  { %v3342_v32 = vmul.f32 -1.442695, %v2561_v20 }
0x1787   :  { %v2563_v33 = vpop.f32.mrf.mxu0 }
0x1788   :  { %3968 = vpow2.f32 %v3342_v32  ;;  %v3847_v32 = vld [vmem:[#allocation12 + $0x10] sm:$0xff]  }
0x1789   :  { %v3705_v34 = vpop.f32.mrf.mxu0 }
0x178a   :  { %v3848_v34 = vld [vmem:[#allocation12 + $0x8] sm:$0xff]  }
0x178b   :  { %v2792_v35 = vpop.f32.mrf.mxu0 }
0x178c   :  { %v2798_v36 = vadd.f32 %v2792_v35, %v2736_v25  ;;  %v3849_v25 = vld [vmem:[#allocation12] sm:$0xff]  }
0x178d   :  { %v3724_v37 = vpop.f32.mrf.mxu0 }
0x178e   :  { %v3355_v31 = vmul.f32 -1.442695, %v2798_v36 }
0x178f   :  { %v2795_v38 = vpop.f32.mrf.mxu0 }
0x1790   :  { %3970 = vpow2.f32 %v3355_v31 }
0x1791   :  { %v3725_v39 = vpop.f32.mrf.mxu0 }
0x1795   :  { %v3969_v40 = vpop.eup %3968 }
0x1796   :  { %v2570_v41 = vadd.f32 1.0, %v3969_v40 }
0x1798   :  { %3972 = vrcp.f32 %v2570_v41 }
0x179d   :  { %v3971_v42 = vpop.eup %3970 }
0x179e   :  { %v2803_v43 = vadd.f32 1.0, %v3971_v42 }
0x17a0   :  { %3974 = vrcp.f32 %v2803_v43 }
0x17a1   :  { %v2349_v44 = vpop.permute.xlu1 %2348 }
0x17a2   :  { %v2351_v45 = vmul.f32 %v4727_v24, %v2349_v44 }
0x17a4   :  { %2353 = vrot.lane.b32.xlu0 %v2351_v45, %s4170_s3 }
0x17a5   :  { %v3973_v46 = vpop.eup %3972  ;;  %v2344_v58 = vpop.permute.xlu1 %2343 }
0x17a6   :  { %v2573_v48 = vmul.f32 2.0, %v3973_v46  ;;  %v2346_v60 = vmul.f32 %v4727_v24, %v2344_v58 }
0x17a8   :  { %2473 = vrot.lane.b32.xlu0 %v4690_v49, %s4171_s17  ;;  %v3343_v50 = vadd.f32 -1.0, %v2573_v48 }
0x17aa   :  { %2581 = vrot.lane.b32.xlu1 %v3343_v50, %s4159_s16 }
0x17ad   :  { %v4738_v51 = vpop.eup %3974 }
0x17ae   :  { %2576 = vrot.lane.b32.xlu1 %v2566_v53, %s4170_s3  ;;  %v2806_v55 = vmul.f32 2.0, %v4738_v51 }
0x17b0   :  { %v3356_v56 = vadd.f32 -1.0, %v2806_v55 }
0x17b2   :  { %2814 = vrot.lane.b32.xlu1 %v3356_v56, %s4159_s16 }
0x1816   :  { %v2354_v61 = vpop.permute.xlu0 %2353 }
0x1817   :  { %v4744_v62 = vadd.f32 %v2354_v61, %v2346_v60 }
0x1819   :  { %3976 = vtanh.f32 %v4744_v62 }
0x181a   :  { %v2474_v49 = vpop.permute.xlu0 %2473 }
0x181b   :  { %2476 = vst.msk [vmem:[#allocation3] sm:$0x3] %vm123_vm0, %v2474_v49 }
0x181c   :  { %v2582_v63 = vpop.permute.xlu1 %2581 }
0x181d   :  { %v2584_v1 = vmul.f32 %v3973_v46, %v2582_v63 }
0x181f   :  { %2586 = vrot.lane.b32.xlu0 %v2584_v1, %s4170_s3 }
0x1820   :  { %v2577_v54 = vpop.permute.xlu1 %2576 }
0x1821   :  { %v2579_v59 = vmul.f32 %v3973_v46, %v2577_v54 }
0x1822   :  { %v2799_v2 = vld [vmem:[#allocation3] sm:$0x3] }
0x1823   :  { %2809 = vrot.lane.b32.xlu1 %v2799_v2, %s4170_s3 }
0x1824   :  { %v2815_v4 = vpop.permute.xlu1 %2814 }
0x1825   :  { %v2817_v5 = vmul.f32 %v4738_v51, %v2815_v4 }
0x1826   :  { %v3977_v3 = vpop.eup %3976 }
0x1827   :  { %2359 = vrot.lane.b32.xlu0 %v3977_v3, %s4159_s16 }
0x182b   :  { %2819 = vrot.lane.b32.xlu0 %v2817_v5, %s4170_s3 }
0x1891   :  { %v2587_v6 = vpop.permute.xlu0 %2586 }
0x1892   :  { %v2589_v7 = vadd.f32 %v2587_v6, %v2579_v59 }
0x1894   :  { %3978 = vtanh.f32 %v2589_v7 }
0x1895   :  { %v2810_v14 = vpop.permute.xlu1 %2809 }
0x1896   :  { %v2812_v16 = vmul.f32 %v4738_v51, %v2810_v14 }
0x1899   :  { %v2360_v8 = vpop.permute.xlu0 %2359 }
0x189a   :  { %v2362_v9 = vmul.f32 %v4727_v24, %v2360_v8 }
0x189c   :  { %2364 = vrot.lane.b32.xlu1 %v2362_v9, %s4170_s3 }
0x189d   :  { %v2820_v15 = vpop.permute.xlu0 %2819 }
0x189e   :  { %v4760_v17 = vadd.f32 %v2820_v15, %v2812_v16 }
0x18a0   :  { %3980 = vtanh.f32 %v4760_v17 }
0x18a1   :  { %v3979_v12 = vpop.eup %3978 }
0x18a2   :  { %2592 = vrot.lane.b32.xlu0 %v3979_v12, %s4159_s16 }
0x18ad   :  { %v3981_v23 = vpop.eup %3980 }
0x190e   :  { %v2365_v19 = vpop.permute.xlu1 %2364 }
0x190f   :  { %2367 = vst.msk [vmem:[#allocation2 + $0x4] sm:$0x3] %vm123_vm0, %v2365_v19  ;;  %2373 = vst.msk [vmem:[#allocation5 + $0xa] sm:$0x3] %vm123_vm0, %v2365_v19  ;;  %v3850_v19 = vld [vmem:[#allocation14 + $0x18] sm:$0xff]  }
0x1910   :  { %3739 = vmatpush3.bf16.msra.mxu0 %v3850_v19 }
0x1911   :  { %3740 = vmatprep.subr.bf16.mxu0 %v4168_v0 }
0x1914   :  { %v2593_v52 = vpop.permute.xlu0 %2592 }
0x1915   :  { %v2595_v21 = vmul.f32 %v3973_v46, %v2593_v52  ;;  %v3851_v52 = vld [vmem:[#allocation14 + $0x10] sm:$0xff]  }
0x1916   :  { %v2606_v22 = vld [vmem:[#allocation2 + $0x4] sm:$0x3]  ;;  %3741 = vmatpush3.bf16.msra.mxu0 %v3851_v52 }
0x1917   :  { %2597 = vrot.lane.b32.xlu1 %v2595_v21, %s4170_s3  ;;  %2608 = vrot.lane.b32.xlu0 %v2606_v22, %s4170_s3  ;;  %v3852_v22 = vld [vmem:[#allocation14 + $0x8] sm:$0xff]  }
0x1918   :  { %3742 = vmatprep.subr.bf16.mxu0 %v4168_v0 }
0x191a   :  { %3743 = vmatpush3.bf16.msra.mxu0 %v3852_v22 }
0x191b   :  { %2825 = vrot.lane.b32.xlu1 %v3981_v23, %s4159_s16  ;;  %3744 = vmatprep.subr.bf16.mxu0 %v4168_v0  ;;  %v3853_v23 = vld [vmem:[#allocation14] sm:$0xff]  }
0x191e   :  { %3745 = vmatpush3.bf16.msra.mxu0 %v3853_v23 }
0x1989   :  { %v2609_v24 = vpop.permute.xlu0 %2608  ;;  %v2598_v26 = vpop.permute.xlu1 %2597 }
0x198a   :  { %2600 = vst.msk [vmem:[#allocation2 + $0x2] sm:$0x3] %vm123_vm0, %v2598_v26  ;;  %v2611_v27 = vsel %vm214_vm3, %v2598_v26, %v2609_v24 }
0x198b   :  { %v2612_v29 = vpack.c.bf16 %v2611_v27, %v2611_v27 }
0x198d   :  { %3715 = vmatmul.mubr.msk.bf16.vlgmr.msra.gmra.mxu1 %vm347_vm4, %v2612_v29  ;;  %v2826_v20 = vpop.permute.xlu1 %2825 }
0x198e   :  { %v2828_v30 = vmul.f32 %v4738_v51, %v2826_v20  ;;  %3727 = vmatpush3.bf16.msra.mxu1 %v3846_v28  ;;  %3734 = vmatprep.mubr.msk.bf16.mxu1 %vm4169_vm1, %v4168_v0 }
0x198f   :  { %3728 = vmatprep.subr.bf16.mxu1 %v4168_v0 }
0x1990   :  { %2830 = vrot.lane.b32.xlu0 %v2828_v30, %s4170_s3 }
0x1991   :  { %v2839_v33 = vld [vmem:[#allocation2 + $0x2] sm:$0x3] }
0x1992   :  { %2841 = vrot.lane.b32.xlu1 %v2839_v33, %s4170_s3  ;;  %3729 = vmatpush3.bf16.msra.mxu1 %v3847_v32 }
0x1993   :  { %3730 = vmatprep.subr.bf16.mxu1 %v4168_v0 }
0x1994   :  { %2369 = vrot.lane.b32.xlu0 %v4744_v62, %s4171_s17 }
0x1996   :  { %3731 = vmatpush3.bf16.msra.mxu1 %v3848_v34 }
0x1997   :  { %3732 = vmatprep.subr.bf16.mxu1 %v4168_v0 }
0x1998   :  { %2602 = vrot.lane.b32.xlu0 %v2589_v7, %s4171_s17 }
0x199a   :  { %3733 = vmatpush3.bf16.msra.mxu1 %v3849_v25 }
0x199b   :  { %3750 = vmatprep.subr.bf16.mxu1 %v4168_v0 }
0x1a02   :  { %v2831_v35 = vpop.permute.xlu0 %2830 }
0x1a03   :  { %2833 = vst.msk [vmem:[#allocation2] sm:$0x3] %vm123_vm0, %v2831_v35 }
0x1a04   :  { %v2842_v36 = vpop.permute.xlu1 %2841 }
0x1a05   :  { %v2844_v37 = vsel %vm214_vm3, %v2831_v35, %v2842_v36 }
0x1a06   :  { %v2845_v31 = vpack.c.bf16 %v2844_v37, %v2844_v37  ;;  %v2370_v38 = vpop.permute.xlu0 %2369 }
0x1a07   :  { %2372 = vst.msk [vmem:[#allocation3 + $0x4] sm:$0x3] %vm123_vm0, %v2370_v38 }
0x1a08   :  { %3735 = vmatmul.mubr.msk.bf16.vlgmr.msra.gmra.mxu1 %vm347_vm4, %v2845_v31 }
0x1a09   :  { %3754 = vmatprep.mubr.msk.bf16.mxu1 %vm4169_vm1, %v4168_v0 }
0x1a0a   :  { %v2603_v39 = vpop.permute.xlu0 %2602 }
0x1a0b   :  { %2605 = vst.msk [vmem:[#allocation3 + $0x2] sm:$0x3] %vm123_vm0, %v2603_v39 }
0x1a0e   :  { %v2695_v55 = vld [vmem:[#allocation3 + $0x4] sm:$0x3] }
0x1a12   :  { %v2928_v5 = vld [vmem:[#allocation3 + $0x2] sm:$0x3] }
0x1a4d   :  { %v2689_v40 = vpop.f32.mrf.mxu1 }
0x1a4e   :  { %v2690_v41 = vadd.f32 %v4654_v47, %v2689_v40 }
0x1a4f   :  { %v3716_v42 = vpop.f32.mrf.mxu1 }
0x1a50   :  { %v3350_v43 = vmul.f32 -1.442695, %v2690_v41 }
0x1a51   :  { %v2692_v44 = vpop.f32.mrf.mxu1 }
0x1a52   :  { %3982 = vpow2.f32 %v3350_v43 }
0x1a53   :  { %v3717_v45 = vpop.f32.mrf.mxu1 }
0x1a5f   :  { %v3983_v46 = vpop.eup %3982 }
0x1a60   :  { %v2699_v48 = vadd.f32 1.0, %v3983_v46 }
0x1a62   :  { %3984 = vrcp.f32 %v2699_v48 }
0x1a6f   :  { %v3985_v50 = vpop.eup %3984 }
0x1a70   :  { %v2702_v51 = vmul.f32 2.0, %v3985_v50 }
0x1a72   :  { %v3351_v53 = vadd.f32 -1.0, %v2702_v51 }
0x1a74   :  { %2710 = vrot.lane.b32.xlu1 %v3351_v53, %s4159_s16  ;;  %v3854_v53 = vld [vmem:[#allocation15 + $0x8] sm:$0xff]  }
0x1a75   :  { %3751 = vmatpush3.bf16.msra.mxu1 %v3854_v53 }
0x1a76   :  { %3752 = vmatprep.subr.bf16.mxu1 %v4168_v0 }
0x1a78   :  { %2705 = vrot.lane.b32.xlu1 %v2695_v55, %s4170_s3  ;;  %v3855_v55 = vld [vmem:[#allocation15] sm:$0xff]  }
0x1a79   :  { %3753 = vmatpush3.bf16.msra.mxu1 %v3855_v55 }
0x1ac8   :  { %v2922_v56 = vpop.f32.mrf.mxu1 }
0x1ac9   :  { %v2923_v58 = vadd.f32 %v4585_v57, %v2922_v56 }
0x1aca   :  { %v3736_v60 = vpop.f32.mrf.mxu1 }
0x1acb   :  { %v3363_v61 = vmul.f32 -1.442695, %v2923_v58 }
0x1acc   :  { %v2925_v62 = vpop.f32.mrf.mxu1 }
0x1acd   :  { %3986 = vpow2.f32 %v3363_v61  ;;  %v3098_v62 = vld [vmem:[#allocation5] sm:$0xff] }
0x1ace   :  { %v3737_v49 = vpop.f32.mrf.mxu1 }
0x1ada   :  { %v3987_v63 = vpop.eup %3986 }
0x1adb   :  { %v2932_v1 = vadd.f32 1.0, %v3987_v63 }
0x1add   :  { %3988 = vrcp.f32 %v2932_v1  ;;  %v3373_v1 = vld [vmem:[%s4853_s9] ss:$0 sm:$0xff]  ;;  %s4128_s9 = scalar_lea.vmem %s3188_s13, 256 }
0x1ade   :  { %p4129_p2 = scmp.ne.s32.totalorder %s3188_s13, %s4128_s9  ;;  %p4134_p4 = scmp.lt.s32.totalorder %s4128_s9, %s4128_s9 }
0x1ae0   :  { %p4135_p5 = por %p4134_p4, %p4133_p3 }
0x1ae2   :  { %p4136_p6 = pnand %p4135_p5, %p4129_p2 }
0x1ae6   :  { %v2711_v54 = vpop.permute.xlu1 %2710 }
0x1ae7   :  { %v2713_v2 = vmul.f32 %v3985_v50, %v2711_v54 }
0x1ae9   :  { %2715 = vrot.lane.b32.xlu0 %v2713_v2, %s4170_s3 }
0x1aea   :  { %v3989_v3 = vpop.eup %3988  ;;  %v2706_v57 = vpop.permute.xlu1 %2705 }
0x1aeb   :  { %v2935_v4 = vmul.f32 2.0, %v3989_v3  ;;  %v2708_v6 = vmul.f32 %v3985_v50, %v2706_v57 }
0x1aed   :  { %2938 = vrot.lane.b32.xlu0 %v2928_v5, %s4170_s3  ;;  %v3364_v59 = vadd.f32 -1.0, %v2935_v4 }
0x1aef   :  { %2943 = vrot.lane.b32.xlu1 %v3364_v59, %s4159_s16 }
0x1b5b   :  { %v2716_v7 = vpop.permute.xlu0 %2715 }
0x1b5c   :  { %v2718_v8 = vadd.f32 %v2716_v7, %v2708_v6 }
0x1b5e   :  { %3990 = vtanh.f32 %v2718_v8 }
0x1b5f   :  { %v2939_v12 = vpop.permute.xlu0 %2938 }
0x1b60   :  { %v2941_v13 = vmul.f32 %v3989_v3, %v2939_v12 }
0x1b61   :  { %v2944_v9 = vpop.permute.xlu1 %2943 }
0x1b62   :  { %v2946_v10 = vmul.f32 %v3989_v3, %v2944_v9 }
0x1b64   :  { %2948 = vrot.lane.b32.xlu1 %v2946_v10, %s4170_s3 }
0x1b6b   :  { %v3991_v11 = vpop.eup %3990 }
0x1b6c   :  { %2721 = vrot.lane.b32.xlu0 %v3991_v11, %s4159_s16 }
0x1bd6   :  { %v2949_v14 = vpop.permute.xlu1 %2948 }
0x1bd7   :  { %v4800_v15 = vadd.f32 %v2949_v14, %v2941_v13 }
0x1bd9   :  { %3992 = vtanh.f32 %v4800_v15 }
0x1bde   :  { %v2722_v16 = vpop.permute.xlu0 %2721 }
0x1bdf   :  { %v2724_v18 = vmul.f32 %v3985_v50, %v2722_v16 }
0x1be1   :  { %2726 = vrot.lane.b32.xlu1 %v2724_v18, %s4170_s3 }
0x1be6   :  { %v3993_v21 = vpop.eup %3992 }
0x1be7   :  { %2954 = vrot.lane.b32.xlu0 %v3993_v21, %s4159_s16 }
0x1c53   :  { %v2727_v24 = vpop.permute.xlu1 %2726 }
0x1c54   :  { %2729 = vst.msk [vmem:[#allocation2 + $0x4] sm:$0x3] %vm123_vm0, %v2727_v24  ;;  %2735 = vst.msk [vmem:[#allocation5 + $0xc] sm:$0x3] %vm123_vm0, %v2727_v24 }
0x1c59   :  { %v2955_v26 = vpop.permute.xlu0 %2954 }
0x1c5a   :  { %v2957_v27 = vmul.f32 %v3989_v3, %v2955_v26 }
0x1c5b   :  { %v2968_v28 = vld [vmem:[#allocation2 + $0x4] sm:$0x3] }
0x1c5c   :  { %2959 = vrot.lane.b32.xlu1 %v2957_v27, %s4170_s3  ;;  %2970 = vrot.lane.b32.xlu0 %v2968_v28, %s4170_s3 }
0x1c60   :  { %2731 = vrot.lane.b32.xlu1 %v2718_v8, %s4171_s17 }
0x1cce   :  { %v2971_v29 = vpop.permute.xlu0 %2970  ;;  %v2960_v20 = vpop.permute.xlu1 %2959 }
0x1ccf   :  { %2962 = vst.msk [vmem:[#allocation2 + $0x2] sm:$0x3] %vm123_vm0, %v2960_v20  ;;  %v2973_v30 = vsel %vm214_vm3, %v2960_v20, %v2971_v29 }
0x1cd0   :  { %v2974_v32 = vpack.c.bf16 %v2973_v30, %v2973_v30 }
0x1cd2   :  { %3747 = vmatmul.mubr.msk.bf16.vlgmr.msra.gmra.mxu0 %vm347_vm4, %v2974_v32  ;;  %v2732_v33 = vpop.permute.xlu1 %2731 }
0x1cd3   :  { %2734 = vst.msk [vmem:[#allocation3 + $0x4] sm:$0x3] %vm123_vm0, %v2732_v33 }
0x1cda   :  { %v3057_v34 = vld [vmem:[#allocation3 + $0x4] sm:$0x3] }
0x1cdb   :  { %3067 = vrot.lane.b32.xlu1 %v3057_v34, %s4170_s3 }
0x1d4d   :  { %v3068_v46 = vpop.permute.xlu1 %3067 }
0x1d92   :  { %v3051_v25 = vpop.f32.mrf.mxu0 }
0x1d93   :  { %v3052_v35 = vadd.f32 %v4654_v47, %v3051_v25 }
0x1d94   :  { %v3748_v36 = vpop.f32.mrf.mxu0 }
0x1d95   :  { %v3371_v37 = vmul.f32 -1.442695, %v3052_v35 }
0x1d96   :  { %v3054_v31 = vpop.f32.mrf.mxu0 }
0x1d97   :  { %3994 = vpow2.f32 %v3371_v37 }
0x1d98   :  { %v3749_v38 = vpop.f32.mrf.mxu0 }
0x1da4   :  { %v3995_v39 = vpop.eup %3994 }
0x1da5   :  { %v3061_v40 = vadd.f32 1.0, %v3995_v39 }
0x1da7   :  { %3996 = vrcp.f32 %v3061_v40 }
0x1db4   :  { %v3997_v41 = vpop.eup %3996 }
0x1db5   :  { %v3064_v42 = vmul.f32 2.0, %v3997_v41  ;;  %v3070_v48 = vmul.f32 %v3997_v41, %v3068_v46 }
0x1db7   :  { %v3372_v43 = vadd.f32 -1.0, %v3064_v42 }
0x1db9   :  { %3072 = vrot.lane.b32.xlu0 %v3372_v43, %s4159_s16 }
0x1e2b   :  { %v3073_v44 = vpop.permute.xlu0 %3072 }
0x1e2c   :  { %v3075_v45 = vmul.f32 %v3997_v41, %v3073_v44 }
0x1e2e   :  { %3077 = vrot.lane.b32.xlu0 %v3075_v45, %s4170_s3 }
0x1ea0   :  { %v3078_v47 = vpop.permute.xlu0 %3077 }
0x1ea1   :  { %v3080_v50 = vadd.f32 %v3078_v47, %v3070_v48 }
0x1ea3   :  { %3998 = vtanh.f32 %v3080_v50 }
0x1eb0   :  { %v3999_v51 = vpop.eup %3998 }
0x1eb1   :  { %3083 = vrot.lane.b32.xlu1 %v3999_v51, %s4159_s16 }
0x1eb5   :  { %2835 = vrot.lane.b32.xlu1 %v4760_v17, %s4171_s17 }
0x1eb9   :  { %3093 = vrot.lane.b32.xlu1 %v3080_v50, %s4171_s17 }
0x1f23   :  { %v3084_v56 = vpop.permute.xlu1 %3083 }
0x1f24   :  { %v3086_v58 = vmul.f32 %v3997_v41, %v3084_v56 }
0x1f26   :  { %3088 = vrot.lane.b32.xlu0 %v3086_v58, %s4170_s3 }
0x1f27   :  { %v2836_v60 = vpop.permute.xlu1 %2835 }
0x1f28   :  { %2838 = vst.msk [vmem:[#allocation3] sm:$0x3] %vm123_vm0, %v2836_v60 }
0x1f2a   :  { %2964 = vrot.lane.b32.xlu0 %v4800_v15, %s4171_s17 }
0x1f2b   :  { %v3094_v61 = vpop.permute.xlu1 %3093 }
0x1f2c   :  { %3096 = vst.msk [vmem:[#allocation3 + $0x4] sm:$0x3] %vm123_vm0, %v3094_v61 }
0x1f98   :  { %v3089_v17 = vpop.permute.xlu0 %3088 }
0x1f99   :  { %3091 = vst.msk [vmem:[#allocation2 + $0x4] sm:$0x3] %vm123_vm0, %v3089_v17  ;;  %3097 = vst.msk [vmem:[#allocation5 + $0xe] sm:$0x3] %vm123_vm0, %v3089_v17 }
0x1f9c   :  { %v2965_v0 = vpop.permute.xlu0 %2964 }
0x1f9d   :  { %2967 = vst.msk [vmem:[#allocation3 + $0x2] sm:$0x3] %vm123_vm0, %v2965_v0 }
0x1fa0   :  { %v3099_v49 = vld [vmem:[#allocation5 + $0x8] sm:$0xff] }
0x1fa1   :  { %v3100_v63 = vpack.c.bf16 %v3099_v49, %v3098_v62 }
0x1fa3   :  { %3755 = vmatmul.mubr.msk.bf16.vlgmr.msra.gmra.mxu1 %vm214_vm3, %v3100_v63 }
0x2063   :  { %v3161_v54 = vpop.f32.mrf.mxu1 }
0x2064   :  { %v3162_v2 = vadd.f32 %v3373_v1, %v3161_v54 }
0x2065   :  { %v3756_v3 = vpop.f32.mrf.mxu1 }
0x2066   :  { %v3377_v4 = vmul.f32 -1.442695, %v3162_v2 }
0x2067   :  { %v3164_v5 = vpop.f32.mrf.mxu1 }
0x2068   :  { %4000 = vpow2.f32 %v3377_v4  ;;  %v3165_v59 = vadd.f32 %v3373_v1, %v3164_v5 }
0x2069   :  { %v3757_v57 = vpop.f32.mrf.mxu1 }
0x206a   :  { %v3378_v6 = vmul.f32 -1.442695, %v3165_v59 }
0x206c   :  { %4002 = vpow2.f32 %v3378_v6 }
0x2075   :  { %v4001_v7 = vpop.eup %4000 }
0x2076   :  { %v3174_v8 = vadd.f32 1.0, %v4001_v7 }
0x2078   :  { %4004 = vrcp.f32 %v3174_v8 }
0x2079   :  { %v4003_v9 = vpop.eup %4002 }
0x207a   :  { %v3175_v10 = vadd.f32 1.0, %v4003_v9 }
0x207c   :  { %4006 = vrcp.f32 %v3175_v10 }
0x2085   :  { %v4005_v11 = vpop.eup %4004 }
0x2086   :  { %3180 = vst [vmem:[#allocation17] sm:$0xff] %v4005_v11 }
0x2089   :  { %v4007_v12 = vpop.eup %4006 }
0x208a   :  { %3181 = vst [vmem:[#allocation17 + $0x8] sm:$0xff] %v4007_v12 }
0x208b   :  { %4139 = shalt.err (!%p4136_p6)
}
0x208c   :  { %3193 = dma.vmem_to_hbm [thread:$0]  %s3188_s13, 256, %s4854_s10, [#allocation8], %s4163_s27, %s4163_s27, %s4164_s28  }
0x208d   :  { %4156 = dma.done.wait [#allocation8], 256  }
0x208e   :  { %4157 = vsyncadd [#allocation8], 4294967040 }
0x208f   :  { %3197 = vsyncpa [#allocation7], 1 }
0x2090   :  { %3198 = vsyncpa [#allocation10], 1 }
0x2091   :  { %3199 = vsyncpa [#allocation13], 1 }
0x2092   :  { %3200 = vsyncpa [#allocation16], 1 }
0x2093   :  { %3201 = vsyncpa [#allocation8], 1 }

</bundles_post_ra>
